<compile_context>
chip_gen: v7x
topology: tpu7x:2x2x1
jax: 0.10.0
libtpu: 0.0.40
codegen_flags: <defaults>
</compile_context>

<pallas_src>
import numpy as np

import jax
import jax.numpy as jnp
from jax.experimental import pallas as pl
from jax.experimental.pallas import tpu as pltpu


# ----------------------------------------------------------------------------
# Pallas kernels
# ----------------------------------------------------------------------------
def _toeplitz_conv_kernel(x_ref, t_ref, b_ref, o_ref):
    """One image of 5x5 valid conv + bias + ReLU as 5 row-tap MXU matmuls.

    x_ref: (1, H, W*Cin)         activation, lane-dense bf16
    t_ref: (5, W*Cin, Wo*Cout)   banded-Toeplitz weights (column taps folded in)
    b_ref: (1, Wo*Cout)          bias tiled along Wo, f32
    o_ref: (1, Ho, Wo*Cout)      relu(conv + bias), bf16
    """
    kh = t_ref.shape[0]
    ho = o_ref.shape[1]
    acc = None
    for i in range(kh):                       # static unroll: 5 matmuls
        piece = x_ref[0, i:i + ho, :]         # sublane-shifted in-VMEM slice
        y = jnp.dot(piece, t_ref[i], preferred_element_type=jnp.float32)
        acc = y if acc is None else acc + y
    acc = jnp.maximum(acc + b_ref[...], 0.0)  # bias + ReLU once, in f32
    o_ref[0, :, :] = acc.astype(o_ref.dtype)


def _mlp_kernel(x_ref, w1_ref, b1_ref, w2_ref, b2_ref, o_ref):
    """Fused classifier: relu(x @ w1 + b1) @ w2 + b2."""
    h = jnp.dot(x_ref[...], w1_ref[...], preferred_element_type=jnp.float32)
    h = jnp.maximum(h + b1_ref[...], 0.0).astype(w2_ref.dtype)
    o = jnp.dot(h, w2_ref[...], preferred_element_type=jnp.float32) + b2_ref[...]
    o_ref[...] = o.astype(o_ref.dtype)


def toeplitz_conv(x, t, b):
    """Per-image batch grid; Toeplitz weights / bias stay VMEM-resident."""
    B, H, lin = x.shape
    kh, _, n = t.shape
    ho = H - kh + 1
    return pl.pallas_call(
        _toeplitz_conv_kernel,
        grid=(B,),
        in_specs=[pl.BlockSpec((1, H, lin), lambda i: (i, 0, 0)),
                  pl.BlockSpec((kh, lin, n), lambda i: (0, 0, 0)),
                  pl.BlockSpec((1, n), lambda i: (0, 0))],
        out_specs=pl.BlockSpec((1, ho, n), lambda i: (i, 0, 0)),
        out_shape=jax.ShapeDtypeStruct((B, ho, n), jnp.bfloat16),
        compiler_params=pltpu.CompilerParams(dimension_semantics=("parallel",)),
    )(x, t, b)


def mlp(x, w1, b1, w2, b2):
    B, K = x.shape
    n1, n2 = w1.shape[1], w2.shape[1]
    tm = B if B <= 512 else 512
    return pl.pallas_call(
        _mlp_kernel,
        grid=(pl.cdiv(B, tm),),
        in_specs=[pl.BlockSpec((tm, K), lambda i: (i, 0)),
                  pl.BlockSpec((K, n1), lambda i: (0, 0)),
                  pl.BlockSpec((1, n1), lambda i: (0, 0)),
                  pl.BlockSpec((n1, n2), lambda i: (0, 0)),
                  pl.BlockSpec((1, n2), lambda i: (0, 0))],
        out_specs=pl.BlockSpec((tm, n2), lambda i: (i, 0)),
        out_shape=jax.ShapeDtypeStruct((B, n2), jnp.float32),
        compiler_params=pltpu.CompilerParams(dimension_semantics=("parallel",)),
    )(x, w1, b1, w2, b2)


# ----------------------------------------------------------------------------
# Tiny XLA glue: 2x2 max-pool on the lane-dense (B, Ho, Wo*C) layout
# ----------------------------------------------------------------------------
def _max_pool_2x2(y, wo, c):
    B, ho, _ = y.shape
    y = y.reshape(B, ho // 2, 2, wo // 2, 2, c)
    return jnp.max(y, axis=(2, 4)).reshape(B, ho // 2, (wo // 2) * c)


# ----------------------------------------------------------------------------
# Parameters: PyTorch-layout init + one-time host-side kernel-layout prep
# ----------------------------------------------------------------------------
def init_params(key):
    keys = jax.random.split(key, 10)

    def u(k, shape, fan_in):
        bound = 1.0 / float(fan_in) ** 0.5
        return jax.random.uniform(k, shape, jnp.float32, -bound, bound)

    return {
        "conv1_w": u(keys[0], (16, 1, 5, 5), 1 * 5 * 5),
        "conv1_b": u(keys[1], (16,), 1 * 5 * 5),
        "conv2_w": u(keys[2], (32, 16, 5, 5), 16 * 5 * 5),
        "conv2_b": u(keys[3], (32,), 16 * 5 * 5),
        "conv3_w": u(keys[4], (64, 32, 5, 5), 32 * 5 * 5),
        "conv3_b": u(keys[5], (64,), 32 * 5 * 5),
        "fc1_w": u(keys[6], (100, 64 * 3 * 3), 64 * 3 * 3),
        "fc1_b": u(keys[7], (100,), 64 * 3 * 3),
        "fc2_w": u(keys[8], (10, 100), 100),
        "fc2_b": u(keys[9], (10,), 100),
    }


def prepare_params(params):
    """One-time weight re-layout (host-side numpy, hoisted out of the fwd pass).

    Conv weights become banded block-Toeplitz matrices:
      T[i, w*Cin + c, wo*Cout + o] = W[o, c, i, w - wo]  if 0 <= w - wo < 5
    so the kernel only needs 5 row-shifted slices of the raw activation.
    """
    def toeplitz(w_oihw, w_in):
        w = np.asarray(w_oihw, np.float32)            # (Cout, Cin, KH, KW)
        cout, cin, kh, kw = w.shape
        wo = w_in - kw + 1
        t = np.zeros((kh, w_in * cin, wo * cout), np.float32)
        for i in range(kh):
            for j in range(kw):
                tap = w[:, :, i, j].T                  # (Cin, Cout)
                for oc in range(wo):
                    col = oc + j
                    t[i, col * cin:(col + 1) * cin,
                      oc * cout:(oc + 1) * cout] = tap
        return jnp.asarray(t, jnp.bfloat16)

    def bias_row(b, wo):
        return jnp.asarray(np.tile(np.asarray(b, np.float32), wo)[None, :])

    pp = {
        "c1_t": toeplitz(params["conv1_w"], 28), "c1_b": bias_row(params["conv1_b"], 24),
        "c2_t": toeplitz(params["conv2_w"], 24), "c2_b": bias_row(params["conv2_b"], 20),
        "c3_t": toeplitz(params["conv3_w"], 10), "c3_b": bias_row(params["conv3_b"], 6),
    }
    # fc1: fold torch's NCHW flatten (c*9 + h*3 + w) into the weights so the
    # classifier consumes the kernel's (h, w, c) lane-dense flatten directly.
    w1 = np.asarray(params["fc1_w"], np.float32).reshape(100, 64, 3, 3)  # [o,c,h,w]
    pp["fc1_w"] = jnp.asarray(np.transpose(w1, (2, 3, 1, 0)).reshape(576, 100),
                              jnp.bfloat16)
    pp["fc1_b"] = jnp.asarray(np.asarray(params["fc1_b"], np.float32)[None, :])
    pp["fc2_w"] = jnp.asarray(np.asarray(params["fc2_w"], np.float32).T, jnp.bfloat16)
    pp["fc2_b"] = jnp.asarray(np.asarray(params["fc2_b"], np.float32)[None, :])
    return pp


# ----------------------------------------------------------------------------
# Forward pass
# ----------------------------------------------------------------------------
@jax.jit
def cnn_forward(pp, x_nchw):
    B = x_nchw.shape[0]
    x = x_nchw.reshape(B, 28, 28).astype(jnp.bfloat16)     # (B, H, W*Cin), Cin=1

    a1 = toeplitz_conv(x, pp["c1_t"], pp["c1_b"])          # (B, 24, 24*16)
    a2 = toeplitz_conv(a1, pp["c2_t"], pp["c2_b"])         # (B, 20, 20*32)
    a2 = _max_pool_2x2(a2, 20, 32)                         # (B, 10, 10*32)
    a3 = toeplitz_conv(a2, pp["c3_t"], pp["c3_b"])         # (B, 6, 6*64)
    a3 = _max_pool_2x2(a3, 6, 64)                          # (B, 3, 3*64)

    return mlp(a3.reshape(B, 3 * 3 * 64), pp["fc1_w"], pp["fc1_b"],
               pp["fc2_w"], pp["fc2_b"])                   # (B, 10)


def cnn_reference(params, x_nchw):
    """Pure-JAX f32 reference (XLA conv/pool) used only to self-check kernels."""
    def conv(x, w, b):
        y = jax.lax.conv_general_dilated(
            x, w, (1, 1), "VALID", dimension_numbers=("NCHW", "OIHW", "NCHW"))
        return jax.nn.relu(y + b[None, :, None, None])

    def pool(x):
        return jax.lax.reduce_window(x, -jnp.inf, jax.lax.max,
                                     (1, 1, 2, 2), (1, 1, 2, 2), "VALID")

    x = conv(x_nchw, params["conv1_w"], params["conv1_b"])
    x = pool(conv(x, params["conv2_w"], params["conv2_b"]))
    x = pool(conv(x, params["conv3_w"], params["conv3_b"]))
    flat = x.reshape(x.shape[0], -1)
    h = jax.nn.relu(flat @ params["fc1_w"].T + params["fc1_b"])
    return h @ params["fc2_w"].T + params["fc2_b"]


if __name__ == "__main__":
    key = jax.random.PRNGKey(0)
    pkey, xkey = jax.random.split(key)
    params = init_params(pkey)
    pp = prepare_params(params)        # one-time weight re-layout

    # Small batch; spatial must be 28x28 so the classifier's 64*3*3 matches.
    batch = 2
    x = jax.random.normal(xkey, (batch, 1, 28, 28), dtype=jnp.float32)

    out = jax.block_until_ready(cnn_forward(pp, x))
    ref = jax.block_until_ready(cnn_reference(params, x))

    assert out.shape == (batch, 10), out.shape
    max_err = float(jnp.max(jnp.abs(out - ref)))
    # bf16 activations/weights with f32 accumulation: expected err ~1e-3.
    if max_err > 2e-2:
        raise AssertionError(f"Pallas vs reference mismatch: max abs err = {max_err}")
    print("KERNEL_OK")
</pallas_src>

<mosaic_0001>
module attributes {stable_mosaic.version = 11 : i64} {
  func.func @_toeplitz_conv_kernel(%arg0: i32, %arg1: memref<1x28x28xbf16, #tpu.memory_space<vmem>>, %arg2: memref<5x28x384xbf16, #tpu.memory_space<vmem>>, %arg3: memref<1x384xf32, #tpu.memory_space<vmem>>, %arg4: memref<1x24x384xbf16, #tpu.memory_space<vmem>>) attributes {dimension_semantics = [#tpu.dimension_semantics<parallel>], iteration_bounds = array<i64: 2>, scalar_prefetch = 0 : i64, scratch_operands = 0 : i64, tpu.core_type = #tpu.core_type<tc>, window_params = [{transform_indices = @transform_0, window_bounds = array<i64: 1, 28, 28>}, {pipeline_mode = #tpu.pipeline_mode<synchronous>, transform_indices = @transform_1, window_bounds = array<i64: 5, 28, 384>}, {pipeline_mode = #tpu.pipeline_mode<synchronous>, transform_indices = @transform_2, window_bounds = array<i64: 1, 384>}, {transform_indices = @transform_3, window_bounds = array<i64: 1, 24, 384>}]} {
    %c0 = arith.constant 0 : index
    %c0_0 = arith.constant 0 : index
    %c0_1 = arith.constant 0 : index
    %0 = vector.load %arg1[%c0, %c0_0, %c0_1] : memref<1x28x28xbf16, #tpu.memory_space<vmem>>, vector<1x24x28xbf16>
    %1 = vector.shape_cast %0 : vector<1x24x28xbf16> to vector<24x28xbf16>
    %c0_2 = arith.constant 0 : index
    %c0_3 = arith.constant 0 : index
    %c0_4 = arith.constant 0 : index
    %2 = vector.load %arg2[%c0_2, %c0_3, %c0_4] : memref<5x28x384xbf16, #tpu.memory_space<vmem>>, vector<1x28x384xbf16>
    %3 = vector.shape_cast %2 : vector<1x28x384xbf16> to vector<28x384xbf16>
    %cst = arith.constant dense<0.000000e+00> : vector<24x384xf32>
    %4 = tpu.matmul %1, %3, %cst {dimension_numbers = #tpu.dot_dimension_numbers<[1], [0], [0], [1], [0, 0, 1, 1], [], []>} : vector<24x28xbf16>, vector<28x384xbf16>, vector<24x384xf32> -> vector<24x384xf32>
    %c0_5 = arith.constant 0 : index
    %c1 = arith.constant 1 : index
    %c0_6 = arith.constant 0 : index
    %5 = vector.load %arg1[%c0_5, %c1, %c0_6] : memref<1x28x28xbf16, #tpu.memory_space<vmem>>, vector<1x24x28xbf16>
    %6 = vector.shape_cast %5 : vector<1x24x28xbf16> to vector<24x28xbf16>
    %c1_7 = arith.constant 1 : index
    %c0_8 = arith.constant 0 : index
    %c0_9 = arith.constant 0 : index
    %7 = vector.load %arg2[%c1_7, %c0_8, %c0_9] : memref<5x28x384xbf16, #tpu.memory_space<vmem>>, vector<1x28x384xbf16>
    %8 = vector.shape_cast %7 : vector<1x28x384xbf16> to vector<28x384xbf16>
    %cst_10 = arith.constant dense<0.000000e+00> : vector<24x384xf32>
    %9 = tpu.matmul %6, %8, %cst_10 {dimension_numbers = #tpu.dot_dimension_numbers<[1], [0], [0], [1], [0, 0, 1, 1], [], []>} : vector<24x28xbf16>, vector<28x384xbf16>, vector<24x384xf32> -> vector<24x384xf32>
    %10 = arith.addf %4, %9 : vector<24x384xf32>
    %c0_11 = arith.constant 0 : index
    %c2 = arith.constant 2 : index
    %c0_12 = arith.constant 0 : index
    %11 = vector.load %arg1[%c0_11, %c2, %c0_12] : memref<1x28x28xbf16, #tpu.memory_space<vmem>>, vector<1x24x28xbf16>
    %12 = vector.shape_cast %11 : vector<1x24x28xbf16> to vector<24x28xbf16>
    %c2_13 = arith.constant 2 : index
    %c0_14 = arith.constant 0 : index
    %c0_15 = arith.constant 0 : index
    %13 = vector.load %arg2[%c2_13, %c0_14, %c0_15] : memref<5x28x384xbf16, #tpu.memory_space<vmem>>, vector<1x28x384xbf16>
    %14 = vector.shape_cast %13 : vector<1x28x384xbf16> to vector<28x384xbf16>
    %cst_16 = arith.constant dense<0.000000e+00> : vector<24x384xf32>
    %15 = tpu.matmul %12, %14, %cst_16 {dimension_numbers = #tpu.dot_dimension_numbers<[1], [0], [0], [1], [0, 0, 1, 1], [], []>} : vector<24x28xbf16>, vector<28x384xbf16>, vector<24x384xf32> -> vector<24x384xf32>
    %16 = arith.addf %10, %15 : vector<24x384xf32>
    %c0_17 = arith.constant 0 : index
    %c3 = arith.constant 3 : index
    %c0_18 = arith.constant 0 : index
    %17 = vector.load %arg1[%c0_17, %c3, %c0_18] : memref<1x28x28xbf16, #tpu.memory_space<vmem>>, vector<1x24x28xbf16>
    %18 = vector.shape_cast %17 : vector<1x24x28xbf16> to vector<24x28xbf16>
    %c3_19 = arith.constant 3 : index
    %c0_20 = arith.constant 0 : index
    %c0_21 = arith.constant 0 : index
    %19 = vector.load %arg2[%c3_19, %c0_20, %c0_21] : memref<5x28x384xbf16, #tpu.memory_space<vmem>>, vector<1x28x384xbf16>
    %20 = vector.shape_cast %19 : vector<1x28x384xbf16> to vector<28x384xbf16>
    %cst_22 = arith.constant dense<0.000000e+00> : vector<24x384xf32>
    %21 = tpu.matmul %18, %20, %cst_22 {dimension_numbers = #tpu.dot_dimension_numbers<[1], [0], [0], [1], [0, 0, 1, 1], [], []>} : vector<24x28xbf16>, vector<28x384xbf16>, vector<24x384xf32> -> vector<24x384xf32>
    %22 = arith.addf %16, %21 : vector<24x384xf32>
    %c0_23 = arith.constant 0 : index
    %c4 = arith.constant 4 : index
    %c0_24 = arith.constant 0 : index
    %23 = vector.load %arg1[%c0_23, %c4, %c0_24] : memref<1x28x28xbf16, #tpu.memory_space<vmem>>, vector<1x24x28xbf16>
    %24 = vector.shape_cast %23 : vector<1x24x28xbf16> to vector<24x28xbf16>
    %c4_25 = arith.constant 4 : index
    %c0_26 = arith.constant 0 : index
    %c0_27 = arith.constant 0 : index
    %25 = vector.load %arg2[%c4_25, %c0_26, %c0_27] : memref<5x28x384xbf16, #tpu.memory_space<vmem>>, vector<1x28x384xbf16>
    %26 = vector.shape_cast %25 : vector<1x28x384xbf16> to vector<28x384xbf16>
    %cst_28 = arith.constant dense<0.000000e+00> : vector<24x384xf32>
    %27 = tpu.matmul %24, %26, %cst_28 {dimension_numbers = #tpu.dot_dimension_numbers<[1], [0], [0], [1], [0, 0, 1, 1], [], []>} : vector<24x28xbf16>, vector<28x384xbf16>, vector<24x384xf32> -> vector<24x384xf32>
    %28 = arith.addf %22, %27 : vector<24x384xf32>
    %c0_29 = arith.constant 0 : index
    %c0_30 = arith.constant 0 : index
    %29 = vector.load %arg3[%c0_29, %c0_30] : memref<1x384xf32, #tpu.memory_space<vmem>>, vector<1x384xf32>
    %30 = vector.broadcast %29 : vector<1x384xf32> to vector<24x384xf32>
    %31 = arith.addf %28, %30 : vector<24x384xf32>
    %cst_31 = arith.constant 0.000000e+00 : f32
    %32 = vector.broadcast %cst_31 : f32 to vector<24x384xf32>
    %33 = arith.maximumf %31, %32 : vector<24x384xf32>
    %34 = arith.truncf %33 : vector<24x384xf32> to vector<24x384xbf16>
    %c0_32 = arith.constant 0 : index
    %c0_33 = arith.constant 0 : index
    %c0_34 = arith.constant 0 : index
    %35 = vector.load %arg4[%c0_32, %c0_33, %c0_34] : memref<1x24x384xbf16, #tpu.memory_space<vmem>>, vector<1x24x384xbf16>
    %36 = vector.shape_cast %35 : vector<1x24x384xbf16> to vector<24x384xbf16>
    %37 = vector.shape_cast %34 : vector<24x384xbf16> to vector<1x24x384xbf16>
    tpu.vector_store %arg4[%c0_32, %c0_33, %c0_34], %37 {strides = array<i32>} : memref<1x24x384xbf16, #tpu.memory_space<vmem>>, vector<1x24x384xbf16>,
    return
  }
  func.func @transform_0(%arg0: i32) -> (i32, i32, i32) {
    %c0_i32 = arith.constant 0 : i32
    %c0_i32_0 = arith.constant 0 : i32
    %c0_i32_1 = arith.constant 0 : i32
    return %arg0, %c0_i32, %c0_i32_0 : i32, i32, i32
  }
  func.func @transform_1(%arg0: i32) -> (i32, i32, i32) {
    %c0_i32 = arith.constant 0 : i32
    %c0_i32_0 = arith.constant 0 : i32
    %c0_i32_1 = arith.constant 0 : i32
    %c0_i32_2 = arith.constant 0 : i32
    return %c0_i32, %c0_i32_0, %c0_i32_1 : i32, i32, i32
  }
  func.func @transform_2(%arg0: i32) -> (i32, i32) {
    %c0_i32 = arith.constant 0 : i32
    %c0_i32_0 = arith.constant 0 : i32
    %c0_i32_1 = arith.constant 0 : i32
    return %c0_i32, %c0_i32_0 : i32, i32
  }
  func.func @transform_3(%arg0: i32) -> (i32, i32, i32) {
    %c0_i32 = arith.constant 0 : i32
    %c0_i32_0 = arith.constant 0 : i32
    %c0_i32_1 = arith.constant 0 : i32
    return %arg0, %c0_i32, %c0_i32_0 : i32, i32, i32
  }
}

module attributes {stable_mosaic.version = 11 : i64} {
  func.func @_toeplitz_conv_kernel(%arg0: i32, %arg1: memref<1x24x384xbf16, #tpu.memory_space<vmem>>, %arg2: memref<5x384x640xbf16, #tpu.memory_space<vmem>>, %arg3: memref<1x640xf32, #tpu.memory_space<vmem>>, %arg4: memref<1x20x640xbf16, #tpu.memory_space<vmem>>) attributes {dimension_semantics = [#tpu.dimension_semantics<parallel>], iteration_bounds = array<i64: 2>, scalar_prefetch = 0 : i64, scratch_operands = 0 : i64, tpu.core_type = #tpu.core_type<tc>, window_params = [{transform_indices = @transform_0, window_bounds = array<i64: 1, 24, 384>}, {pipeline_mode = #tpu.pipeline_mode<synchronous>, transform_indices = @transform_1, window_bounds = array<i64: 5, 384, 640>}, {pipeline_mode = #tpu.pipeline_mode<synchronous>, transform_indices = @transform_2, window_bounds = array<i64: 1, 640>}, {transform_indices = @transform_3, window_bounds = array<i64: 1, 20, 640>}]} {
    %c0 = arith.constant 0 : index
    %c0_0 = arith.constant 0 : index
    %c0_1 = arith.constant 0 : index
    %0 = vector.load %arg1[%c0, %c0_0, %c0_1] : memref<1x24x384xbf16, #tpu.memory_space<vmem>>, vector<1x20x384xbf16>
    %1 = vector.shape_cast %0 : vector<1x20x384xbf16> to vector<20x384xbf16>
    %c0_2 = arith.constant 0 : index
    %c0_3 = arith.constant 0 : index
    %c0_4 = arith.constant 0 : index
    %2 = vector.load %arg2[%c0_2, %c0_3, %c0_4] : memref<5x384x640xbf16, #tpu.memory_space<vmem>>, vector<1x384x640xbf16>
    %3 = vector.shape_cast %2 : vector<1x384x640xbf16> to vector<384x640xbf16>
    %cst = arith.constant dense<0.000000e+00> : vector<20x640xf32>
    %4 = tpu.matmul %1, %3, %cst {dimension_numbers = #tpu.dot_dimension_numbers<[1], [0], [0], [1], [0, 0, 1, 1], [], []>} : vector<20x384xbf16>, vector<384x640xbf16>, vector<20x640xf32> -> vector<20x640xf32>
    %c0_5 = arith.constant 0 : index
    %c1 = arith.constant 1 : index
    %c0_6 = arith.constant 0 : index
    %5 = vector.load %arg1[%c0_5, %c1, %c0_6] : memref<1x24x384xbf16, #tpu.memory_space<vmem>>, vector<1x20x384xbf16>
    %6 = vector.shape_cast %5 : vector<1x20x384xbf16> to vector<20x384xbf16>
    %c1_7 = arith.constant 1 : index
    %c0_8 = arith.constant 0 : index
    %c0_9 = arith.constant 0 : index
    %7 = vector.load %arg2[%c1_7, %c0_8, %c0_9] : memref<5x384x640xbf16, #tpu.memory_space<vmem>>, vector<1x384x640xbf16>
    %8 = vector.shape_cast %7 : vector<1x384x640xbf16> to vector<384x640xbf16>
    %cst_10 = arith.constant dense<0.000000e+00> : vector<20x640xf32>
    %9 = tpu.matmul %6, %8, %cst_10 {dimension_numbers = #tpu.dot_dimension_numbers<[1], [0], [0], [1], [0, 0, 1, 1], [], []>} : vector<20x384xbf16>, vector<384x640xbf16>, vector<20x640xf32> -> vector<20x640xf32>
    %10 = arith.addf %4, %9 : vector<20x640xf32>
    %c0_11 = arith.constant 0 : index
    %c2 = arith.constant 2 : index
    %c0_12 = arith.constant 0 : index
    %11 = vector.load %arg1[%c0_11, %c2, %c0_12] : memref<1x24x384xbf16, #tpu.memory_space<vmem>>, vector<1x20x384xbf16>
    %12 = vector.shape_cast %11 : vector<1x20x384xbf16> to vector<20x384xbf16>
    %c2_13 = arith.constant 2 : index
    %c0_14 = arith.constant 0 : index
    %c0_15 = arith.constant 0 : index
    %13 = vector.load %arg2[%c2_13, %c0_14, %c0_15] : memref<5x384x640xbf16, #tpu.memory_space<vmem>>, vector<1x384x640xbf16>
    %14 = vector.shape_cast %13 : vector<1x384x640xbf16> to vector<384x640xbf16>
    %cst_16 = arith.constant dense<0.000000e+00> : vector<20x640xf32>
    %15 = tpu.matmul %12, %14, %cst_16 {dimension_numbers = #tpu.dot_dimension_numbers<[1], [0], [0], [1], [0, 0, 1, 1], [], []>} : vector<20x384xbf16>, vector<384x640xbf16>, vector<20x640xf32> -> vector<20x640xf32>
    %16 = arith.addf %10, %15 : vector<20x640xf32>
    %c0_17 = arith.constant 0 : index
    %c3 = arith.constant 3 : index
    %c0_18 = arith.constant 0 : index
    %17 = vector.load %arg1[%c0_17, %c3, %c0_18] : memref<1x24x384xbf16, #tpu.memory_space<vmem>>, vector<1x20x384xbf16>
    %18 = vector.shape_cast %17 : vector<1x20x384xbf16> to vector<20x384xbf16>
    %c3_19 = arith.constant 3 : index
    %c0_20 = arith.constant 0 : index
    %c0_21 = arith.constant 0 : index
    %19 = vector.load %arg2[%c3_19, %c0_20, %c0_21] : memref<5x384x640xbf16, #tpu.memory_space<vmem>>, vector<1x384x640xbf16>
    %20 = vector.shape_cast %19 : vector<1x384x640xbf16> to vector<384x640xbf16>
    %cst_22 = arith.constant dense<0.000000e+00> : vector<20x640xf32>
    %21 = tpu.matmul %18, %20, %cst_22 {dimension_numbers = #tpu.dot_dimension_numbers<[1], [0], [0], [1], [0, 0, 1, 1], [], []>} : vector<20x384xbf16>, vector<384x640xbf16>, vector<20x640xf32> -> vector<20x640xf32>
    %22 = arith.addf %16, %21 : vector<20x640xf32>
    %c0_23 = arith.constant 0 : index
    %c4 = arith.constant 4 : index
    %c0_24 = arith.constant 0 : index
    %23 = vector.load %arg1[%c0_23, %c4, %c0_24] : memref<1x24x384xbf16, #tpu.memory_space<vmem>>, vector<1x20x384xbf16>
    %24 = vector.shape_cast %23 : vector<1x20x384xbf16> to vector<20x384xbf16>
    %c4_25 = arith.constant 4 : index
    %c0_26 = arith.constant 0 : index
    %c0_27 = arith.constant 0 : index
    %25 = vector.load %arg2[%c4_25, %c0_26, %c0_27] : memref<5x384x640xbf16, #tpu.memory_space<vmem>>, vector<1x384x640xbf16>
    %26 = vector.shape_cast %25 : vector<1x384x640xbf16> to vector<384x640xbf16>
    %cst_28 = arith.constant dense<0.000000e+00> : vector<20x640xf32>
    %27 = tpu.matmul %24, %26, %cst_28 {dimension_numbers = #tpu.dot_dimension_numbers<[1], [0], [0], [1], [0, 0, 1, 1], [], []>} : vector<20x384xbf16>, vector<384x640xbf16>, vector<20x640xf32> -> vector<20x640xf32>
    %28 = arith.addf %22, %27 : vector<20x640xf32>
    %c0_29 = arith.constant 0 : index
    %c0_30 = arith.constant 0 : index
    %29 = vector.load %arg3[%c0_29, %c0_30] : memref<1x640xf32, #tpu.memory_space<vmem>>, vector<1x640xf32>
    %30 = vector.broadcast %29 : vector<1x640xf32> to vector<20x640xf32>
    %31 = arith.addf %28, %30 : vector<20x640xf32>
    %cst_31 = arith.constant 0.000000e+00 : f32
    %32 = vector.broadcast %cst_31 : f32 to vector<20x640xf32>
    %33 = arith.maximumf %31, %32 : vector<20x640xf32>
    %34 = arith.truncf %33 : vector<20x640xf32> to vector<20x640xbf16>
    %c0_32 = arith.constant 0 : index
    %c0_33 = arith.constant 0 : index
    %c0_34 = arith.constant 0 : index
    %35 = vector.load %arg4[%c0_32, %c0_33, %c0_34] : memref<1x20x640xbf16, #tpu.memory_space<vmem>>, vector<1x20x640xbf16>
    %36 = vector.shape_cast %35 : vector<1x20x640xbf16> to vector<20x640xbf16>
    %37 = vector.shape_cast %34 : vector<20x640xbf16> to vector<1x20x640xbf16>
    tpu.vector_store %arg4[%c0_32, %c0_33, %c0_34], %37 {strides = array<i32>} : memref<1x20x640xbf16, #tpu.memory_space<vmem>>, vector<1x20x640xbf16>,
    return
  }
  func.func @transform_0(%arg0: i32) -> (i32, i32, i32) {
    %c0_i32 = arith.constant 0 : i32
    %c0_i32_0 = arith.constant 0 : i32
    %c0_i32_1 = arith.constant 0 : i32
    return %arg0, %c0_i32, %c0_i32_0 : i32, i32, i32
  }
  func.func @transform_1(%arg0: i32) -> (i32, i32, i32) {
    %c0_i32 = arith.constant 0 : i32
    %c0_i32_0 = arith.constant 0 : i32
    %c0_i32_1 = arith.constant 0 : i32
    %c0_i32_2 = arith.constant 0 : i32
    return %c0_i32, %c0_i32_0, %c0_i32_1 : i32, i32, i32
  }
  func.func @transform_2(%arg0: i32) -> (i32, i32) {
    %c0_i32 = arith.constant 0 : i32
    %c0_i32_0 = arith.constant 0 : i32
    %c0_i32_1 = arith.constant 0 : i32
    return %c0_i32, %c0_i32_0 : i32, i32
  }
  func.func @transform_3(%arg0: i32) -> (i32, i32, i32) {
    %c0_i32 = arith.constant 0 : i32
    %c0_i32_0 = arith.constant 0 : i32
    %c0_i32_1 = arith.constant 0 : i32
    return %arg0, %c0_i32, %c0_i32_0 : i32, i32, i32
  }
}

module attributes {stable_mosaic.version = 11 : i64} {
  func.func @_toeplitz_conv_kernel(%arg0: i32, %arg1: memref<1x10x320xbf16, #tpu.memory_space<vmem>>, %arg2: memref<5x320x384xbf16, #tpu.memory_space<vmem>>, %arg3: memref<1x384xf32, #tpu.memory_space<vmem>>, %arg4: memref<1x6x384xbf16, #tpu.memory_space<vmem>>) attributes {dimension_semantics = [#tpu.dimension_semantics<parallel>], iteration_bounds = array<i64: 2>, scalar_prefetch = 0 : i64, scratch_operands = 0 : i64, tpu.core_type = #tpu.core_type<tc>, window_params = [{transform_indices = @transform_0, window_bounds = array<i64: 1, 10, 320>}, {pipeline_mode = #tpu.pipeline_mode<synchronous>, transform_indices = @transform_1, window_bounds = array<i64: 5, 320, 384>}, {pipeline_mode = #tpu.pipeline_mode<synchronous>, transform_indices = @transform_2, window_bounds = array<i64: 1, 384>}, {transform_indices = @transform_3, window_bounds = array<i64: 1, 6, 384>}]} {
    %c0 = arith.constant 0 : index
    %c0_0 = arith.constant 0 : index
    %c0_1 = arith.constant 0 : index
    %0 = vector.load %arg1[%c0, %c0_0, %c0_1] : memref<1x10x320xbf16, #tpu.memory_space<vmem>>, vector<1x6x320xbf16>
    %1 = vector.shape_cast %0 : vector<1x6x320xbf16> to vector<6x320xbf16>
    %c0_2 = arith.constant 0 : index
    %c0_3 = arith.constant 0 : index
    %c0_4 = arith.constant 0 : index
    %2 = vector.load %arg2[%c0_2, %c0_3, %c0_4] : memref<5x320x384xbf16, #tpu.memory_space<vmem>>, vector<1x320x384xbf16>
    %3 = vector.shape_cast %2 : vector<1x320x384xbf16> to vector<320x384xbf16>
    %cst = arith.constant dense<0.000000e+00> : vector<6x384xf32>
    %4 = tpu.matmul %1, %3, %cst {dimension_numbers = #tpu.dot_dimension_numbers<[1], [0], [0], [1], [0, 0, 1, 1], [], []>} : vector<6x320xbf16>, vector<320x384xbf16>, vector<6x384xf32> -> vector<6x384xf32>
    %c0_5 = arith.constant 0 : index
    %c1 = arith.constant 1 : index
    %c0_6 = arith.constant 0 : index
    %5 = vector.load %arg1[%c0_5, %c1, %c0_6] : memref<1x10x320xbf16, #tpu.memory_space<vmem>>, vector<1x6x320xbf16>
    %6 = vector.shape_cast %5 : vector<1x6x320xbf16> to vector<6x320xbf16>
    %c1_7 = arith.constant 1 : index
    %c0_8 = arith.constant 0 : index
    %c0_9 = arith.constant 0 : index
    %7 = vector.load %arg2[%c1_7, %c0_8, %c0_9] : memref<5x320x384xbf16, #tpu.memory_space<vmem>>, vector<1x320x384xbf16>
    %8 = vector.shape_cast %7 : vector<1x320x384xbf16> to vector<320x384xbf16>
    %cst_10 = arith.constant dense<0.000000e+00> : vector<6x384xf32>
    %9 = tpu.matmul %6, %8, %cst_10 {dimension_numbers = #tpu.dot_dimension_numbers<[1], [0], [0], [1], [0, 0, 1, 1], [], []>} : vector<6x320xbf16>, vector<320x384xbf16>, vector<6x384xf32> -> vector<6x384xf32>
    %10 = arith.addf %4, %9 : vector<6x384xf32>
    %c0_11 = arith.constant 0 : index
    %c2 = arith.constant 2 : index
    %c0_12 = arith.constant 0 : index
    %11 = vector.load %arg1[%c0_11, %c2, %c0_12] : memref<1x10x320xbf16, #tpu.memory_space<vmem>>, vector<1x6x320xbf16>
    %12 = vector.shape_cast %11 : vector<1x6x320xbf16> to vector<6x320xbf16>
    %c2_13 = arith.constant 2 : index
    %c0_14 = arith.constant 0 : index
    %c0_15 = arith.constant 0 : index
    %13 = vector.load %arg2[%c2_13, %c0_14, %c0_15] : memref<5x320x384xbf16, #tpu.memory_space<vmem>>, vector<1x320x384xbf16>
    %14 = vector.shape_cast %13 : vector<1x320x384xbf16> to vector<320x384xbf16>
    %cst_16 = arith.constant dense<0.000000e+00> : vector<6x384xf32>
    %15 = tpu.matmul %12, %14, %cst_16 {dimension_numbers = #tpu.dot_dimension_numbers<[1], [0], [0], [1], [0, 0, 1, 1], [], []>} : vector<6x320xbf16>, vector<320x384xbf16>, vector<6x384xf32> -> vector<6x384xf32>
    %16 = arith.addf %10, %15 : vector<6x384xf32>
    %c0_17 = arith.constant 0 : index
    %c3 = arith.constant 3 : index
    %c0_18 = arith.constant 0 : index
    %17 = vector.load %arg1[%c0_17, %c3, %c0_18] : memref<1x10x320xbf16, #tpu.memory_space<vmem>>, vector<1x6x320xbf16>
    %18 = vector.shape_cast %17 : vector<1x6x320xbf16> to vector<6x320xbf16>
    %c3_19 = arith.constant 3 : index
    %c0_20 = arith.constant 0 : index
    %c0_21 = arith.constant 0 : index
    %19 = vector.load %arg2[%c3_19, %c0_20, %c0_21] : memref<5x320x384xbf16, #tpu.memory_space<vmem>>, vector<1x320x384xbf16>
    %20 = vector.shape_cast %19 : vector<1x320x384xbf16> to vector<320x384xbf16>
    %cst_22 = arith.constant dense<0.000000e+00> : vector<6x384xf32>
    %21 = tpu.matmul %18, %20, %cst_22 {dimension_numbers = #tpu.dot_dimension_numbers<[1], [0], [0], [1], [0, 0, 1, 1], [], []>} : vector<6x320xbf16>, vector<320x384xbf16>, vector<6x384xf32> -> vector<6x384xf32>
    %22 = arith.addf %16, %21 : vector<6x384xf32>
    %c0_23 = arith.constant 0 : index
    %c4 = arith.constant 4 : index
    %c0_24 = arith.constant 0 : index
    %23 = vector.load %arg1[%c0_23, %c4, %c0_24] : memref<1x10x320xbf16, #tpu.memory_space<vmem>>, vector<1x6x320xbf16>
    %24 = vector.shape_cast %23 : vector<1x6x320xbf16> to vector<6x320xbf16>
    %c4_25 = arith.constant 4 : index
    %c0_26 = arith.constant 0 : index
    %c0_27 = arith.constant 0 : index
    %25 = vector.load %arg2[%c4_25, %c0_26, %c0_27] : memref<5x320x384xbf16, #tpu.memory_space<vmem>>, vector<1x320x384xbf16>
    %26 = vector.shape_cast %25 : vector<1x320x384xbf16> to vector<320x384xbf16>
    %cst_28 = arith.constant dense<0.000000e+00> : vector<6x384xf32>
    %27 = tpu.matmul %24, %26, %cst_28 {dimension_numbers = #tpu.dot_dimension_numbers<[1], [0], [0], [1], [0, 0, 1, 1], [], []>} : vector<6x320xbf16>, vector<320x384xbf16>, vector<6x384xf32> -> vector<6x384xf32>
    %28 = arith.addf %22, %27 : vector<6x384xf32>
    %c0_29 = arith.constant 0 : index
    %c0_30 = arith.constant 0 : index
    %29 = vector.load %arg3[%c0_29, %c0_30] : memref<1x384xf32, #tpu.memory_space<vmem>>, vector<1x384xf32>
    %30 = vector.broadcast %29 : vector<1x384xf32> to vector<6x384xf32>
    %31 = arith.addf %28, %30 : vector<6x384xf32>
    %cst_31 = arith.constant 0.000000e+00 : f32
    %32 = vector.broadcast %cst_31 : f32 to vector<6x384xf32>
    %33 = arith.maximumf %31, %32 : vector<6x384xf32>
    %34 = arith.truncf %33 : vector<6x384xf32> to vector<6x384xbf16>
    %c0_32 = arith.constant 0 : index
    %c0_33 = arith.constant 0 : index
    %c0_34 = arith.constant 0 : index
    %35 = vector.load %arg4[%c0_32, %c0_33, %c0_34] : memref<1x6x384xbf16, #tpu.memory_space<vmem>>, vector<1x6x384xbf16>
    %36 = vector.shape_cast %35 : vector<1x6x384xbf16> to vector<6x384xbf16>
    %37 = vector.shape_cast %34 : vector<6x384xbf16> to vector<1x6x384xbf16>
    tpu.vector_store %arg4[%c0_32, %c0_33, %c0_34], %37 {strides = array<i32>} : memref<1x6x384xbf16, #tpu.memory_space<vmem>>, vector<1x6x384xbf16>,
    return
  }
  func.func @transform_0(%arg0: i32) -> (i32, i32, i32) {
    %c0_i32 = arith.constant 0 : i32
    %c0_i32_0 = arith.constant 0 : i32
    %c0_i32_1 = arith.constant 0 : i32
    return %arg0, %c0_i32, %c0_i32_0 : i32, i32, i32
  }
  func.func @transform_1(%arg0: i32) -> (i32, i32, i32) {
    %c0_i32 = arith.constant 0 : i32
    %c0_i32_0 = arith.constant 0 : i32
    %c0_i32_1 = arith.constant 0 : i32
    %c0_i32_2 = arith.constant 0 : i32
    return %c0_i32, %c0_i32_0, %c0_i32_1 : i32, i32, i32
  }
  func.func @transform_2(%arg0: i32) -> (i32, i32) {
    %c0_i32 = arith.constant 0 : i32
    %c0_i32_0 = arith.constant 0 : i32
    %c0_i32_1 = arith.constant 0 : i32
    return %c0_i32, %c0_i32_0 : i32, i32
  }
  func.func @transform_3(%arg0: i32) -> (i32, i32, i32) {
    %c0_i32 = arith.constant 0 : i32
    %c0_i32_0 = arith.constant 0 : i32
    %c0_i32_1 = arith.constant 0 : i32
    return %arg0, %c0_i32, %c0_i32_0 : i32, i32, i32
  }
}

module attributes {stable_mosaic.version = 11 : i64} {
  func.func @_mlp_kernel(%arg0: i32, %arg1: memref<2x576xbf16, #tpu.memory_space<vmem>>, %arg2: memref<576x100xbf16, #tpu.memory_space<vmem>>, %arg3: memref<1x100xf32, #tpu.memory_space<vmem>>, %arg4: memref<100x10xbf16, #tpu.memory_space<vmem>>, %arg5: memref<1x10xf32, #tpu.memory_space<vmem>>, %arg6: memref<2x10xf32, #tpu.memory_space<vmem>>) attributes {dimension_semantics = [#tpu.dimension_semantics<parallel>], iteration_bounds = array<i64: 1>, scalar_prefetch = 0 : i64, scratch_operands = 0 : i64, tpu.core_type = #tpu.core_type<tc>, window_params = [{transform_indices = @transform_0, window_bounds = array<i64: 2, 576>}, {pipeline_mode = #tpu.pipeline_mode<synchronous>, transform_indices = @transform_1, window_bounds = array<i64: 576, 100>}, {pipeline_mode = #tpu.pipeline_mode<synchronous>, transform_indices = @transform_2, window_bounds = array<i64: 1, 100>}, {pipeline_mode = #tpu.pipeline_mode<synchronous>, transform_indices = @transform_3, window_bounds = array<i64: 100, 10>}, {pipeline_mode = #tpu.pipeline_mode<synchronous>, transform_indices = @transform_4, window_bounds = array<i64: 1, 10>}, {transform_indices = @transform_5, window_bounds = array<i64: 2, 10>}]} {
    %c0 = arith.constant 0 : index
    %c0_0 = arith.constant 0 : index
    %0 = vector.load %arg1[%c0, %c0_0] : memref<2x576xbf16, #tpu.memory_space<vmem>>, vector<2x576xbf16>
    %c0_1 = arith.constant 0 : index
    %c0_2 = arith.constant 0 : index
    %1 = vector.load %arg2[%c0_1, %c0_2] : memref<576x100xbf16, #tpu.memory_space<vmem>>, vector<576x100xbf16>
    %cst = arith.constant dense<0.000000e+00> : vector<2x100xf32>
    %2 = tpu.matmul %0, %1, %cst {dimension_numbers = #tpu.dot_dimension_numbers<[1], [0], [0], [1], [0, 0, 1, 1], [], []>} : vector<2x576xbf16>, vector<576x100xbf16>, vector<2x100xf32> -> vector<2x100xf32>
    %c0_3 = arith.constant 0 : index
    %c0_4 = arith.constant 0 : index
    %3 = vector.load %arg3[%c0_3, %c0_4] : memref<1x100xf32, #tpu.memory_space<vmem>>, vector<1x100xf32>
    %4 = vector.broadcast %3 : vector<1x100xf32> to vector<2x100xf32>
    %5 = arith.addf %2, %4 : vector<2x100xf32>
    %cst_5 = arith.constant 0.000000e+00 : f32
    %6 = vector.broadcast %cst_5 : f32 to vector<2x100xf32>
    %7 = arith.maximumf %5, %6 : vector<2x100xf32>
    %8 = arith.truncf %7 : vector<2x100xf32> to vector<2x100xbf16>
    %c0_6 = arith.constant 0 : index
    %c0_7 = arith.constant 0 : index
    %9 = vector.load %arg4[%c0_6, %c0_7] : memref<100x10xbf16, #tpu.memory_space<vmem>>, vector<100x10xbf16>
    %cst_8 = arith.constant dense<0.000000e+00> : vector<2x10xf32>
    %10 = tpu.matmul %8, %9, %cst_8 {dimension_numbers = #tpu.dot_dimension_numbers<[1], [0], [0], [1], [0, 0, 1, 1], [], []>} : vector<2x100xbf16>, vector<100x10xbf16>, vector<2x10xf32> -> vector<2x10xf32>
    %c0_9 = arith.constant 0 : index
    %c0_10 = arith.constant 0 : index
    %11 = vector.load %arg5[%c0_9, %c0_10] : memref<1x10xf32, #tpu.memory_space<vmem>>, vector<1x10xf32>
    %12 = vector.broadcast %11 : vector<1x10xf32> to vector<2x10xf32>
    %13 = arith.addf %10, %12 : vector<2x10xf32>
    %c0_11 = arith.constant 0 : index
    %c0_12 = arith.constant 0 : index
    %14 = vector.load %arg6[%c0_11, %c0_12] : memref<2x10xf32, #tpu.memory_space<vmem>>, vector<2x10xf32>
    tpu.vector_store %arg6[%c0_11, %c0_12], %13 {strides = array<i32>} : memref<2x10xf32, #tpu.memory_space<vmem>>, vector<2x10xf32>,
    return
  }
  func.func @transform_0(%arg0: i32) -> (i32, i32) {
    %c0_i32 = arith.constant 0 : i32
    %c0_i32_0 = arith.constant 0 : i32
    return %arg0, %c0_i32 : i32, i32
  }
  func.func @transform_1(%arg0: i32) -> (i32, i32) {
    %c0_i32 = arith.constant 0 : i32
    %c0_i32_0 = arith.constant 0 : i32
    %c0_i32_1 = arith.constant 0 : i32
    return %c0_i32, %c0_i32_0 : i32, i32
  }
  func.func @transform_2(%arg0: i32) -> (i32, i32) {
    %c0_i32 = arith.constant 0 : i32
    %c0_i32_0 = arith.constant 0 : i32
    %c0_i32_1 = arith.constant 0 : i32
    return %c0_i32, %c0_i32_0 : i32, i32
  }
  func.func @transform_3(%arg0: i32) -> (i32, i32) {
    %c0_i32 = arith.constant 0 : i32
    %c0_i32_0 = arith.constant 0 : i32
    %c0_i32_1 = arith.constant 0 : i32
    return %c0_i32, %c0_i32_0 : i32, i32
  }
  func.func @transform_4(%arg0: i32) -> (i32, i32) {
    %c0_i32 = arith.constant 0 : i32
    %c0_i32_0 = arith.constant 0 : i32
    %c0_i32_1 = arith.constant 0 : i32
    return %c0_i32, %c0_i32_0 : i32, i32
  }
  func.func @transform_5(%arg0: i32) -> (i32, i32) {
    %c0_i32 = arith.constant 0 : i32
    %c0_i32_0 = arith.constant 0 : i32
    return %arg0, %c0_i32 : i32, i32
  }
}

</mosaic_0001>

<bundles_post_ra>
// kernel: cnn_forward.4
= control target key start
LH: loop header
LB: loop body
LE: loop exit
PB: predicated region body
PF: predicated region fallthrough
CT: control target
= control target key end

     0   :  { %8 = vsyncpa [#allocation3], 0  ;;  %s1741_s0 = inlined_call_operand.vmem [shape: bf16[2,28,28], index: 0, kind: input, shape index: {}]   ;;  %s1742_s1 = inlined_call_operand.hbm [shape: bf16[5,28,384], index: 1, kind: input, shape index: {}]   ;;  %s1743_s2 = inlined_call_operand.hbm [shape: f32[1,384], index: 2, kind: input, shape index: {}]   ;;  %s1744_s3 = inlined_call_operand.vmem [shape: bf16[2,24,384], index: 3, kind: output, shape index: {}]  }
   0x1   :  { %9 = vsyncpa [#allocation5], 0  ;;  %s1552_s12 = smov 0  }
   0x2 LB: > { %s1558_s13 = sadd.s32 4294967295, %s1525_s12   ;;  %p1209_p0 = scmp.ge.s32.totalorder %s1525_s12, 1  ;;  %s1525_s12 = sphi %s1552_s12, %s15_s12  }
   0x3   : > { %p114_p1 = scmp.lt.s32.totalorder %s1525_s12, 3  ;;  %s1527_s14 = smov [#allocation2]  }
   0x4   : > { %s126_s15 = sshll.u32 %s1527_s14, 4  ;;  %p1745_p3 = scmp.eq.s32.totalorder %s1558_s13, 0  ;;  %s127_s15 = int_to_ptr.vmem [resolvable:$true] %s126_s15 }
   0x5   : > { %p1562_p2 = pnand %p1209_p0, %p114_p1  ;;  %s1528_s17 = smov [#allocation4]  }
   0x6   : > { %s140_s18 = sshll.u32 %s1528_s17, 4  ;;  %s1455_s22 = scalar_lea.hbm %s1742_s1, 3840  ;;  %s1575_s18 = int_to_ptr.vmem [resolvable:$true] %s140_s18 }
   0x7   : > { %s1747_s16 = scalar_select %p1562_p2, 1, 0 }
   0x8   : > { %p1385_p4 = pneg %p1562_p2  ;;  %p1456_p6 = scmp.ne.s32.totalorder %s1742_s1, %s1455_s22 }
   0x9   : > { %p1462_p10 = scmp.lt.u32.totalorder %s1455_s22, %s1742_s1 }
   0xa   : > { %p1571_p5 = pnand %p1745_p3, %p1385_p4 }
   0xc   : > { %p1457_p7 = pneg %p1571_p5 }
   0xe   : > { %p1458_p8 = pnand %p1457_p7, %p1456_p6 }
  0x10   : > { %p1459_p9 = pneg %p1458_p8 }
  0x12   : > { %p1464_p11 = pnand %p1462_p10, %p1459_p9 }
  0x14   : > { %1467 = shalt.err (!%p1464_p11)
}
  0x15   : > { %s1468_s27 = scalar_lea.vmem %s127_s15, 3840  ;;  %p1476_p1 = scmp.lt.s32.totalorder %s127_s15, %s127_s15 }
  0x16   : > { %p1469_p12 = scmp.ne.s32.totalorder %s127_s15, %s1468_s27  ;;  %p1477_p4 = scmp.lt.s32.totalorder %s1468_s27, %s1468_s27 }
  0x18   : > { %p1471_p13 = pnand %p1469_p12, %p1457_p7  ;;  %p1478_p3 = por %p1477_p4, %p1476_p1 }
  0x1a   : > { %p1472_p0 = pneg %p1471_p13 }
  0x1c   : > { %p1479_p2 = pnand %p1478_p3, %p1472_p0 }
  0x1e   : > { %1482 = shalt.err (!%p1479_p2)
}
  0x1f   : > { %s1529_s28 = smov 192   ;;  %s1530_s29 = smov 12  }
  0x20   : > { %1388 = dma.hbm_to_vmem [thread:$0]  (!%p1571_p5), %s1742_s1, 3840, %s127_s15, [#allocation3], %s1529_s28, %s1529_s28, %s1530_s29  }
  0x21   : > { %s1483_s7 = scalar_lea.hbm %s1743_s2, 48 }
  0x22   : > { %p1484_p6 = scmp.ne.s32.totalorder %s1743_s2, %s1483_s7  ;;  %p1490_p8 = scmp.lt.u32.totalorder %s1483_s7, %s1743_s2 }
  0x24   : > { %p1486_p2 = pnand %p1484_p6, %p1457_p7 }
  0x26   : > { %p1487_p3 = pneg %p1486_p2 }
  0x28   : > { %p1492_p9 = pnand %p1490_p8, %p1487_p3 }
  0x2a   : > { %1495 = shalt.err (!%p1492_p9)
}
  0x2b   : > { %s1496_s14 = scalar_lea.vmem %s1575_s18, 48  ;;  %s1503_s15 = scalar_lea.vmem %s1575_s18, 64 }
  0x2c   : > { %p1497_p10 = scmp.ne.s32.totalorder %s1575_s18, %s1496_s14  ;;  %p1504_p13 = scmp.lt.s32.totalorder %s1575_s18, %s1575_s18 }
  0x2d   : > { %p1505_p0 = scmp.lt.s32.totalorder %s1503_s15, %s1496_s14 }
  0x2e   : > { %p1499_p11 = pnand %p1497_p10, %p1457_p7 }
  0x2f   : > { %p1506_p1 = por %p1505_p0, %p1504_p13 }
  0x30   : > { %p1500_p12 = pneg %p1499_p11 }
  0x32   : > { %p1507_p4 = pnand %p1506_p1, %p1500_p12 }
  0x34   : > { %1510 = shalt.err (!%p1507_p4)
}
  0x35   : > { %1391 = dma.hbm_to_vmem [thread:$0]  (!%p1571_p5), %s1743_s2, 48, %s1575_s18, [#allocation5]  }
  0x36   : > { %p1749_p6 = scmp.ne.s32.totalorder %s1747_s16, 0 }
  0x37   : > { %p1750_p7 = scmp.eq.s32.totalorder (!%p1749_p6), %s1558_s13, 0 }
  0x38   : > { %161 = sbr.rel (%p1749_p6) target bundleno = 356 (0x164), region = 32 }
  0x3f   : > { %1516 = dma.done.wait (%p1750_p7), [#allocation3], 3840   ;;  %p1751_p2 = pmov %p1750_p7 }
  0x41   : > { %1518 = vsyncadd (%p1751_p2), [#allocation3], 4294963456  ;;  %p1752_p3 = pmov %p1751_p2 }
  0x42   : > { %p1753_p8 = pmov %p1751_p2 }
  0x43   : > { %1520 = dma.done.wait (%p1752_p3), [#allocation5], 48  }
  0x44   : > { %1522 = vsyncadd (%p1753_p8), [#allocation5], 4294967248  ;;  %p189_p9 = scmp.lt.s32.totalorder %s1558_s13, 1  ;;  %v1531_v0 = vmov 0   ;;  %v1409_v1 = vld [vmem:[#allocation2 + $0x34] ss:$12 sps:$4 sm:$0xff]  }
  0x45   : > { %325 = vmatprep.mubr.bf16.mxu1 %v1531_v0  ;;  %468 = vmatprep.mubr.bf16.mxu0 %v1531_v0  ;;  %v1411_v2 = vld [vmem:[#allocation2 + $0x4] ss:$12 sps:$4 sm:$0xff]   ;;  %v1414_v4 = vld [vmem:[#allocation2] ss:$12 sps:$4 sm:$0xff]   ;;  %vm283_vm0 = vcmask 1045504   ;;  %vm276_vm1 = vcmask 228352  }
  0x46   : > { %s1755_s13 = smov (!%p189_p9, %s1558_s13), 1  ;;  %293 = vmatprep.subr.bf16.mxu1 %v1409_v1  ;;  %v1413_v3 = vld [vmem:[#allocation2 + $0x30] ss:$12 sps:$4 sm:$0xff]   ;;  %436 = vmatprep.subr.bf16.mxu0 %v1411_v2  ;;  %v1415_v5 = vld [vmem:[#allocation2 + $0x4c] ss:$12 sps:$4 sm:$0x3f]  }
  0x47   : > { %s1288_s16 = sshll.u32 %s1755_s13, 4  ;;  %294 = vmatpush1.bf16.msra.mxu1 %v1413_v3  ;;  %437 = vmatpush1.bf16.msra.mxu0 %v1414_v4  ;;  %v1417_v6 = vld [vmem:[#allocation2 + $0x1c] ss:$12 sps:$4 sm:$0x3f]   ;;  %v1424_v17 = vld [vmem:[#allocation2 + $0x60] ss:$12 sps:$4 sm:$0xff]  }
  0x48   : > { %s1645_s21 = scalar_lea.vmem %s1741_s0, %s1288_s16  ;;  %1227 = vmatprep.subr.msk.bf16.mxu1 %vm283_vm0, %v1415_v5  ;;  %v1419_v7 = vld [vmem:[#allocation2 + $0x48] ss:$12 sps:$4 sm:$0x3f]   ;;  %v1420_v8 = vld [vmem:[#allocation2 + $0x18] ss:$12 sps:$4 sm:$0x3f]   ;;  %1239 = vmatprep.subr.msk.bf16.mxu0 %vm283_vm0, %v1417_v6 }
  0x49   : > { %v200_v9 = vld [vmem:[%s1645_s21] sm:$0xf]  ;;  %v1651_v10 = vld [vmem:[%s1645_s21 + $0x4] sm:$0xf]  ;;  %v202_v11 = vld [vmem:[%s1645_s21 + $0x8] sm:$0xf] }
  0x4a   : > { %v285_v12 = vsel %vm283_vm0, %v1419_v7, 0  ;;  %v428_v13 = vsel %vm283_vm0, %v1420_v8, 0  ;;  %v211_v14 = vld [vmem:[%s1645_s21 + $0xc] sm:$0x1]  ;;  %v1658_v15 = vcombine.low %v200_v9, %v1651_v10  ;;  %v1426_v18 = vld [vmem:[#allocation2 + $0x64] ss:$12 sps:$4 sm:$0xff]   ;;  %v1232_v31 = vcombine.low %v202_v11, %v202_v11 }
  0x4b   : > { %296 = vmatpush1.bf16.msra.mxu1 %v285_v12  ;;  %439 = vmatpush1.bf16.msra.mxu0 %v428_v13  ;;  %v1220_v16 = vcombine.low %v202_v11, %v211_v14  ;;  %vm231_vm2 = vsmask.f32 7424  ;;  %v1427_v22 = vld [vmem:[#allocation2 + $0x38] ss:$12 sps:$4 sm:$0xff]   ;;  %v535_v32 = vld [vmem:[%s1645_s21] sm:$0xe] }
  0x4c   : > { %v233_v19 = vshrl.u32 %v1658_v15, 16  ;;  %v235_v20 = vshll.u32 %v1658_v15, 16  ;;  %596 = vmatprep.subr.bf16.mxu0 %v1426_v18  ;;  %v1429_v24 = vld [vmem:[#allocation2 + $0x7c] ss:$12 sps:$4 sm:$0x3f]   ;;  %1315 = vmatprep.subr.bf16.mxu1 %v1427_v22  ;;  %v1244_v34 = vcombine.low %v535_v32, %v1651_v10  ;;  %vm548_vm3 = vcmask 1046528  }
  0x4d   : > { %v240_v21 = vshll.u32 %v1220_v16, 16  ;;  %v1431_v26 = vld [vmem:[#allocation2 + $0x78] ss:$12 sps:$4 sm:$0x3f]   ;;  %v244_v33 = vshrl.u32 %v1220_v16, 16  ;;  %v550_v40 = vrot.slane %v1220_v16, 1 }
  0x4e   : > { %v237_v23 = vrot.slane %v235_v20, 1  ;;  %1240 = vmatmul.mubr.msk.bf16.vlgmr.msra.gmra.mrb[0].mxu0 %vm276_vm1, %v1658_v15  ;;  %v1432_v28 = vld [vmem:[#allocation2 + $0x50] ss:$12 sps:$4 sm:$0x3f]   ;;  %v588_v29 = vsel %vm283_vm0, %v1431_v26, 0  ;;  %v549_v39 = vrot.slane %v1244_v34, 1 }
  0x4f   : > { %v242_v25 = vrot.slane %v240_v21, 1  ;;  %597 = vmatpush1.bf16.msra.mxu0 %v1424_v17  ;;  %478 = vmatprep.mubr.bf16.mxu0 %v1531_v0  ;;  %v1437_v35 = vld [vmem:[#allocation2 + $0x94] ss:$12 sps:$4 sm:$0xff]   ;;  %v291_v36 = vsel %vm283_vm0, %v1432_v28, 0  ;;  %v704_v41 = vld [vmem:[%s1645_s21 + $0xc] sm:$0x3] }
  0x50   : > { %v238_v27 = vor.u32 %v237_v23, %v233_v19  ;;  %1251 = vmatprep.subr.msk.bf16.mxu0 %vm283_vm0, %v1429_v24  ;;  %v1433_v37 = vld [vmem:[#allocation2 + $0x8] ss:$12 sps:$4 sm:$0xff]   ;;  %v1435_v42 = vld [vmem:[#allocation2 + $0x90] ss:$12 sps:$4 sm:$0xff]   ;;  %v1677_v44 = vcombine.low %v202_v11, %v704_v41  ;;  %v551_v45 = vsel %vm548_vm3, %v549_v39, %v550_v40  ;;  %v719_v47 = vshrl.u32 %v1244_v34, 16  ;;  %s1376_s22 = smul.u32 36, %s1755_s13 }
  0x51   : > { %v246_v38 = vor.u32 %v244_v33, %v242_v25  ;;  %v1440_v43 = vld [vmem:[#allocation2 + $0xac] ss:$12 sps:$4 sm:$0x3f]   ;;  %v1442_v46 = vld [vmem:[#allocation2 + $0xa8] ss:$12 sps:$4 sm:$0x3f]  }
  0x52   : > { %v243_v30 = vsel %vm231_vm2, %v238_v27, %v242_v25  ;;  %v722_v48 = vshll.u32 %v1244_v34, 16  ;;  %v727_v49 = vshrl.u32 %v1677_v44, 16  ;;  %v730_v50 = vshll.u32 %v1677_v44, 16  ;;  %v1438_v51 = vld [vmem:[#allocation2 + $0x20] ss:$12 sps:$4 sm:$0x3f]   ;;  %s1730_s25 = scalar_lea.vmem %s1744_s3, %s1376_s22 }
  0x53   : > { %1228 = vmatmul.mubr.msk.bf16.vlgmr.msra.gmra.mrb[0].mxu1 %vm276_vm1, %v243_v30  ;;  %599 = vmatpush1.bf16.msra.mxu0 %v588_v29  ;;  %v771_v52 = vsel %vm283_vm0, %v1442_v46, 0  ;;  %v1447_v53 = vld [vmem:[#allocation2 + $0xc4] ss:$12 sps:$4 sm:$0xff]   ;;  %v721_v54 = vrot.slane %v719_v47, 1  ;;  %v434_v58 = vsel %vm283_vm0, %v1438_v51, 0  ;;  %v902_v14 = vrot.slane %v1677_v44, 2 }
  0x54   : > { %335 = vmatprep.mubr.bf16.mxu1 %v1531_v0  ;;  %1316 = vmatpush3.bf16.msra.mxu1 %v1427_v22  ;;  %v724_v55 = vrot.slane %v722_v48, 2  ;;  %v729_v56 = vrot.slane %v727_v49, 1  ;;  %v732_v57 = vrot.slane %v730_v50, 2  ;;  %v1439_v59 = vld [vmem:[#allocation2 + $0x68] ss:$12 sps:$4 sm:$0xff]   ;;  %v1058_v47 = vlaneseq }
  0x55   : > { %1371 = vmatprep.subr.msk.bf16.mxu1 %vm283_vm0, %v1432_v28  ;;  %779 = vmatprep.subr.bf16.mxu0 %v1437_v35  ;;  %vm717_vm4 = vsmask.f32 6400  ;;  %v1443_v62 = vld [vmem:[#allocation2 + $0x80] ss:$12 sps:$4 sm:$0x3f]  }
  0x56   : > { %1241 = vmatmul.mubr.msk.bf16.gmra.mrb[4].mxu0 %vm276_vm1, %v1232_v31  ;;  %v725_v60 = vor.u32 %v724_v55, %v721_v54  ;;  %v733_v61 = vor.u32 %v732_v57, %v729_v56  ;;  %v1445_v1 = vld [vmem:[#allocation2 + $0xc0] ss:$12 sps:$4 sm:$0xff]   ;;  %v1449_v2 = vld [vmem:[#allocation2 + $0xdc] ss:$12 sps:$4 sm:$0x3f]   ;;  %v594_v4 = vsel %vm283_vm0, %v1443_v62, 0 }
  0x57   : > { %628 = vmatprep.mubr.bf16.mxu0 %v1531_v0  ;;  %v1452_v3 = vld [vmem:[#allocation2 + $0xd8] ss:$12 sps:$4 sm:$0x3f]   ;;  %v887_v6 = vld [vmem:[%s1645_s21] sm:$0xc] }
  0x58   : > { %1318 = vmatpush3.bf16.msra.mxu1 %v291_v36  ;;  %v734_v63 = vsel %vm717_vm4, %v725_v60, %v733_v61  ;;  %v1444_v5 = vld [vmem:[#allocation2 + $0x98] ss:$12 sps:$4 sm:$0xff]   ;;  %v940_v7 = vsel %vm283_vm0, %v1452_v3, 0  ;;  %v1448_v8 = vld [vmem:[#allocation2 + $0xb0] ss:$12 sps:$4 sm:$0x3f]   ;;  %v1268_v9 = vcombine.low %v887_v6, %v1651_v10 }
  0x59   : > { %1323 = vmatprep.subr.bf16.mxu1 %v1433_v37  ;;  %v777_v11 = vsel %vm283_vm0, %v1448_v8, 0  ;;  %v1451_v12 = vld [vmem:[#allocation2 + $0xc8] ss:$12 sps:$4 sm:$0xff]   ;;  %v1453_v10 = vld [vmem:[#allocation2 + $0xe0] ss:$12 sps:$4 sm:$0x3f]  }
  0x5a   : > { %v901_v13 = vrot.slane %v1268_v9, 2  ;;  %v946_v16 = vsel %vm283_vm0, %v1453_v10, 0 }
  0x5b   : > { %1229 = vmatmul.mubr.msk.bf16.gmra.mrb[4].mxu1 %vm276_vm1, %v246_v38 }
  0x5c   : > { %1319 = vmatprep.mubr.msk.bf16.mxu1 %vm276_vm1, %v243_v30 }
  0x5e   : > { %1252 = vmatmul.mubr.msk.bf16.vlgmr.msra.gmra.mrb[0].mxu0 %vm276_vm1, %v551_v45 }
  0x5f   : > { %780 = vmatpush1.bf16.msra.mxu0 %v1435_v42  ;;  %638 = vmatprep.mubr.bf16.mxu0 %v1531_v0 }
  0x60   : > { %1263 = vmatprep.subr.msk.bf16.mxu0 %vm283_vm0, %v1440_v43 }
  0x63   : > { %1320 = vmatmul.mubr.msk.bf16.vlgmr.msra.gmra.mrb[8].mxu1 %vm276_vm1, %v246_v38  ;;  %782 = vmatpush1.bf16.msra.mxu0 %v771_v52 }
  0x64   : > { %1324 = vmatpush3.bf16.msra.mxu1 %v1433_v37  ;;  %1327 = vmatprep.mubr.msk.bf16.mxu1 %vm276_vm1, %v1658_v15  ;;  %v903_v15 = vsel %vm283_vm0, %v901_v13, %v902_v14 }
  0x65   : > { %1372 = vmatprep.subr.msk.bf16.mxu1 %vm283_vm0, %v1438_v51  ;;  %948 = vmatprep.subr.bf16.mxu0 %v1447_v53  ;;  %v1059_v53 = vshrl.u32 %v1058_v47, 7 }
  0x66   : > { %1253 = vmatmul.mubr.msk.bf16.gmra.mrb[8].mxu0 %vm276_vm1, %v550_v40 }
  0x67   : > { %811 = vmatprep.mubr.bf16.mxu0 %v1531_v0 }
  0x68   : > { %1326 = vmatpush3.bf16.msra.mxu1 %v434_v58 }
  0x69   : > { %1331 = vmatprep.subr.bf16.mxu1 %v1439_v59 }
  0x6b   : > { %1328 = vmatmul.mubr.msk.bf16.vlgmr.msra.gmra.mrb[12].mxu1 %vm276_vm1, %v1232_v31 }
  0x6c   : > { %1332 = vmatpush3.bf16.msra.mxu1 %v1439_v59  ;;  %1335 = vmatprep.mubr.msk.bf16.mxu1 %vm276_vm1, %v551_v45 }
  0x6d   : > { %1373 = vmatprep.subr.msk.bf16.mxu1 %vm283_vm0, %v1443_v62  ;;  %v1060_v62 = vsub.s32 0, %v1059_v53 }
  0x6e   : > { %1264 = vmatmul.mubr.msk.bf16.vlgmr.msra.gmra.mrb[0].mxu0 %vm276_vm1, %v734_v63 }
  0x6f   : > { %949 = vmatpush1.bf16.msra.mxu0 %v1445_v1  ;;  %821 = vmatprep.mubr.bf16.mxu0 %v1531_v0  ;;  %v1064_v1 = vsub.s32 1, %v1059_v53 }
  0x70   : > { %1334 = vmatpush3.bf16.msra.mxu1 %v594_v4  ;;  %1275 = vmatprep.subr.msk.bf16.mxu0 %vm283_vm0, %v1449_v2 }
  0x71   : > { %1339 = vmatprep.subr.bf16.mxu1 %v1444_v5 }
  0x73   : > { %1336 = vmatmul.mubr.msk.bf16.vlgmr.msra.gmra.mrb[16].mxu1 %vm276_vm1, %v550_v40  ;;  %951 = vmatpush1.bf16.msra.mxu0 %v940_v7 }
  0x74   : > { %1340 = vmatpush3.bf16.msra.mxu1 %v1444_v5  ;;  %1343 = vmatprep.mubr.msk.bf16.mxu1 %vm276_vm1, %v734_v63  ;;  %v1056_v63 = vld [vmem:[#allocation4] sm:$0x7] }
  0x75   : > { %1374 = vmatprep.subr.msk.bf16.mxu1 %vm283_vm0, %v1448_v8  ;;  %v1061_v7 = vrot.slane %v1056_v63, %v1060_v62 }
  0x76   : > { %1265 = vmatmul.mubr.msk.bf16.gmra.mrb[12].mxu0 %vm276_vm1, %v733_v61 }
  0x77   : > { %980 = vmatprep.mubr.bf16.mxu0 %v1531_v0 }
  0x78   : > { %1342 = vmatpush3.bf16.msra.mxu1 %v777_v11  ;;  %v1068_v11 = vsub.s32 2, %v1059_v53 }
  0x79   : > { %1347 = vmatprep.subr.bf16.mxu1 %v1451_v12 }
  0x7b   : > { %1344 = vmatmul.mubr.msk.bf16.vlgmr.msra.gmra.mrb[20].mxu1 %vm276_vm1, %v733_v61 }
  0x7c   : > { %1348 = vmatpush3.bf16.msra.mxu1 %v1451_v12  ;;  %1351 = vmatprep.mubr.msk.bf16.mxu1 %vm276_vm1, %v903_v15  ;;  %v1065_v12 = vrot.slane %v1056_v63, %v1064_v1 }
  0x7d   : > { %1375 = vmatprep.subr.msk.bf16.mxu1 %vm283_vm0, %v1453_v10 }
  0x7e   : > { %1276 = vmatmul.mubr.msk.bf16.vlgmr.msra.gmra.mrb[0].mxu0 %vm276_vm1, %v903_v15 }
  0x7f   : > { %990 = vmatprep.mubr.bf16.mxu0 %v1531_v0 }
  0x80   : > { %1350 = vmatpush3.bf16.msra.mxu1 %v946_v16 }
  0x83   : > { %1352 = vmatmul.mubr.msk.bf16.vlgmr.msra.gmra.mrb[24].mxu1 %vm276_vm1, %v902_v14 }
  0x86   : > { %1277 = vmatmul.mubr.msk.bf16.gmra.mrb[16].mxu0 %vm276_vm1, %v902_v14 }
 0x126   : > { %v327_v17 = vpop.f32.mrb[0].mxu1 }
 0x127   : > { %v329_v18 = vpop.f32.mrb[1].mxu1 }
 0x128   : > { %v1720_v19 = vpop.f32.mrb[2].mxu1 }
 0x129   : > { %v1722_v20 = vpop.f32.mrb[3].mxu1  ;;  %v480_v21 = vpop.f32.mrb[4].mxu0 }
 0x12a   : > { %v482_v22 = vpop.f32.mrb[5].mxu0 }
 0x12b   : > { %v484_v23 = vpop.f32.mrb[6].mxu0 }
 0x12c   : > { %v485_v24 = vpop.f32.mrb[7].mxu0 }
 0x12d   : > { %v1069_v24 = vrot.slane %v1056_v63, %v1068_v11 }
 0x12e   : > { %v337_v25 = vpop.f32.mrb[4].mxu1 }
 0x12f   : > { %v481_v26 = vadd.f32 %v480_v21, %v337_v25  ;;  %v339_v27 = vpop.f32.mrb[5].mxu1 }
 0x130   : > { %v483_v28 = vadd.f32 %v482_v22, %v339_v27  ;;  %v341_v0 = vpop.f32.mrb[6].mxu1 }
 0x131   : > { %v342_v29 = vpop.f32.mrb[7].mxu1 }
 0x136   : > { %v1321_v30 = vpop.f32.mrb[8].mxu1 }
 0x137   : > { %v378_v31 = vpop.f32.mrb[9].mxu1 }
 0x138   : > { %v1322_v32 = vpop.f32.mrb[10].mxu1 }
 0x139   : > { %v381_v33 = vpop.f32.mrb[11].mxu1  ;;  %v640_v34 = vpop.f32.mrb[8].mxu0 }
 0x13a   : > { %v701_v35 = vadd.f32 %v640_v34, %v481_v26  ;;  %v642_v36 = vpop.f32.mrb[9].mxu0 }
 0x13b   : > { %v702_v37 = vadd.f32 %v642_v36, %v483_v28  ;;  %v644_v38 = vpop.f32.mrb[10].mxu0 }
 0x13c   : > { %v645_v39 = vpop.f32.mrb[11].mxu0 }
 0x13e   : > { %v1329_v40 = vpop.f32.mrb[12].mxu1 }
 0x13f   : > { %v530_v41 = vadd.f32 %v1329_v40, %v1321_v30  ;;  %v521_v42 = vpop.f32.mrb[13].mxu1 }
 0x140   : > { %v522_v43 = vadd.f32 %v521_v42, %v378_v31  ;;  %v1330_v44 = vpop.f32.mrb[14].mxu1 }
 0x141   : > { %v524_v45 = vpop.f32.mrb[15].mxu1 }
 0x142   : > { %v525_v46 = vadd.f32 %v524_v45, %v381_v33 }
 0x146   : > { %v1337_v48 = vpop.f32.mrb[16].mxu1 }
 0x147   : > { %v703_v49 = vadd.f32 %v1337_v48, %v530_v41  ;;  %v681_v50 = vpop.f32.mrb[17].mxu1 }
 0x148   : > { %v697_v51 = vadd.f32 %v681_v50, %v522_v43  ;;  %v1338_v52 = vpop.f32.mrb[18].mxu1 }
 0x149   : > { %v684_v54 = vpop.f32.mrb[19].mxu1  ;;  %v823_v55 = vpop.f32.mrb[12].mxu0 }
 0x14a   : > { %v700_v56 = vadd.f32 %v684_v54, %v525_v46  ;;  %v884_v57 = vadd.f32 %v823_v55, %v701_v35  ;;  %v825_v58 = vpop.f32.mrb[13].mxu0 }
 0x14b   : > { %v885_v59 = vadd.f32 %v825_v58, %v702_v37  ;;  %v827_v60 = vpop.f32.mrb[14].mxu0 }
 0x14c   : > { %v828_v61 = vpop.f32.mrb[15].mxu0 }
 0x14e   : > { %v1345_v2 = vpop.f32.mrb[20].mxu1 }
 0x14f   : > { %v886_v3 = vadd.f32 %v1345_v2, %v703_v49  ;;  %v864_v4 = vpop.f32.mrb[21].mxu1 }
 0x150   : > { %v880_v5 = vadd.f32 %v864_v4, %v697_v51  ;;  %v1346_v6 = vpop.f32.mrb[22].mxu1 }
 0x151   : > { %v867_v8 = vpop.f32.mrb[23].mxu1  ;;  %v982_v9 = vpop.f32.mrb[0].mxu0 }
 0x152   : > { %v883_v13 = vadd.f32 %v867_v8, %v700_v56  ;;  %v1355_v14 = vadd.f32 %v982_v9, %v327_v17  ;;  %v984_v10 = vpop.f32.mrb[1].mxu0 }
 0x153   : > { %v1356_v15 = vadd.f32 %v984_v10, %v329_v18  ;;  %v986_v16 = vpop.f32.mrb[2].mxu0 }
 0x154   : > { %v1073_v21 = vadd.f32 %v1355_v14, %v1061_v7  ;;  %v1357_v22 = vadd.f32 %v986_v16, %v1720_v19  ;;  %v988_v23 = vpop.f32.mrb[3].mxu0 }
 0x155   : > { %v1074_v25 = vadd.f32 %v1356_v15, %v1065_v12  ;;  %v1358_v26 = vadd.f32 %v988_v23, %v1722_v20 }
 0x156   : > { %v1082_v27 = vmax.f32 %v1073_v21, 0.0  ;;  %v1353_v28 = vpop.f32.mrb[24].mxu1  ;;  %v1076_v0 = vadd.f32 %v1357_v22, %v1061_v7 }
 0x157   : > { %v1055_v29 = vadd.f32 %v1353_v28, %v886_v3  ;;  %v1083_v30 = vmax.f32 %v1074_v25, 0.0  ;;  %v1033_v31 = vpop.f32.mrb[25].mxu1  ;;  %v1077_v32 = vadd.f32 %v1358_v26, %v1065_v12 }
 0x158   : > { %v1049_v17 = vadd.f32 %v1033_v31, %v880_v5  ;;  %v1085_v18 = vmax.f32 %v1076_v0, 0.0  ;;  %v1354_v19 = vpop.f32.mrb[26].mxu1 }
 0x159   : > { %v1081_v33 = vadd.f32 %v1069_v24, %v1055_v29  ;;  %v1289_v34 = vpack.c.bf16 %v1083_v30, %v1082_v27  ;;  %v1086_v35 = vmax.f32 %v1077_v32, 0.0  ;;  %v1036_v20 = vpop.f32.mrb[27].mxu1  ;;  %v992_v36 = vpop.f32.mrb[16].mxu0 }
 0x15a   : > { %v1075_v37 = vadd.f32 %v1069_v24, %v1049_v17  ;;  %v1052_v38 = vadd.f32 %v1036_v20, %v883_v13  ;;  %v1053_v39 = vadd.f32 %v992_v36, %v884_v57  ;;  %v994_v40 = vpop.f32.mrb[17].mxu0 }
 0x15b   : > { %v1090_v41 = vmax.f32 %v1081_v33, 0.0  ;;  %1124 = vst [vmem:[%s1730_s25] sm:$0xff] %v1289_v34  ;;  %v1291_v42 = vpack.c.bf16 %v1086_v35, %v1085_v18  ;;  %v1054_v43 = vadd.f32 %v994_v40, %v885_v59  ;;  %v996_v44 = vpop.f32.mrb[18].mxu0 }
 0x15c   : > { %v1084_v45 = vmax.f32 %v1075_v37, 0.0  ;;  %v1078_v46 = vadd.f32 %v1069_v24, %v1052_v38  ;;  %v1079_v47 = vadd.f32 %v1061_v7, %v1053_v39  ;;  %v997_v48 = vpop.f32.mrb[19].mxu0 }
 0x15d   : > { %v1294_v49 = vpack.c.bf16 %v1090_v41, %v1090_v41  ;;  %1126 = vst [vmem:[%s1730_s25 + $0xc] sm:$0xff] %v1291_v42  ;;  %v1080_v50 = vadd.f32 %v1065_v12, %v1054_v43 }
 0x15e   : > { %v1290_v51 = vpack.c.bf16 %v1084_v45, %v1084_v45  ;;  %v1087_v52 = vmax.f32 %v1078_v46, 0.0  ;;  %v1088_v53 = vmax.f32 %v1079_v47, 0.0 }
 0x15f   : > { %1129 = vst [vmem:[%s1730_s25 + $0x20] sm:$0xf] %v1294_v49  ;;  %v1089_v54 = vmax.f32 %v1080_v50, 0.0 }
 0x160   : > { %1125 = vst [vmem:[%s1730_s25 + $0x8] sm:$0xf] %v1290_v51  ;;  %v1292_v55 = vpack.c.bf16 %v1087_v52, %v1087_v52 }
 0x161   : > { %v1293_v56 = vpack.c.bf16 %v1089_v54, %v1088_v53 }
 0x162   : > { %1127 = vst [vmem:[%s1730_s25 + $0x14] sm:$0xf] %v1292_v55 }
 0x163   : > { %1128 = vst [vmem:[%s1730_s25 + $0x18] sm:$0xff] %v1293_v56 }
 0x164 PF: > { %s15_s12 = sadd.s32 1, %s1525_s12  }
 0x165   : > { %p12_p5 = scmp.ge.s32.totalorder %s15_s12, 4  }
 0x167   :  { %14 = sbr.rel (!%p12_p5) target bundleno = 2 (0x2), region = 75 }
 0x16e   :  { %1151 = vsyncpa [#allocation3], 1 }
 0x16f   :  { %1153 = vsyncpa [#allocation3 + $0x1], 1 }
 0x170   :  { %1154 = vsyncpa [#allocation5], 1 }

// kernel: cnn_forward.6
= control target key start
LH: loop header
LB: loop body
LE: loop exit
PB: predicated region body
PF: predicated region fallthrough
CT: control target
= control target key end

     0   :  { %s4534_s12 = smov 0   ;;  %s5585_s0 = inlined_call_operand.vmem [shape: bf16[2,10,320], index: 0, kind: input, shape index: {}]   ;;  %s5586_s1 = inlined_call_operand.vmem [shape: bf16[5,320,384], index: 1, kind: input, shape index: {}]   ;;  %s5587_s2 = inlined_call_operand.vmem [shape: f32[1,384], index: 2, kind: input, shape index: {}]   ;;  %s5588_s3 = inlined_call_operand.vmem [shape: bf16[2,6,384], index: 3, kind: output, shape index: {}]  }
   0x1 LB: > { %s3222_s13 = sadd.s32 4294967295, %s4509_s12   ;;  %p3226_p0 = scmp.ge.s32.totalorder %s4509_s12, 1  ;;  %s4509_s12 = sphi %s4534_s12, %s13_s12  }
   0x2   : > { %p137_p1 = scmp.lt.s32.totalorder %s4509_s12, 3 }
   0x4   : > { %p138_p2 = pnand %p3226_p0, %p137_p1 }
   0x5   : > { %v4088_v0 = vld [vmem:[%s5586_s1 + $0x1e4] ss:$12 sps:$4 sm:$0xff] (!%p138_p2)   ;;  %p161_p3 = scmp.lt.s32.totalorder (!%p138_p2), %s3222_s13, 1  ;;  %v4511_v2 = vmov (!%p138_p2), 0   ;;  %v4092_v3 = vld [vmem:[%s5586_s1 + $0x1e0] ss:$12 sps:$4 sm:$0xff] (!%p138_p2)  }
   0x6   : > { %141 = sbr.rel (%p138_p2) target bundleno = 551 (0x227), region = 32  ;;  %v4090_v1 = vld [vmem:[%s5586_s1 + $0x364] ss:$12 sps:$4 sm:$0xff] (!%p138_p2)   ;;  %765 = vmatprep.mubr.bf16.mxu1 (!%p138_p2), %v4511_v2  ;;  %692 = vmatprep.subr.bf16.mxu0 (!%p138_p2), %v4088_v0  ;;  %v4093_v4 = vld [vmem:[%s5586_s1 + $0x360] ss:$12 sps:$4 sm:$0xff] (!%p138_p2)   ;;  %vm688_vm0 = vcmask (!%p138_p2), 523264  }
   0x7   : > { %733 = vmatprep.subr.bf16.mxu1 (!%p138_p2), %v4090_v1  ;;  %v4094_v5 = vld [vmem:[%s5586_s1 + $0x1fc] ss:$12 sps:$4 sm:$0xff] (!%p138_p2)   ;;  %693 = vmatpush1.bf16.msra.mxu0 (!%p138_p2), %v4092_v3  ;;  %v4098_v7 = vld [vmem:[%s5586_s1 + $0x1f8] ss:$12 sps:$4 sm:$0xff] (!%p138_p2)   ;;  %v4100_v9 = vld [vmem:[%s5586_s1 + $0x214] ss:$12 sps:$4 sm:$0xff] (!%p138_p2)  }
   0x8   : > { %734 = vmatpush1.bf16.msra.mxu1 (!%p138_p2), %v4093_v4  ;;  %v4096_v6 = vld [vmem:[%s5586_s1 + $0x37c] ss:$12 sps:$4 sm:$0xff] (!%p138_p2)   ;;  %694 = vmatprep.subr.bf16.mxu0 (!%p138_p2), %v4094_v5  ;;  %v4099_v8 = vld [vmem:[%s5586_s1 + $0x378] ss:$12 sps:$4 sm:$0xff] (!%p138_p2)   ;;  %v4102_v10 = vld [vmem:[%s5586_s1 + $0x394] ss:$12 sps:$4 sm:$0xff] (!%p138_p2)  }
   0x9   : > { %735 = vmatprep.subr.bf16.mxu1 (!%p138_p2), %v4096_v6  ;;  %v4104_v11 = vld [vmem:[%s5586_s1 + $0x210] ss:$12 sps:$4 sm:$0xff] (!%p138_p2)   ;;  %v4106_v13 = vld [vmem:[%s5586_s1 + $0x22c] ss:$12 sps:$4 sm:$0xff] (!%p138_p2)   ;;  %v4110_v15 = vld [vmem:[%s5586_s1 + $0x228] ss:$12 sps:$4 sm:$0xff] (!%p138_p2)  }
   0xa   : > { %v4105_v12 = vld [vmem:[%s5586_s1 + $0x390] ss:$12 sps:$4 sm:$0xff] (!%p138_p2)   ;;  %v4108_v14 = vld [vmem:[%s5586_s1 + $0x3ac] ss:$12 sps:$4 sm:$0xff] (!%p138_p2)   ;;  %v4111_v16 = vld [vmem:[%s5586_s1 + $0x3a8] ss:$12 sps:$4 sm:$0xff] (!%p138_p2)  }
   0xb   : > { %695 = vmatpush1.bf16.msra.mxu0 (!%p138_p2), %v4098_v7  ;;  %v4112_v18 = vld [vmem:[%s5586_s1 + $0x244] ss:$12 sps:$4 sm:$0xff] (!%p138_p2)   ;;  %v4115_v19 = vld [vmem:[%s5586_s1 + $0x2a8] ss:$12 sps:$4 sm:$0xff] (!%p138_p2)   ;;  %v4116_v22 = vld [vmem:[%s5586_s1 + $0x240] ss:$12 sps:$4 sm:$0xff] (!%p138_p2)  }
   0xc   : > { %736 = vmatpush1.bf16.msra.mxu1 (!%p138_p2), %v4099_v8  ;;  %696 = vmatprep.subr.bf16.mxu0 (!%p138_p2), %v4100_v9  ;;  %v4117_v24 = vld [vmem:[%s5586_s1 + $0x1e8] ss:$12 sps:$4 sm:$0xff] (!%p138_p2)   ;;  %v4120_v27 = vld [vmem:[%s5586_s1 + $0x2c0] ss:$12 sps:$4 sm:$0xff] (!%p138_p2)   ;;  %v4121_v28 = vld [vmem:[%s5586_s1 + $0x258] ss:$12 sps:$4 sm:$0xff] (!%p138_p2)  }
   0xd   : > { %s5590_s13 = smov (!%p161_p3, %s3222_s13), 1  ;;  %737 = vmatprep.subr.bf16.mxu1 %v4102_v10  ;;  %v4118_v25 = vld [vmem:[%s5586_s1 + $0x25c] ss:$12 sps:$4 sm:$0xff]   ;;  %v4122_v29 = vld [vmem:[%s5586_s1 + $0x200] ss:$12 sps:$4 sm:$0xff]   ;;  %v4512_v6 = vmov 0.0  }
   0xe   : > { %s4075_s30 = smul.u32 24, %s5590_s13  ;;  %v4123_v30 = vld [vmem:[%s5586_s1 + $0x274] ss:$12 sps:$4 sm:$0xff]   ;;  %v4125_v31 = vld [vmem:[%s5586_s1 + $0x2d8] ss:$12 sps:$4 sm:$0xff]   ;;  %vm4513_vm1 = vmmov 0  }
   0xf   : > { %697 = vmatpush1.bf16.msra.mxu0 %v4104_v11  ;;  %v4126_v32 = vld [vmem:[%s5586_s1 + $0x270] ss:$12 sps:$4 sm:$0xff]   ;;  %v4127_v33 = vld [vmem:[%s5586_s1 + $0x218] ss:$12 sps:$4 sm:$0xff]   ;;  %v4131_v36 = vld [vmem:[%s5586_s1 + $0x288] ss:$12 sps:$4 sm:$0xff]  }
  0x10   : > { %s4591_s20 = scalar_lea.vmem %s5585_s0, %s4075_s30  ;;  %738 = vmatpush1.bf16.msra.mxu1 %v4105_v12  ;;  %698 = vmatprep.subr.bf16.mxu0 %v4106_v13  ;;  %v4128_v34 = vld [vmem:[%s5586_s1 + $0x28c] ss:$12 sps:$4 sm:$0xff]   ;;  %v4130_v35 = vld [vmem:[%s5586_s1 + $0x2f0] ss:$12 sps:$4 sm:$0xff]   ;;  %v4135_v39 = vld [vmem:[%s5586_s1 + $0x308] ss:$12 sps:$4 sm:$0xff]  }
  0x11   : > { %v4114_v17 = vld [vmem:[%s4591_s20 + $0x8] ss:$0 sps:$4 sm:$0xff]   ;;  %739 = vmatprep.subr.bf16.mxu1 %v4108_v14  ;;  %v4132_v37 = vld [vmem:[%s5586_s1 + $0x230] ss:$12 sps:$4 sm:$0xff]   ;;  %v4136_v40 = vld [vmem:[%s5586_s1 + $0x2a0] ss:$12 sps:$4 sm:$0xff]  }
  0x12   : > { %v360_v20 = vshrl.u32 %v4114_v17, 16  ;;  %v362_v21 = vshll.u32 %v4114_v17, 16  ;;  %v4133_v38 = vld [vmem:[%s5586_s1 + $0x2a4] ss:$12 sps:$4 sm:$0xff]   ;;  %v4137_v41 = vld [vmem:[%s5586_s1 + $0x248] ss:$12 sps:$4 sm:$0xff]  }
  0x13   : > { %699 = vmatpush1.bf16.msra.mxu0 %v4110_v15  ;;  %v4138_v42 = vld [vmem:[%s5586_s1 + $0x2bc] ss:$12 sps:$4 sm:$0xff]   ;;  %v4140_v43 = vld [vmem:[%s5586_s1 + $0x320] ss:$12 sps:$4 sm:$0xff]   ;;  %v4141_v44 = vld [vmem:[%s5586_s1 + $0x2b8] ss:$12 sps:$4 sm:$0xff]  }
  0x14   : > { %740 = vmatpush1.bf16.msra.mxu1 %v4111_v16  ;;  %v364_v23 = vrot.slane %v362_v21, 1  ;;  %700 = vmatprep.subr.bf16.mxu0 %v4112_v18  ;;  %v4142_v45 = vld [vmem:[%s5586_s1 + $0x260] ss:$12 sps:$4 sm:$0xff]   ;;  %v4145_v47 = vld [vmem:[%s5586_s1 + $0x338] ss:$12 sps:$4 sm:$0xff]   ;;  %s4076_s14 = smul.u32 12, %s5590_s13 }
  0x15   : > { %3880 = vmatprep.subr.bf16.mxu1 %v4115_v19  ;;  %v4143_v46 = vld [vmem:[%s5586_s1 + $0x2d4] ss:$12 sps:$4 sm:$0xff]   ;;  %v4146_v49 = vld [vmem:[%s5586_s1 + $0x2d0] ss:$12 sps:$4 sm:$0xff]   ;;  %v4147_v50 = vld [vmem:[%s5586_s1 + $0x278] ss:$12 sps:$4 sm:$0xff]  }
  0x16   : > { %v4615_v26 = vor.u32 %v364_v23, %v360_v20  ;;  %v254_v48 = vld [vmem:[%s4591_s20] sm:$0xff]  ;;  %v4148_v53 = vld [vmem:[%s5586_s1 + $0x2ec] ss:$12 sps:$4 sm:$0xff]   ;;  %v4150_v57 = vld [vmem:[%s5586_s1 + $0x350] ss:$12 sps:$4 sm:$0xff]   ;;  %s170_s17 = scalar_lea.vmem %s5588_s3, %s4076_s14 }
  0x17   : > { %701 = vmatpush1.bf16.msra.mxu0 %v4116_v22  ;;  %v3309_v51 = vcombine.low %v254_v48, %v254_v48  ;;  %v3310_v52 = vcombine.high %v254_v48, %v254_v48  ;;  %v4151_v58 = vld [vmem:[%s5586_s1 + $0x2e8] ss:$12 sps:$4 sm:$0xff]   ;;  %v4152_v60 = vld [vmem:[%s5586_s1 + $0x290] ss:$12 sps:$4 sm:$0xff]   ;;  %v4157_v3 = vld [vmem:[%s5586_s1 + $0x300] ss:$12 sps:$4 sm:$0xff]  }
  0x18   : > { %3372 = vmatmul.mubr.msk.bf16.vlgmr.msra.gmra.mrb[0].mxu1 %vm688_vm0, %v4615_v26  ;;  %702 = vmatprep.subr.bf16.mxu0 %v4118_v25  ;;  %v4155_v0 = vld [vmem:[%s5586_s1 + $0x304] ss:$12 sps:$4 sm:$0xff]   ;;  %v4158_v4 = vld [vmem:[%s5586_s1 + $0x368] ss:$12 sps:$4 sm:$0xff]   ;;  %v4162_v8 = vld [vmem:[%s5586_s1 + $0x380] ss:$12 sps:$4 sm:$0xff]  }
  0x19   : > { %3881 = vmatpush3.bf16.msra.mxu1 %v4117_v24  ;;  %v353_v54 = vshrl.u32 %v3310_v52, 16  ;;  %v355_v55 = vshll.u32 %v3310_v52, 16  ;;  %v348_v56 = vshll.u32 %v3309_v51, 16  ;;  %v346_v61 = vshrl.u32 %v3309_v51, 16  ;;  %v4159_v5 = vld [vmem:[%s5586_s1 + $0x31c] ss:$12 sps:$4 sm:$0xff]  }
  0x1a   : > { %3882 = vmatprep.subr.bf16.mxu1 %v4120_v27  ;;  %v4161_v7 = vld [vmem:[%s5586_s1 + $0x318] ss:$12 sps:$4 sm:$0xff]   ;;  %v4163_v9 = vld [vmem:[%s5586_s1 + $0x334] ss:$12 sps:$4 sm:$0xff]   ;;  %v4165_v10 = vld [vmem:[%s5586_s1 + $0x330] ss:$12 sps:$4 sm:$0xff]  }
  0x1b   : > { %703 = vmatpush1.bf16.msra.mxu0 %v4121_v28  ;;  %v357_v59 = vrot.slane %v355_v55, 1  ;;  %v350_v62 = vrot.slane %v348_v56, 1  ;;  %v4166_v11 = vld [vmem:[%s5586_s1 + $0x398] ss:$12 sps:$4 sm:$0xff]   ;;  %v4169_v13 = vld [vmem:[%s5586_s1 + $0x348] ss:$12 sps:$4 sm:$0xff]  }
  0x1c   : > { %704 = vmatprep.subr.bf16.mxu0 %v4123_v30  ;;  %v4167_v12 = vld [vmem:[%s5586_s1 + $0x34c] ss:$12 sps:$4 sm:$0xff]   ;;  %v4170_v14 = vld [vmem:[%s5586_s1 + $0x3b0] ss:$12 sps:$4 sm:$0xff]   ;;  %v4185_v23 = vld [vmem:[%s5586_s1 + $0x34] ss:$12 sps:$4 sm:$0xff]  }
  0x1d   : > { %3883 = vmatpush3.bf16.msra.mxu1 %v4122_v29  ;;  %v358_v63 = vor.u32 %v357_v59, %v353_v54  ;;  %v351_v1 = vor.u32 %v350_v62, %v346_v61  ;;  %v4173_v15 = vld [vmem:[%s5586_s1 + $0x4] ss:$12 sps:$4 sm:$0xff]   ;;  %v4171_v17 = vld [vmem:[%s5586_s1] ss:$12 sps:$4 sm:$0xff]   ;;  %v4179_v19 = vld [vmem:[%s5586_s1 + $0x1c] ss:$12 sps:$4 sm:$0xff]  }
  0x1e   : > { %3884 = vmatprep.subr.bf16.mxu1 %v4125_v31  ;;  %v4176_v16 = vld [vmem:[%s5586_s1 + $0x184] ss:$12 sps:$4 sm:$0xff]   ;;  %v4174_v18 = vld [vmem:[%s5586_s1 + $0x180] ss:$12 sps:$4 sm:$0xff]   ;;  %v4182_v20 = vld [vmem:[%s5586_s1 + $0x19c] ss:$12 sps:$4 sm:$0xff]  }
  0x1f   : > { %705 = vmatpush1.bf16.msra.mxu0 %v4126_v32  ;;  %806 = vmatprep.mubr.bf16.mxu1 %v358_v63  ;;  %v4177_v21 = vld [vmem:[%s5586_s1 + $0x18] ss:$12 sps:$4 sm:$0xff]   ;;  %v4188_v24 = vld [vmem:[%s5586_s1 + $0x1b4] ss:$12 sps:$4 sm:$0xff]   ;;  %v4183_v25 = vld [vmem:[%s5586_s1 + $0x30] ss:$12 sps:$4 sm:$0xff]  }
  0x20   : > { %706 = vmatprep.subr.bf16.mxu0 %v4128_v34  ;;  %724 = vmatprep.mubr.bf16.mxu0 %v358_v63  ;;  %v4180_v22 = vld [vmem:[%s5586_s1 + $0x198] ss:$12 sps:$4 sm:$0xff]   ;;  %v4189_v29 = vld [vmem:[%s5586_s1 + $0x48] ss:$12 sps:$4 sm:$0xff]   ;;  %v4195_v34 = vld [vmem:[%s5586_s1 + $0x60] ss:$12 sps:$4 sm:$0xff]  }
  0x21   : > { %3885 = vmatpush3.bf16.msra.mxu1 %v4127_v33  ;;  %v4191_v27 = vld [vmem:[%s5586_s1 + $0x4c] ss:$12 sps:$4 sm:$0xff]   ;;  %v4192_v30 = vld [vmem:[%s5586_s1 + $0x1c8] ss:$12 sps:$4 sm:$0xff]   ;;  %v4197_v31 = vld [vmem:[%s5586_s1 + $0x64] ss:$12 sps:$4 sm:$0xff]  }
  0x22   : > { %3886 = vmatprep.subr.bf16.mxu1 %v4130_v35  ;;  %v4194_v28 = vld [vmem:[%s5586_s1 + $0x1cc] ss:$12 sps:$4 sm:$0xff]   ;;  %v4798_v32 = vld [vmem:[%s4591_s20 + $0x8] ss:$0 sps:$4 sm:$0x77]  }
  0x23   : > { %707 = vmatpush1.bf16.msra.mxu0 %v4131_v36  ;;  %v4199_v33 = vld [vmem:[%s5586_s1 + $0xc8] ss:$12 sps:$4 sm:$0xff]   ;;  %v4216_v52 = vld [vmem:[%s5586_s1 + $0xc0] ss:$12 sps:$4 sm:$0xff]   ;;  %v4221_v56 = vld [vmem:[%s5586_s1 + $0xd8] ss:$12 sps:$4 sm:$0xff]  }
  0x24   : > { %708 = vmatprep.subr.bf16.mxu0 %v4133_v38  ;;  %v4200_v35 = vld [vmem:[%s5586_s1 + $0x8] ss:$12 sps:$4 sm:$0xff]   ;;  %v4201_v38 = vld [vmem:[%s5586_s1 + $0x78] ss:$12 sps:$4 sm:$0xff]   ;;  %v4224_v55 = vld [vmem:[%s5586_s1 + $0x140] ss:$12 sps:$4 sm:$0xff]  }
  0x25   : > { %3887 = vmatpush3.bf16.msra.mxu1 %v4132_v37  ;;  %v4203_v36 = vld [vmem:[%s5586_s1 + $0x7c] ss:$12 sps:$4 sm:$0xff]   ;;  %v4204_v37 = vld [vmem:[%s5586_s1 + $0xe0] ss:$12 sps:$4 sm:$0xff]   ;;  %v4229_v59 = vld [vmem:[%s5586_s1 + $0x158] ss:$12 sps:$4 sm:$0xff]  }
  0x26   : > { %3888 = vmatprep.subr.bf16.mxu1 %v4135_v39  ;;  %v4205_v39 = vld [vmem:[%s5586_s1 + $0x20] ss:$12 sps:$4 sm:$0xff]   ;;  %v4211_v48 = vld [vmem:[%s5586_s1 + $0xa8] ss:$12 sps:$4 sm:$0xff]   ;;  %v4230_v61 = vld [vmem:[%s5586_s1 + $0x98] ss:$12 sps:$4 sm:$0xff]  }
  0x27   : > { %709 = vmatpush1.bf16.msra.mxu0 %v4136_v40  ;;  %v4208_v40 = vld [vmem:[%s5586_s1 + $0x94] ss:$12 sps:$4 sm:$0xff]   ;;  %v4223_v54 = vld [vmem:[%s5586_s1 + $0xdc] ss:$12 sps:$4 sm:$0xff]   ;;  %v4233_v62 = vld [vmem:[%s5586_s1 + $0x10c] ss:$12 sps:$4 sm:$0xff]  }
  0x28   : > { %710 = vmatprep.subr.bf16.mxu0 %v4138_v42  ;;  %v172_v42 = vld [vmem:[%s4591_s20] sm:$0x77]  ;;  %v4219_v51 = vld [vmem:[%s5586_s1 + $0x128] ss:$12 sps:$4 sm:$0xff]   ;;  %v4234_v63 = vld [vmem:[%s5586_s1 + $0x170] ss:$12 sps:$4 sm:$0xff]  }
  0x29   : > { %3889 = vmatpush3.bf16.msra.mxu1 %v4137_v41  ;;  %v4209_v41 = vld [vmem:[%s5586_s1 + $0xf8] ss:$12 sps:$4 sm:$0xff]  }
  0x2a   : > { %3890 = vmatprep.subr.bf16.mxu1 %v4140_v43  ;;  %v4206_v43 = vld [vmem:[%s5586_s1 + $0x90] ss:$12 sps:$4 sm:$0xff]  }
  0x2b   : > { %711 = vmatpush1.bf16.msra.mxu0 %v4141_v44  ;;  %v3375_v44 = vcombine.high %v172_v42, %v172_v42 }
  0x2c   : > { %712 = vmatprep.subr.bf16.mxu0 %v4143_v46  ;;  %v4213_v46 = vld [vmem:[%s5586_s1 + $0xac] ss:$12 sps:$4 sm:$0xff]  }
  0x2d   : > { %3891 = vmatpush3.bf16.msra.mxu1 %v4142_v45  ;;  %v4210_v45 = vld [vmem:[%s5586_s1 + $0x38] ss:$12 sps:$4 sm:$0xff]  }
  0x2e   : > { %3892 = vmatprep.subr.bf16.mxu1 %v4145_v47  ;;  %v4214_v47 = vld [vmem:[%s5586_s1 + $0x110] ss:$12 sps:$4 sm:$0xff]  }
  0x2f   : > { %713 = vmatpush1.bf16.msra.mxu0 %v4146_v49  ;;  %v4215_v49 = vld [vmem:[%s5586_s1 + $0x50] ss:$12 sps:$4 sm:$0xff]  }
  0x30   : > { %714 = vmatprep.subr.bf16.mxu0 %v4148_v53  ;;  %v4220_v53 = vld [vmem:[%s5586_s1 + $0x68] ss:$12 sps:$4 sm:$0xff]  }
  0x31   : > { %3893 = vmatpush3.bf16.msra.mxu1 %v4147_v50  ;;  %v4218_v50 = vld [vmem:[%s5586_s1 + $0xc4] ss:$12 sps:$4 sm:$0xff]  }
  0x32   : > { %3894 = vmatprep.subr.bf16.mxu1 %v4150_v57  ;;  %v4225_v57 = vld [vmem:[%s5586_s1 + $0x80] ss:$12 sps:$4 sm:$0xff]  }
  0x33   : > { %715 = vmatpush1.bf16.msra.mxu0 %v4151_v58  ;;  %v4228_v58 = vld [vmem:[%s5586_s1 + $0xf4] ss:$12 sps:$4 sm:$0xff]  }
  0x34   : > { %716 = vmatprep.subr.bf16.mxu0 %v4155_v0  ;;  %v4231_v0 = vld [vmem:[%s5586_s1 + $0x108] ss:$12 sps:$4 sm:$0xff]  }
  0x35   : > { %3895 = vmatpush3.bf16.msra.mxu1 %v4152_v60  ;;  %v4226_v60 = vld [vmem:[%s5586_s1 + $0xf0] ss:$12 sps:$4 sm:$0xff]  }
  0x36   : > { %4015 = vmatprep.subr.bf16.mxu1 %v4512_v6 }
  0x37   : > { %717 = vmatpush1.bf16.msra.mxu0 %v4157_v3  ;;  %v4240_v3 = vld [vmem:[%s5586_s1 + $0x124] ss:$12 sps:$4 sm:$0xff]  }
  0x38   : > { %807 = vmatmul.mubr.bf16.vlgmr.msra.gmra.mrb[4].mxu1 %v351_v1  ;;  %718 = vmatprep.subr.bf16.mxu0 %v4159_v5  ;;  %v3374_v5 = vcombine.low %v172_v42, %v172_v42  ;;  %v4286_v42 = vld [vmem:[%s5586_s1 + $0x43c] ss:$12 sps:$4 sm:$0xff]  }
  0x39   : > { %4016 = vmatpush3.bf16.msra.mxu1 %v4158_v4  ;;  %4023 = vmatprep.mubr.msk.bf16.mxu1 %vm4513_vm1, %v4512_v6  ;;  %v4238_v4 = vld [vmem:[%s5586_s1 + $0x120] ss:$12 sps:$4 sm:$0xff]  }
  0x3a   : > { %4017 = vmatprep.subr.bf16.mxu1 %v4512_v6 }
  0x3b   : > { %719 = vmatpush1.bf16.msra.mxu0 %v4161_v7  ;;  %v4241_v7 = vld [vmem:[%s5586_s1 + $0x188] ss:$12 sps:$4 sm:$0xff]  }
  0x3c   : > { %720 = vmatprep.subr.bf16.mxu0 %v4163_v9  ;;  %v4242_v9 = vld [vmem:[%s5586_s1 + $0x138] ss:$12 sps:$4 sm:$0xff]  }
  0x3d   : > { %4018 = vmatpush3.bf16.msra.mxu1 %v4162_v8  ;;  %v4244_v8 = vld [vmem:[%s5586_s1 + $0x13c] ss:$12 sps:$4 sm:$0xff]  }
  0x3e   : > { %4019 = vmatprep.subr.bf16.mxu1 %v4512_v6 }
  0x3f   : > { %721 = vmatpush1.bf16.msra.mxu0 %v4165_v10  ;;  %v4245_v10 = vld [vmem:[%s5586_s1 + $0x1a0] ss:$12 sps:$4 sm:$0xff]  }
  0x40   : > { %722 = vmatprep.subr.bf16.mxu0 %v4167_v12  ;;  %v4246_v12 = vld [vmem:[%s5586_s1 + $0x150] ss:$12 sps:$4 sm:$0xff]  }
  0x41   : > { %4020 = vmatpush3.bf16.msra.mxu1 %v4166_v11  ;;  %v4248_v11 = vld [vmem:[%s5586_s1 + $0x154] ss:$12 sps:$4 sm:$0xff]  }
  0x42   : > { %4021 = vmatprep.subr.bf16.mxu1 %v4512_v6 }
  0x43   : > { %723 = vmatpush1.bf16.msra.mxu0 %v4169_v13  ;;  %v4249_v13 = vld [vmem:[%s5586_s1 + $0x1b8] ss:$12 sps:$4 sm:$0xff]  }
  0x44   : > { %1187 = vmatprep.subr.bf16.mxu0 %v4173_v15  ;;  %v4250_v15 = vld [vmem:[%s5586_s1 + $0x168] ss:$12 sps:$4 sm:$0xff]  }
  0x45   : > { %4022 = vmatpush3.bf16.msra.mxu1 %v4170_v14  ;;  %v4252_v14 = vld [vmem:[%s5586_s1 + $0x16c] ss:$12 sps:$4 sm:$0xff]  }
  0x46   : > { %1228 = vmatprep.subr.bf16.mxu1 %v4176_v16  ;;  %725 = vmatmul.mubr.bf16.vlgmr.msra.gmra.mrb[0].mxu0 %v351_v1  ;;  %v4235_v1 = vld [vmem:[%s5586_s1 + $0xb0] ss:$12 sps:$4 sm:$0xff]  }
  0x47   : > { %1188 = vmatpush1.bf16.msra.mxu0 %v4171_v17  ;;  %1219 = vmatprep.mubr.bf16.mxu0 %v3375_v44  ;;  %v4253_v16 = vld [vmem:[%s5586_s1 + $0x1d0] ss:$12 sps:$4 sm:$0xff]  }
  0x48   : > { %4024 = vmatmul.mubr.msk.bf16.vlgmr.msra.gmra.mrb[8].mxu1 %vm688_vm0, %v4615_v26  ;;  %1189 = vmatprep.subr.bf16.mxu0 %v4179_v19  ;;  %v4186_v26 = vld [vmem:[%s5586_s1 + $0x1b0] ss:$12 sps:$4 sm:$0xff]   ;;  %v4254_v19 = vld [vmem:[%s5586_s1 + $0x3c0] ss:$12 sps:$4 sm:$0xff]  }
  0x49   : > { %1229 = vmatpush1.bf16.msra.mxu1 %v4174_v18  ;;  %1260 = vmatprep.mubr.bf16.mxu1 %v4511_v2  ;;  %v4256_v17 = vld [vmem:[%s5586_s1 + $0x3c4] ss:$12 sps:$4 sm:$0xff]  }
  0x4a   : > { %1230 = vmatprep.subr.bf16.mxu1 %v4182_v20  ;;  %v4259_v18 = vld [vmem:[%s5586_s1 + $0x544] ss:$12 sps:$4 sm:$0xff]   ;;  %v4257_v20 = vld [vmem:[%s5586_s1 + $0x540] ss:$12 sps:$4 sm:$0xff]  }
  0x4b   : > { %1190 = vmatpush1.bf16.msra.mxu0 %v4177_v21  ;;  %v4262_v21 = vld [vmem:[%s5586_s1 + $0x3dc] ss:$12 sps:$4 sm:$0xff]  }
  0x4c   : > { %1191 = vmatprep.subr.bf16.mxu0 %v4185_v23  ;;  %v4260_v23 = vld [vmem:[%s5586_s1 + $0x3d8] ss:$12 sps:$4 sm:$0xff]  }
  0x4d   : > { %1231 = vmatpush1.bf16.msra.mxu1 %v4180_v22  ;;  %v4265_v22 = vld [vmem:[%s5586_s1 + $0x55c] ss:$12 sps:$4 sm:$0xff]  }
  0x4e   : > { %1232 = vmatprep.subr.bf16.mxu1 %v4188_v24  ;;  %v4263_v24 = vld [vmem:[%s5586_s1 + $0x558] ss:$12 sps:$4 sm:$0xff]  }
  0x4f   : > { %1192 = vmatpush1.bf16.msra.mxu0 %v4183_v25  ;;  %v4268_v25 = vld [vmem:[%s5586_s1 + $0x3f4] ss:$12 sps:$4 sm:$0xff]  }
  0x50   : > { %1193 = vmatprep.subr.bf16.mxu0 %v4191_v27  ;;  %v4972_v27 = vld [vmem:[%s4591_s20] sm:$0xee] }
  0x51   : > { %1233 = vmatpush1.bf16.msra.mxu1 %v4186_v26  ;;  %v4271_v26 = vld [vmem:[%s5586_s1 + $0x574] ss:$12 sps:$4 sm:$0xff]  }
  0x52   : > { %1234 = vmatprep.subr.bf16.mxu1 %v4194_v28  ;;  %v4266_v28 = vld [vmem:[%s5586_s1 + $0x3f0] ss:$12 sps:$4 sm:$0xff]  }
  0x53   : > { %1194 = vmatpush1.bf16.msra.mxu0 %v4189_v29  ;;  %v3520_v29 = vcombine.high %v4972_v27, %v4972_v27 }
  0x54   : > { %1195 = vmatprep.subr.bf16.mxu0 %v4197_v31  ;;  %v4274_v31 = vld [vmem:[%s5586_s1 + $0x40c] ss:$12 sps:$4 sm:$0xff]  }
  0x55   : > { %1235 = vmatpush1.bf16.msra.mxu1 %v4192_v30  ;;  %v4269_v30 = vld [vmem:[%s5586_s1 + $0x570] ss:$12 sps:$4 sm:$0xff]  }
  0x56   : > { %3907 = vmatprep.subr.bf16.mxu1 %v4199_v33  ;;  %v4272_v33 = vld [vmem:[%s5586_s1 + $0x408] ss:$12 sps:$4 sm:$0xff]  }
  0x57   : > { %1196 = vmatpush1.bf16.msra.mxu0 %v4195_v34  ;;  %v4277_v34 = vld [vmem:[%s5586_s1 + $0x58c] ss:$12 sps:$4 sm:$0xff]  }
  0x58   : > { %3437 = vmatmul.mubr.msk.bf16.vlgmr.msra.gmra.mrb[12].mxu1 %vm688_vm0, %v4798_v32  ;;  %1197 = vmatprep.subr.bf16.mxu0 %v4203_v36  ;;  %v4995_v36 = vld [vmem:[%s4591_s20 + $0x8] ss:$0 sps:$4 sm:$0xee]  }
  0x59   : > { %3908 = vmatpush3.bf16.msra.mxu1 %v4200_v35  ;;  %1301 = vmatprep.mubr.bf16.mxu1 %v3375_v44  ;;  %v4275_v35 = vld [vmem:[%s5586_s1 + $0x588] ss:$12 sps:$4 sm:$0xff]   ;;  %v4284_v44 = vld [vmem:[%s5586_s1 + $0x438] ss:$12 sps:$4 sm:$0xff]  }
  0x5a   : > { %3909 = vmatprep.subr.bf16.mxu1 %v4204_v37  ;;  %v4280_v37 = vld [vmem:[%s5586_s1 + $0x424] ss:$12 sps:$4 sm:$0xff]  }
  0x5b   : > { %1198 = vmatpush1.bf16.msra.mxu0 %v4201_v38  ;;  %v4282_v38 = vld [vmem:[%s5586_s1 + $0x488] ss:$12 sps:$4 sm:$0xff]  }
  0x5c   : > { %1199 = vmatprep.subr.bf16.mxu0 %v4208_v40  ;;  %v1442_v40 = vrot.slane %v4995_v36, 1 }
  0x5d   : > { %3910 = vmatpush3.bf16.msra.mxu1 %v4205_v39  ;;  %v4278_v39 = vld [vmem:[%s5586_s1 + $0x420] ss:$12 sps:$4 sm:$0xff]  }
  0x5e   : > { %3911 = vmatprep.subr.bf16.mxu1 %v4209_v41  ;;  %v4283_v41 = vld [vmem:[%s5586_s1 + $0x3c8] ss:$12 sps:$4 sm:$0xff]  }
  0x5f   : > { %1200 = vmatpush1.bf16.msra.mxu0 %v4206_v43  ;;  %v4287_v43 = vld [vmem:[%s5586_s1 + $0x4a0] ss:$12 sps:$4 sm:$0xff]  }
  0x60   : > { %1201 = vmatprep.subr.bf16.mxu0 %v4213_v46  ;;  %v4291_v46 = vld [vmem:[%s5586_s1 + $0x454] ss:$12 sps:$4 sm:$0xff]  }
  0x61   : > { %3912 = vmatpush3.bf16.msra.mxu1 %v4210_v45  ;;  %v4288_v45 = vld [vmem:[%s5586_s1 + $0x3e0] ss:$12 sps:$4 sm:$0xff]  }
  0x62   : > { %3913 = vmatprep.subr.bf16.mxu1 %v4214_v47  ;;  %v4292_v47 = vld [vmem:[%s5586_s1 + $0x4b8] ss:$12 sps:$4 sm:$0xff]  }
  0x63   : > { %1202 = vmatpush1.bf16.msra.mxu0 %v4211_v48  ;;  %v4289_v48 = vld [vmem:[%s5586_s1 + $0x450] ss:$12 sps:$4 sm:$0xff]  }
  0x64   : > { %1203 = vmatprep.subr.bf16.mxu0 %v4218_v50  ;;  %v4296_v50 = vld [vmem:[%s5586_s1 + $0x46c] ss:$12 sps:$4 sm:$0xff]  }
  0x65   : > { %3914 = vmatpush3.bf16.msra.mxu1 %v4215_v49  ;;  %v4293_v49 = vld [vmem:[%s5586_s1 + $0x3f8] ss:$12 sps:$4 sm:$0xff]  }
  0x66   : > { %3915 = vmatprep.subr.bf16.mxu1 %v4219_v51  ;;  %v4297_v51 = vld [vmem:[%s5586_s1 + $0x4d0] ss:$12 sps:$4 sm:$0xff]  }
  0x67   : > { %1204 = vmatpush1.bf16.msra.mxu0 %v4216_v52  ;;  %v4294_v52 = vld [vmem:[%s5586_s1 + $0x468] ss:$12 sps:$4 sm:$0xff]  }
  0x68   : > { %1205 = vmatprep.subr.bf16.mxu0 %v4223_v54  ;;  %v4301_v54 = vld [vmem:[%s5586_s1 + $0x484] ss:$12 sps:$4 sm:$0xff]  }
  0x69   : > { %3916 = vmatpush3.bf16.msra.mxu1 %v4220_v53  ;;  %v4298_v53 = vld [vmem:[%s5586_s1 + $0x410] ss:$12 sps:$4 sm:$0xff]  }
  0x6a   : > { %3917 = vmatprep.subr.bf16.mxu1 %v4224_v55  ;;  %v4302_v55 = vld [vmem:[%s5586_s1 + $0x4e8] ss:$12 sps:$4 sm:$0xff]  }
  0x6b   : > { %1206 = vmatpush1.bf16.msra.mxu0 %v4221_v56  ;;  %v4299_v56 = vld [vmem:[%s5586_s1 + $0x480] ss:$12 sps:$4 sm:$0xff]  }
  0x6c   : > { %1207 = vmatprep.subr.bf16.mxu0 %v4228_v58  ;;  %v4306_v58 = vld [vmem:[%s5586_s1 + $0x49c] ss:$12 sps:$4 sm:$0xff]  }
  0x6d   : > { %3918 = vmatpush3.bf16.msra.mxu1 %v4225_v57  ;;  %v4303_v57 = vld [vmem:[%s5586_s1 + $0x428] ss:$12 sps:$4 sm:$0xff]  }
  0x6e   : > { %3919 = vmatprep.subr.bf16.mxu1 %v4229_v59  ;;  %v4307_v59 = vld [vmem:[%s5586_s1 + $0x500] ss:$12 sps:$4 sm:$0xff]  }
  0x6f   : > { %1208 = vmatpush1.bf16.msra.mxu0 %v4226_v60  ;;  %v4304_v60 = vld [vmem:[%s5586_s1 + $0x498] ss:$12 sps:$4 sm:$0xff]  }
  0x70   : > { %1209 = vmatprep.subr.bf16.mxu0 %v4233_v62  ;;  %v4311_v62 = vld [vmem:[%s5586_s1 + $0x4b4] ss:$12 sps:$4 sm:$0xff]  }
  0x71   : > { %3920 = vmatpush3.bf16.msra.mxu1 %v4230_v61  ;;  %v4308_v61 = vld [vmem:[%s5586_s1 + $0x440] ss:$12 sps:$4 sm:$0xff]  }
  0x72   : > { %3921 = vmatprep.subr.bf16.mxu1 %v4234_v63  ;;  %v4312_v63 = vld [vmem:[%s5586_s1 + $0x518] ss:$12 sps:$4 sm:$0xff]  }
  0x73   : > { %1210 = vmatpush1.bf16.msra.mxu0 %v4231_v0  ;;  %v4309_v0 = vld [vmem:[%s5586_s1 + $0x4b0] ss:$12 sps:$4 sm:$0xff]  }
  0x74   : > { %1211 = vmatprep.subr.bf16.mxu0 %v4240_v3  ;;  %v4316_v3 = vld [vmem:[%s5586_s1 + $0x4cc] ss:$12 sps:$4 sm:$0xff]  }
  0x75   : > { %3922 = vmatpush3.bf16.msra.mxu1 %v4235_v1  ;;  %v4313_v1 = vld [vmem:[%s5586_s1 + $0x458] ss:$12 sps:$4 sm:$0xff]  }
  0x76   : > { %4027 = vmatprep.subr.bf16.mxu1 %v4512_v6 }
  0x77   : > { %1212 = vmatpush1.bf16.msra.mxu0 %v4238_v4  ;;  %v4317_v4 = vld [vmem:[%s5586_s1 + $0x530] ss:$12 sps:$4 sm:$0xff]  }
  0x78   : > { %1302 = vmatmul.mubr.bf16.vlgmr.msra.gmra.mrb[16].mxu1 %v3374_v5  ;;  %1213 = vmatprep.subr.bf16.mxu0 %v4244_v8  ;;  %v4318_v8 = vld [vmem:[%s5586_s1 + $0x470] ss:$12 sps:$4 sm:$0xff]  }
  0x79   : > { %4028 = vmatpush3.bf16.msra.mxu1 %v4241_v7  ;;  %4035 = vmatprep.mubr.msk.bf16.mxu1 %vm4513_vm1, %v4512_v6  ;;  %v3519_v7 = vcombine.low %v4972_v27, %v4972_v27 }
  0x7a   : > { %4029 = vmatprep.subr.bf16.mxu1 %v4512_v6 }
  0x7b   : > { %1214 = vmatpush1.bf16.msra.mxu0 %v4242_v9  ;;  %v4323_v9 = vld [vmem:[%s5586_s1 + $0x4e4] ss:$12 sps:$4 sm:$0xff]  }
  0x7c   : > { %1215 = vmatprep.subr.bf16.mxu0 %v4248_v11  ;;  %v4321_v11 = vld [vmem:[%s5586_s1 + $0x4e0] ss:$12 sps:$4 sm:$0xff]  }
  0x7d   : > { %4030 = vmatpush3.bf16.msra.mxu1 %v4245_v10  ;;  %v1440_v10 = vrot.slane %v3519_v7, 1  ;;  %v4381_v7 = vld [vmem:[%s5586_s1 + $0x5f0] ss:$12 sps:$4 sm:$0xff]  }
  0x7e   : > { %4031 = vmatprep.subr.bf16.mxu1 %v4512_v6 }
  0x7f   : > { %1216 = vmatpush1.bf16.msra.mxu0 %v4246_v12  ;;  %v4324_v12 = vld [vmem:[%s5586_s1 + $0x548] ss:$12 sps:$4 sm:$0xff]  }
  0x80   : > { %1217 = vmatprep.subr.bf16.mxu0 %v4252_v14  ;;  %v4325_v14 = vld [vmem:[%s5586_s1 + $0x4f8] ss:$12 sps:$4 sm:$0xff]  }
  0x81   : > { %4032 = vmatpush3.bf16.msra.mxu1 %v4249_v13  ;;  %v4327_v13 = vld [vmem:[%s5586_s1 + $0x4fc] ss:$12 sps:$4 sm:$0xff]  }
  0x82   : > { %4033 = vmatprep.subr.bf16.mxu1 %v4512_v6 }
  0x83   : > { %1218 = vmatpush1.bf16.msra.mxu0 %v4250_v15  ;;  %v4328_v15 = vld [vmem:[%s5586_s1 + $0x560] ss:$12 sps:$4 sm:$0xff]  }
  0x84   : > { %1768 = vmatprep.subr.bf16.mxu0 %v4256_v17  ;;  %v5125_v17 = vld [vmem:[%s4591_s20] sm:$0xee] }
  0x85   : > { %4034 = vmatpush3.bf16.msra.mxu1 %v4253_v16  ;;  %v4331_v16 = vld [vmem:[%s5586_s1 + $0x514] ss:$12 sps:$4 sm:$0xff]  }
  0x86   : > { %1809 = vmatprep.subr.bf16.mxu1 %v4259_v18  ;;  %1220 = vmatmul.mubr.bf16.vlgmr.msra.gmra.mrb[4].mxu0 %v3374_v5  ;;  %v4314_v5 = vld [vmem:[%s5586_s1 + $0x4c8] ss:$12 sps:$4 sm:$0xff]   ;;  %v5128_v18 = vld [vmem:[%s4591_s20 + $0xc] sm:$0x11] }
  0x87   : > { %1769 = vmatpush1.bf16.msra.mxu0 %v4254_v19  ;;  %v4329_v19 = vld [vmem:[%s5586_s1 + $0x510] ss:$12 sps:$4 sm:$0xff]  }
  0x88   : > { %4036 = vmatmul.mubr.msk.bf16.vlgmr.msra.gmra.mrb[20].mxu1 %vm688_vm0, %v4798_v32  ;;  %1770 = vmatprep.subr.bf16.mxu0 %v4262_v21  ;;  %v1441_v32 = vrot.slane %v3520_v29, 1  ;;  %v4335_v21 = vld [vmem:[%s5586_s1 + $0x52c] ss:$12 sps:$4 sm:$0xff]   ;;  %v4342_v29 = vld [vmem:[%s5586_s1 + $0x724] ss:$12 sps:$4 sm:$0xff]  }
  0x89   : > { %1810 = vmatpush1.bf16.msra.mxu1 %v4257_v20  ;;  %1841 = vmatprep.mubr.bf16.mxu1 %v4511_v2  ;;  %v4332_v20 = vld [vmem:[%s5586_s1 + $0x578] ss:$12 sps:$4 sm:$0xff]  }
  0x8a   : > { %1811 = vmatprep.subr.bf16.mxu1 %v4265_v22  ;;  %1800 = vmatprep.mubr.bf16.mxu0 %v1441_v32  ;;  %v3665_v22 = vcombine.high %v5125_v17, %v5128_v18 }
  0x8b   : > { %1771 = vmatpush1.bf16.msra.mxu0 %v4260_v23  ;;  %v4333_v23 = vld [vmem:[%s5586_s1 + $0x528] ss:$12 sps:$4 sm:$0xff]  }
  0x8c   : > { %1772 = vmatprep.subr.bf16.mxu0 %v4268_v25  ;;  %v4339_v25 = vld [vmem:[%s5586_s1 + $0x5a4] ss:$12 sps:$4 sm:$0xff]   ;;  %v2043_v27 = vshll.u32 %v3665_v22, 16 }
  0x8d   : > { %1812 = vmatpush1.bf16.msra.mxu1 %v4263_v24  ;;  %v4336_v24 = vld [vmem:[%s5586_s1 + $0x590] ss:$12 sps:$4 sm:$0xff]  }
  0x8e   : > { %1813 = vmatprep.subr.bf16.mxu1 %v4271_v26  ;;  %v2040_v26 = vshrl.u32 %v3665_v22, 16  ;;  %v4392_v22 = vld [vmem:[%s5586_s1 + $0x690] ss:$12 sps:$4 sm:$0xff]  }
  0x8f   : > { %1773 = vmatpush1.bf16.msra.mxu0 %v4266_v28  ;;  %v4337_v28 = vld [vmem:[%s5586_s1 + $0x5a0] ss:$12 sps:$4 sm:$0xff]  }
  0x90   : > { %1774 = vmatprep.subr.bf16.mxu0 %v4274_v31  ;;  %v4345_v31 = vld [vmem:[%s5586_s1 + $0x5bc] ss:$12 sps:$4 sm:$0xff]  }
  0x91   : > { %1814 = vmatpush1.bf16.msra.mxu1 %v4269_v30  ;;  %v4340_v30 = vld [vmem:[%s5586_s1 + $0x720] ss:$12 sps:$4 sm:$0xff]  }
  0x92   : > { %1815 = vmatprep.subr.bf16.mxu1 %v4277_v34  ;;  %v2042_v34 = vrot.slane %v2040_v26, 1 }
  0x93   : > { %1775 = vmatpush1.bf16.msra.mxu0 %v4272_v33  ;;  %v5166_v33 = vld [vmem:[%s4591_s20 + $0x14] sm:$0x1] }
  0x94   : > { %1776 = vmatprep.subr.bf16.mxu0 %v4280_v37  ;;  %v4348_v37 = vld [vmem:[%s5586_s1 + $0x73c] ss:$12 sps:$4 sm:$0xff]  }
  0x95   : > { %1816 = vmatpush1.bf16.msra.mxu1 %v4275_v35  ;;  %v2045_v35 = vrot.slane %v2043_v27, 2 }
  0x96   : > { %3934 = vmatprep.subr.bf16.mxu1 %v4282_v38  ;;  %v4343_v38 = vld [vmem:[%s5586_s1 + $0x5b8] ss:$12 sps:$4 sm:$0xff]  }
  0x97   : > { %1777 = vmatpush1.bf16.msra.mxu0 %v4278_v39  ;;  %v2046_v36 = vor.u32 %v2045_v35, %v2042_v34  ;;  %v4401_v34 = vld [vmem:[%s5586_s1 + $0x650] ss:$12 sps:$4 sm:$0xff]  }
  0x98   : > { %3582 = vmatmul.mubr.msk.bf16.vlgmr.msra.gmra.mrb[24].mxu1 %vm688_vm0, %v1442_v40  ;;  %1778 = vmatprep.subr.bf16.mxu0 %v4286_v42  ;;  %v4351_v42 = vld [vmem:[%s5586_s1 + $0x5d4] ss:$12 sps:$4 sm:$0xff]   ;;  %v4406_v35 = vld [vmem:[%s5586_s1 + $0x6c4] ss:$12 sps:$4 sm:$0xff]  }
  0x99   : > { %3935 = vmatpush3.bf16.msra.mxu1 %v4283_v41  ;;  %1882 = vmatprep.mubr.bf16.mxu1 %v1441_v32  ;;  %v1934_v32 = vld [vmem:[%s4591_s20 + $0x8] sm:$0xe]  ;;  %v4346_v41 = vld [vmem:[%s5586_s1 + $0x738] ss:$12 sps:$4 sm:$0xff]  }
  0x9a   : > { %3936 = vmatprep.subr.bf16.mxu1 %v4287_v43  ;;  %v3666_v39 = vcombine.low %v1934_v32, %v5166_v33  ;;  %v4349_v43 = vld [vmem:[%s5586_s1 + $0x5d0] ss:$12 sps:$4 sm:$0xff]  }
  0x9b   : > { %1779 = vmatpush1.bf16.msra.mxu0 %v4284_v44 }
  0x9c   : > { %1780 = vmatprep.subr.bf16.mxu0 %v4291_v46  ;;  %v2048_v44 = vshrl.u32 %v3666_v39, 16  ;;  %v4352_v46 = vld [vmem:[%s5586_s1 + $0x750] ss:$12 sps:$4 sm:$0xff]  }
  0x9d   : > { %3937 = vmatpush3.bf16.msra.mxu1 %v4288_v45  ;;  %v2051_v45 = vshll.u32 %v3666_v39, 16  ;;  %v4407_v39 = vld [vmem:[%s5586_s1 + $0x728] ss:$12 sps:$4 sm:$0xff]  }
  0x9e   : > { %3938 = vmatprep.subr.bf16.mxu1 %v4292_v47  ;;  %v4357_v47 = vld [vmem:[%s5586_s1 + $0x5ec] ss:$12 sps:$4 sm:$0xff]  }
  0x9f   : > { %1781 = vmatpush1.bf16.msra.mxu0 %v4289_v48  ;;  %v4360_v48 = vld [vmem:[%s5586_s1 + $0x76c] ss:$12 sps:$4 sm:$0xff]  }
  0xa0   : > { %1782 = vmatprep.subr.bf16.mxu0 %v4296_v50  ;;  %v2050_v50 = vrot.slane %v2048_v44, 1  ;;  %v4415_v44 = vld [vmem:[%s5586_s1 + $0x758] ss:$12 sps:$4 sm:$0xff]  }
  0xa1   : > { %3939 = vmatpush3.bf16.msra.mxu1 %v4293_v49  ;;  %v4355_v49 = vld [vmem:[%s5586_s1 + $0x5e8] ss:$12 sps:$4 sm:$0xff]  }
  0xa2   : > { %3940 = vmatprep.subr.bf16.mxu1 %v4297_v51  ;;  %v2053_v51 = vrot.slane %v2051_v45, 2  ;;  %v4418_v45 = vld [vmem:[%s5586_s1 + $0x70c] ss:$12 sps:$4 sm:$0xff]  }
  0xa3   : > { %1783 = vmatpush1.bf16.msra.mxu0 %v4294_v52  ;;  %v4358_v52 = vld [vmem:[%s5586_s1 + $0x768] ss:$12 sps:$4 sm:$0xff]  }
  0xa4   : > { %1784 = vmatprep.subr.bf16.mxu0 %v4301_v54  ;;  %v4365_v54 = vld [vmem:[%s5586_s1 + $0x668] ss:$12 sps:$4 sm:$0xff]  }
  0xa5   : > { %3941 = vmatpush3.bf16.msra.mxu1 %v4298_v53  ;;  %v4363_v53 = vld [vmem:[%s5586_s1 + $0x604] ss:$12 sps:$4 sm:$0xff]  }
  0xa6   : > { %3942 = vmatprep.subr.bf16.mxu1 %v4302_v55  ;;  %v4361_v55 = vld [vmem:[%s5586_s1 + $0x600] ss:$12 sps:$4 sm:$0xff]  }
  0xa7   : > { %1785 = vmatpush1.bf16.msra.mxu0 %v4299_v56  ;;  %v5215_v56 = vor.u32 %v2053_v51, %v2050_v50  ;;  %v5361_v50 = vld [vmem:[%s4591_s20] sm:$0xcc] }
  0xa8   : > { %1786 = vmatprep.subr.bf16.mxu0 %v4306_v58  ;;  %v4369_v58 = vld [vmem:[%s5586_s1 + $0x61c] ss:$12 sps:$4 sm:$0xff]   ;;  %v4420_v51 = vld [vmem:[%s5586_s1 + $0x780] ss:$12 sps:$4 sm:$0xff]  }
  0xa9   : > { %3943 = vmatpush3.bf16.msra.mxu1 %v4303_v57  ;;  %v4366_v57 = vld [vmem:[%s5586_s1 + $0x5a8] ss:$12 sps:$4 sm:$0xff]  }
  0xaa   : > { %3944 = vmatprep.subr.bf16.mxu1 %v4307_v59  ;;  %v4370_v59 = vld [vmem:[%s5586_s1 + $0x680] ss:$12 sps:$4 sm:$0xff]  }
  0xab   : > { %1787 = vmatpush1.bf16.msra.mxu0 %v4304_v60  ;;  %v4367_v60 = vld [vmem:[%s5586_s1 + $0x618] ss:$12 sps:$4 sm:$0xff]  }
  0xac   : > { %1788 = vmatprep.subr.bf16.mxu0 %v4311_v62  ;;  %v4374_v62 = vld [vmem:[%s5586_s1 + $0x634] ss:$12 sps:$4 sm:$0xff]  }
  0xad   : > { %3945 = vmatpush3.bf16.msra.mxu1 %v4308_v61  ;;  %v4371_v61 = vld [vmem:[%s5586_s1 + $0x5c0] ss:$12 sps:$4 sm:$0xff]  }
  0xae   : > { %3946 = vmatprep.subr.bf16.mxu1 %v4312_v63  ;;  %v4375_v63 = vld [vmem:[%s5586_s1 + $0x698] ss:$12 sps:$4 sm:$0xff]  }
  0xaf   : > { %1789 = vmatpush1.bf16.msra.mxu0 %v4309_v0  ;;  %v4372_v0 = vld [vmem:[%s5586_s1 + $0x630] ss:$12 sps:$4 sm:$0xff]  }
  0xb0   : > { %1790 = vmatprep.subr.bf16.mxu0 %v4316_v3  ;;  %v4379_v3 = vld [vmem:[%s5586_s1 + $0x64c] ss:$12 sps:$4 sm:$0xff]  }
  0xb1   : > { %3947 = vmatpush3.bf16.msra.mxu1 %v4313_v1  ;;  %v4376_v1 = vld [vmem:[%s5586_s1 + $0x5d8] ss:$12 sps:$4 sm:$0xff]  }
  0xb2   : > { %3948 = vmatprep.subr.bf16.mxu1 %v4317_v4  ;;  %v4380_v4 = vld [vmem:[%s5586_s1 + $0x6b0] ss:$12 sps:$4 sm:$0xff]  }
  0xb3   : > { %1791 = vmatpush1.bf16.msra.mxu0 %v4314_v5  ;;  %v4377_v5 = vld [vmem:[%s5586_s1 + $0x648] ss:$12 sps:$4 sm:$0xff]  }
  0xb4   : > { %1792 = vmatprep.subr.bf16.mxu0 %v4323_v9  ;;  %v4385_v9 = vld [vmem:[%s5586_s1 + $0x6c8] ss:$12 sps:$4 sm:$0xff]  }
  0xb5   : > { %3949 = vmatpush3.bf16.msra.mxu1 %v4318_v8  ;;  %v4384_v8 = vld [vmem:[%s5586_s1 + $0x664] ss:$12 sps:$4 sm:$0xff]  }
  0xb6   : > { %4039 = vmatprep.subr.bf16.mxu1 %v4512_v6 }
  0xb7   : > { %1793 = vmatpush1.bf16.msra.mxu0 %v4321_v11  ;;  %v4386_v11 = vld [vmem:[%s5586_s1 + $0x608] ss:$12 sps:$4 sm:$0xff]  }
  0xb8   : > { %1883 = vmatmul.mubr.bf16.vlgmr.msra.gmra.mrb[28].mxu1 %v1440_v10  ;;  %1794 = vmatprep.subr.bf16.mxu0 %v4327_v13  ;;  %v4390_v13 = vld [vmem:[%s5586_s1 + $0x6e0] ss:$12 sps:$4 sm:$0xff]  }
  0xb9   : > { %4040 = vmatpush3.bf16.msra.mxu1 %v4324_v12  ;;  %4047 = vmatprep.mubr.msk.bf16.mxu1 %vm4513_vm1, %v4512_v6  ;;  %v4389_v12 = vld [vmem:[%s5586_s1 + $0x67c] ss:$12 sps:$4 sm:$0xff]  }
  0xba   : > { %4041 = vmatprep.subr.bf16.mxu1 %v4512_v6 }
  0xbb   : > { %1795 = vmatpush1.bf16.msra.mxu0 %v4325_v14  ;;  %v4387_v14 = vld [vmem:[%s5586_s1 + $0x678] ss:$12 sps:$4 sm:$0xff]  }
  0xbc   : > { %1796 = vmatprep.subr.bf16.mxu0 %v4331_v16  ;;  %v3664_v16 = vcombine.low %v5125_v17, %v5128_v18  ;;  %v4396_v17 = vld [vmem:[%s5586_s1 + $0x638] ss:$12 sps:$4 sm:$0xff]  }
  0xbd   : > { %4042 = vmatpush3.bf16.msra.mxu1 %v4328_v15  ;;  %v4391_v15 = vld [vmem:[%s5586_s1 + $0x620] ss:$12 sps:$4 sm:$0xff]  }
  0xbe   : > { %4043 = vmatprep.subr.bf16.mxu1 %v4512_v6  ;;  %v2035_v26 = vshll.u32 %v3664_v16, 16 }
  0xbf   : > { %1797 = vmatpush1.bf16.msra.mxu0 %v4329_v19  ;;  %v4394_v19 = vld [vmem:[%s5586_s1 + $0x694] ss:$12 sps:$4 sm:$0xff]  }
  0xc0   : > { %1798 = vmatprep.subr.bf16.mxu0 %v4335_v21  ;;  %v2037_v32 = vrot.slane %v2035_v26, 2 }
  0xc1   : > { %4044 = vmatpush3.bf16.msra.mxu1 %v4332_v20  ;;  %v4395_v20 = vld [vmem:[%s5586_s1 + $0x6f8] ss:$12 sps:$4 sm:$0xff]  }
  0xc2   : > { %4045 = vmatprep.subr.bf16.mxu1 %v4512_v6 }
  0xc3   : > { %1799 = vmatpush1.bf16.msra.mxu0 %v4333_v23 }
  0xc4   : > { %2380 = vmatprep.subr.bf16.mxu0 %v4339_v25  ;;  %v2032_v25 = vshrl.u32 %v3664_v16, 16  ;;  %v4453_v16 = vld [vmem:[%s5586_s1 + $0x860] ss:$12 sps:$4 sm:$0xff]  }
  0xc5   : > { %4046 = vmatpush3.bf16.msra.mxu1 %v4336_v24  ;;  %v4399_v24 = vld [vmem:[%s5586_s1 + $0x6ac] ss:$12 sps:$4 sm:$0xff]  }
  0xc6   : > { %2421 = vmatprep.subr.bf16.mxu1 %v4342_v29  ;;  %1801 = vmatmul.mubr.bf16.vlgmr.msra.gmra.mrb[8].mxu0 %v1440_v10  ;;  %v4382_v10 = vld [vmem:[%s5586_s1 + $0x660] ss:$12 sps:$4 sm:$0xff]   ;;  %v4400_v29 = vld [vmem:[%s5586_s1 + $0x710] ss:$12 sps:$4 sm:$0xff]  }
  0xc7   : > { %2381 = vmatpush1.bf16.msra.mxu0 %v4337_v28  ;;  %2412 = vmatprep.mubr.bf16.mxu0 %v2046_v36 }
  0xc8   : > { %4048 = vmatmul.mubr.msk.bf16.vlgmr.msra.gmra.mrb[32].mxu1 %vm688_vm0, %v1442_v40  ;;  %2382 = vmatprep.subr.bf16.mxu0 %v4345_v31  ;;  %v4354_v40 = vld [vmem:[%s5586_s1 + $0x754] ss:$12 sps:$4 sm:$0xff]   ;;  %v2034_v31 = vrot.slane %v2032_v25, 1 }
  0xc9   : > { %2422 = vmatpush1.bf16.msra.mxu1 %v4340_v30  ;;  %2453 = vmatprep.mubr.bf16.mxu1 %v4511_v2  ;;  %v4397_v30 = vld [vmem:[%s5586_s1 + $0x6a8] ss:$12 sps:$4 sm:$0xff]  }
  0xca   : > { %2423 = vmatprep.subr.bf16.mxu1 %v4348_v37  ;;  %v4404_v37 = vld [vmem:[%s5586_s1 + $0x6c0] ss:$12 sps:$4 sm:$0xff]  }
  0xcb   : > { %2383 = vmatpush1.bf16.msra.mxu0 %v4343_v38  ;;  %v2038_v38 = vor.u32 %v2037_v32, %v2034_v31  ;;  %v4455_v32 = vld [vmem:[%s5586_s1 + $0x810] ss:$12 sps:$4 sm:$0xff]  }
  0xcc   : > { %2384 = vmatprep.subr.bf16.mxu0 %v4351_v42  ;;  %v4408_v42 = vld [vmem:[%s5586_s1 + $0x6d8] ss:$12 sps:$4 sm:$0xff]  }
  0xcd   : > { %2424 = vmatpush1.bf16.msra.mxu1 %v4346_v41  ;;  %v4410_v41 = vld [vmem:[%s5586_s1 + $0x6dc] ss:$12 sps:$4 sm:$0xff]  }
  0xce   : > { %2425 = vmatprep.subr.bf16.mxu1 %v4354_v40  ;;  %v4414_v40 = vld [vmem:[%s5586_s1 + $0x6f4] ss:$12 sps:$4 sm:$0xff]  }
  0xcf   : > { %2385 = vmatpush1.bf16.msra.mxu0 %v4349_v43  ;;  %v4412_v43 = vld [vmem:[%s5586_s1 + $0x6f0] ss:$12 sps:$4 sm:$0xff]  }
  0xd0   : > { %2386 = vmatprep.subr.bf16.mxu0 %v4357_v47  ;;  %v4419_v47 = vld [vmem:[%s5586_s1 + $0x770] ss:$12 sps:$4 sm:$0xff]  }
  0xd1   : > { %2426 = vmatpush1.bf16.msra.mxu1 %v4352_v46  ;;  %v4416_v46 = vld [vmem:[%s5586_s1 + $0x708] ss:$12 sps:$4 sm:$0xff]  }
  0xd2   : > { %2427 = vmatprep.subr.bf16.mxu1 %v4360_v48  ;;  %v4422_v48 = vld [vmem:[%s5586_s1 + $0x784] ss:$12 sps:$4 sm:$0xff]  }
  0xd3   : > { %2387 = vmatpush1.bf16.msra.mxu0 %v4355_v49  ;;  %v4425_v49 = vld [vmem:[%s5586_s1 + $0x904] ss:$12 sps:$4 sm:$0xff]  }
  0xd4   : > { %2388 = vmatprep.subr.bf16.mxu0 %v4363_v53  ;;  %v4428_v53 = vld [vmem:[%s5586_s1 + $0x79c] ss:$12 sps:$4 sm:$0xff]  }
  0xd5   : > { %2428 = vmatpush1.bf16.msra.mxu1 %v4358_v52  ;;  %v4423_v52 = vld [vmem:[%s5586_s1 + $0x900] ss:$12 sps:$4 sm:$0xff]  }
  0xd6   : > { %3961 = vmatprep.subr.bf16.mxu1 %v4365_v54  ;;  %v3810_v54 = vcombine.high %v5361_v50, %v5128_v18 }
  0xd7   : > { %2389 = vmatpush1.bf16.msra.mxu0 %v4361_v55  ;;  %v4431_v55 = vld [vmem:[%s5586_s1 + $0x91c] ss:$12 sps:$4 sm:$0xff]  }
  0xd8   : > { %3727 = vmatmul.mubr.msk.bf16.vlgmr.msra.gmra.mrb[36].mxu1 %vm688_vm0, %v5215_v56  ;;  %2390 = vmatprep.subr.bf16.mxu0 %v4369_v58  ;;  %v4429_v58 = vld [vmem:[%s5586_s1 + $0x918] ss:$12 sps:$4 sm:$0xff]  }
  0xd9   : > { %3962 = vmatpush3.bf16.msra.mxu1 %v4366_v57  ;;  %2494 = vmatprep.mubr.bf16.mxu1 %v2046_v36  ;;  %v4411_v36 = vld [vmem:[%s5586_s1 + $0x740] ss:$12 sps:$4 sm:$0xff]   ;;  %v4426_v57 = vld [vmem:[%s5586_s1 + $0x798] ss:$12 sps:$4 sm:$0xff]  }
  0xda   : > { %3963 = vmatprep.subr.bf16.mxu1 %v4370_v59  ;;  %v4434_v59 = vld [vmem:[%s5586_s1 + $0x7b4] ss:$12 sps:$4 sm:$0xff]  }
  0xdb   : > { %2391 = vmatpush1.bf16.msra.mxu0 %v4367_v60  ;;  %v2637_v60 = vrot.slane %v3810_v54, 2 }
  0xdc   : > { %2392 = vmatprep.subr.bf16.mxu0 %v4374_v62 }
  0xdd   : > { %3964 = vmatpush3.bf16.msra.mxu1 %v4371_v61 }
  0xde   : > { %3965 = vmatprep.subr.bf16.mxu1 %v4375_v63  ;;  %v4432_v63 = vld [vmem:[%s5586_s1 + $0x7b0] ss:$12 sps:$4 sm:$0xff]  }
  0xdf   : > { %2393 = vmatpush1.bf16.msra.mxu0 %v4372_v0  ;;  %v4435_v0 = vld [vmem:[%s5586_s1 + $0x930] ss:$12 sps:$4 sm:$0xff]  }
  0xe0   : > { %2394 = vmatprep.subr.bf16.mxu0 %v4379_v3 }
  0xe1   : > { %3966 = vmatpush3.bf16.msra.mxu1 %v4376_v1 }
  0xe2   : > { %3967 = vmatprep.subr.bf16.mxu1 %v4380_v4  ;;  %v2546_v4 = vld [vmem:[%s4591_s20 + $0x8] sm:$0xc] }
  0xe3   : > { %2395 = vmatpush1.bf16.msra.mxu0 %v4377_v5 }
  0xe4   : > { %2396 = vmatprep.subr.bf16.mxu0 %v4384_v8  ;;  %v4438_v8 = vld [vmem:[%s5586_s1 + $0x7c8] ss:$12 sps:$4 sm:$0xff]  }
  0xe5   : > { %3968 = vmatpush3.bf16.msra.mxu1 %v4381_v7  ;;  %v4443_v7 = vld [vmem:[%s5586_s1 + $0x94c] ss:$12 sps:$4 sm:$0xff]  }
  0xe6   : > { %3969 = vmatprep.subr.bf16.mxu1 %v4385_v9  ;;  %v3811_v9 = vcombine.low %v2546_v4, %v5166_v33  ;;  %v4444_v33 = vld [vmem:[%s5586_s1 + $0x7e0] ss:$12 sps:$4 sm:$0xff]   ;;  %v4495_v4 = vld [vmem:[%s5586_s1 + $0x8d0] ss:$12 sps:$4 sm:$0xff]  }
  0xe7   : > { %2397 = vmatpush1.bf16.msra.mxu0 %v4382_v10  ;;  %v4441_v10 = vld [vmem:[%s5586_s1 + $0x948] ss:$12 sps:$4 sm:$0xff]  }
  0xe8   : > { %2398 = vmatprep.subr.bf16.mxu0 %v4389_v12  ;;  %v4448_v12 = vld [vmem:[%s5586_s1 + $0x848] ss:$12 sps:$4 sm:$0xff]  }
  0xe9   : > { %3970 = vmatpush3.bf16.msra.mxu1 %v4386_v11  ;;  %v4446_v11 = vld [vmem:[%s5586_s1 + $0x7e4] ss:$12 sps:$4 sm:$0xff]  }
  0xea   : > { %3971 = vmatprep.subr.bf16.mxu1 %v4390_v13  ;;  %v5421_v13 = vrot.slane %v3811_v9, 2  ;;  %v4502_v9 = vld [vmem:[%s5586_s1 + $0x950] ss:$12 sps:$4 sm:$0xff]  }
  0xeb   : > { %v5290_v21 = vpop.f32.mrb[0].mxu1  ;;  %2399 = vmatpush1.bf16.msra.mxu0 %v4387_v14  ;;  %v4449_v14 = vld [vmem:[%s5586_s1 + $0x788] ss:$12 sps:$4 sm:$0xff]  }
  0xec   : > { %v5298_v23 = vpop.f32.mrb[1].mxu1  ;;  %2400 = vmatprep.subr.bf16.mxu0 %v4394_v19  ;;  %v4450_v19 = vld [vmem:[%s5586_s1 + $0x7f8] ss:$12 sps:$4 sm:$0xff]  }
  0xed   : > { %v771_v27 = vpop.f32.mrb[2].mxu1  ;;  %3972 = vmatpush3.bf16.msra.mxu1 %v4391_v15  ;;  %v4452_v15 = vld [vmem:[%s5586_s1 + $0x7fc] ss:$12 sps:$4 sm:$0xff]  }
  0xee   : > { %v772_v28 = vpop.f32.mrb[3].mxu1  ;;  %3973 = vmatprep.subr.bf16.mxu1 %v4395_v20  ;;  %v4454_v20 = vld [vmem:[%s5586_s1 + $0x7a0] ss:$12 sps:$4 sm:$0xff]  }
  0xef   : > { %2401 = vmatpush1.bf16.msra.mxu0 %v4392_v22  ;;  %v4457_v22 = vld [vmem:[%s5586_s1 + $0x814] ss:$12 sps:$4 sm:$0xff]  }
  0xf0   : > { %2402 = vmatprep.subr.bf16.mxu0 %v4399_v24  ;;  %v4458_v24 = vld [vmem:[%s5586_s1 + $0x878] ss:$12 sps:$4 sm:$0xff]  }
  0xf1   : > { %3974 = vmatpush3.bf16.msra.mxu1 %v4396_v17 }
  0xf2   : > { %3975 = vmatprep.subr.bf16.mxu1 %v4400_v29 }
  0xf3   : > { %2403 = vmatpush1.bf16.msra.mxu0 %v4397_v30 }
  0xf4   : > { %2404 = vmatprep.subr.bf16.mxu0 %v4406_v35 }
  0xf5   : > { %3976 = vmatpush3.bf16.msra.mxu1 %v4401_v34 }
  0xf6   : > { %4051 = vmatprep.subr.bf16.mxu1 %v4512_v6 }
  0xf7   : > { %2405 = vmatpush1.bf16.msra.mxu0 %v4404_v37 }
  0xf8   : > { %2495 = vmatmul.mubr.bf16.vlgmr.msra.gmra.mrb[40].mxu1 %v2038_v38  ;;  %2406 = vmatprep.subr.bf16.mxu0 %v4410_v41  ;;  %v4464_v41 = vld [vmem:[%s5586_s1 + $0x7d0] ss:$12 sps:$4 sm:$0xff]  }
  0xf9   : > { %4052 = vmatpush3.bf16.msra.mxu1 %v4407_v39  ;;  %4059 = vmatprep.mubr.msk.bf16.mxu1 %vm4513_vm1, %v4512_v6  ;;  %v4460_v39 = vld [vmem:[%s5586_s1 + $0x828] ss:$12 sps:$4 sm:$0xff]  }
  0xfa   : > { %4053 = vmatprep.subr.bf16.mxu1 %v4512_v6 }
  0xfb   : > { %2407 = vmatpush1.bf16.msra.mxu0 %v4408_v42  ;;  %v4467_v42 = vld [vmem:[%s5586_s1 + $0x844] ss:$12 sps:$4 sm:$0xff]  }
  0xfc   : > { %2408 = vmatprep.subr.bf16.mxu0 %v4414_v40  ;;  %v4465_v40 = vld [vmem:[%s5586_s1 + $0x840] ss:$12 sps:$4 sm:$0xff]  }
  0xfd   : > { %4054 = vmatpush3.bf16.msra.mxu1 %v4411_v36  ;;  %v4468_v36 = vld [vmem:[%s5586_s1 + $0x8a8] ss:$12 sps:$4 sm:$0xff]  }
  0xfe   : > { %4055 = vmatprep.subr.bf16.mxu1 %v4512_v6 }
  0xff   : > { %2409 = vmatpush1.bf16.msra.mxu0 %v4412_v43  ;;  %v4469_v43 = vld [vmem:[%s5586_s1 + $0x7e8] ss:$12 sps:$4 sm:$0xff]  }
 0x100   : > { %2410 = vmatprep.subr.bf16.mxu0 %v4418_v45  ;;  %v4473_v45 = vld [vmem:[%s5586_s1 + $0x8c0] ss:$12 sps:$4 sm:$0xff]  }
 0x101   : > { %4056 = vmatpush3.bf16.msra.mxu1 %v4415_v44  ;;  %v4472_v44 = vld [vmem:[%s5586_s1 + $0x85c] ss:$12 sps:$4 sm:$0xff]  }
 0x102   : > { %4057 = vmatprep.subr.bf16.mxu1 %v4512_v6 }
 0x103   : > { %2411 = vmatpush1.bf16.msra.mxu0 %v4416_v46  ;;  %v4470_v46 = vld [vmem:[%s5586_s1 + $0x858] ss:$12 sps:$4 sm:$0xff]  }
 0x104   : > { %2964 = vmatprep.subr.bf16.mxu0 %v4422_v48  ;;  %v4477_v48 = vld [vmem:[%s5586_s1 + $0x874] ss:$12 sps:$4 sm:$0xff]  }
 0x105   : > { %4058 = vmatpush3.bf16.msra.mxu1 %v4419_v47  ;;  %v4474_v47 = vld [vmem:[%s5586_s1 + $0x800] ss:$12 sps:$4 sm:$0xff]  }
 0x106   : > { %3005 = vmatprep.subr.bf16.mxu1 %v4425_v49  ;;  %2413 = vmatmul.mubr.bf16.vlgmr.msra.gmra.mrb[12].mxu0 %v2038_v38  ;;  %v4463_v38 = vld [vmem:[%s5586_s1 + $0x890] ss:$12 sps:$4 sm:$0xff]   ;;  %v4478_v49 = vld [vmem:[%s5586_s1 + $0x8d8] ss:$12 sps:$4 sm:$0xff]  }
 0x107   : > { %2965 = vmatpush1.bf16.msra.mxu0 %v4420_v51  ;;  %2996 = vmatprep.mubr.bf16.mxu0 %v2637_v60 }
 0x108   : > { %4060 = vmatmul.mubr.msk.bf16.vlgmr.msra.gmra.mrb[44].mxu1 %vm688_vm0, %v5215_v56  ;;  %2966 = vmatprep.subr.bf16.mxu0 %v4428_v53  ;;  %v4437_v56 = vld [vmem:[%s5586_s1 + $0x934] ss:$12 sps:$4 sm:$0xff]   ;;  %v4475_v53 = vld [vmem:[%s5586_s1 + $0x870] ss:$12 sps:$4 sm:$0xff]  }
 0x109   : > { %3006 = vmatpush1.bf16.msra.mxu1 %v4423_v52  ;;  %3037 = vmatprep.mubr.bf16.mxu1 %v4511_v2  ;;  %v4440_v2 = vld [vmem:[%s5586_s1 + $0x7cc] ss:$12 sps:$4 sm:$0xff]  }
 0x10a   : > { %3007 = vmatprep.subr.bf16.mxu1 %v4431_v55  ;;  %v4479_v55 = vld [vmem:[%s5586_s1 + $0x818] ss:$12 sps:$4 sm:$0xff]  }
 0x10b   : > { %v3896_v61 = vpop.f32.mrb[4].mxu1  ;;  %2967 = vmatpush1.bf16.msra.mxu0 %v4426_v57  ;;  %v4482_v57 = vld [vmem:[%s5586_s1 + $0x88c] ss:$12 sps:$4 sm:$0xff]  }
 0x10c   : > { %v3897_v62 = vpop.f32.mrb[5].mxu1  ;;  %2968 = vmatprep.subr.bf16.mxu0 %v4434_v59  ;;  %v4483_v59 = vld [vmem:[%s5586_s1 + $0x8f0] ss:$12 sps:$4 sm:$0xff]  }
 0x10d   : > { %v3898_v1 = vadd.f32 %v3897_v62, %v3896_v61  ;;  %v3899_v3 = vpop.f32.mrb[6].mxu1  ;;  %3008 = vmatpush1.bf16.msra.mxu1 %v4429_v58  ;;  %v4484_v61 = vld [vmem:[%s5586_s1 + $0x830] ss:$12 sps:$4 sm:$0xff]  }
 0x10e   : > { %v3900_v5 = vpop.f32.mrb[7].mxu1  ;;  %3009 = vmatprep.subr.bf16.mxu1 %v4437_v56  ;;  %v3809_v56 = vcombine.low %v5361_v50, %v5128_v18  ;;  %v4489_v62 = vld [vmem:[%s5586_s1 + $0x8a4] ss:$12 sps:$4 sm:$0xff]   ;;  %v4490_v18 = vld [vmem:[%s5586_s1 + $0x908] ss:$12 sps:$4 sm:$0xff]  }
 0x10f   : > { %2969 = vmatpush1.bf16.msra.mxu0 %v4432_v63  ;;  %v4493_v50 = vld [vmem:[%s5586_s1 + $0x8bc] ss:$12 sps:$4 sm:$0xff]   ;;  %v4494_v3 = vld [vmem:[%s5586_s1 + $0x920] ss:$12 sps:$4 sm:$0xff]   ;;  %v4498_v5 = vld [vmem:[%s5586_s1 + $0x938] ss:$12 sps:$4 sm:$0xff]  }
 0x110   : > { %2970 = vmatprep.subr.bf16.mxu0 %v4440_v2  ;;  %v2636_v63 = vrot.slane %v3809_v56, 2  ;;  %v4497_v2 = vld [vmem:[%s5586_s1 + $0x8d4] ss:$12 sps:$4 sm:$0xff]  }
 0x111   : > { %3010 = vmatpush1.bf16.msra.mxu1 %v4435_v0  ;;  %v4487_v0 = vld [vmem:[%s5586_s1 + $0x8a0] ss:$12 sps:$4 sm:$0xff]  }
 0x112   : > { %3011 = vmatprep.subr.bf16.mxu1 %v4443_v7  ;;  %v4501_v7 = vld [vmem:[%s5586_s1 + $0x8ec] ss:$12 sps:$4 sm:$0xff]  }
 0x113   : > { %2971 = vmatpush1.bf16.msra.mxu0 %v4438_v8  ;;  %v4499_v8 = vld [vmem:[%s5586_s1 + $0x8e8] ss:$12 sps:$4 sm:$0xff]  }
 0x114   : > { %2972 = vmatprep.subr.bf16.mxu0 %v4446_v11 }
 0x115   : > { %3012 = vmatpush1.bf16.msra.mxu1 %v4441_v10 }
 0x116   : > { %3988 = vmatprep.subr.bf16.mxu1 %v4448_v12 }
 0x117   : > { %2973 = vmatpush1.bf16.msra.mxu0 %v4444_v33 }
 0x118   : > { %3872 = vmatmul.mubr.msk.bf16.vlgmr.msra.gmra.mrb[48].mxu1 %vm688_vm0, %v5421_v13  ;;  %2974 = vmatprep.subr.bf16.mxu0 %v4452_v15 }
 0x119   : > { %3989 = vmatpush3.bf16.msra.mxu1 %v4449_v14  ;;  %v726_v17 = vpop.f32.mrb[0].mxu0  ;;  %3078 = vmatprep.mubr.bf16.mxu1 %v2637_v60  ;;  %v4480_v60 = vld [vmem:[%s5586_s1 + $0x888] ss:$12 sps:$4 sm:$0xff]  }
 0x11a   : > { %3990 = vmatprep.subr.bf16.mxu1 %v4453_v16  ;;  %v5447_v25 = vadd.f32 %v5290_v21, %v726_v17  ;;  %v728_v27 = vpop.f32.mrb[1].mxu0  ;;  %v4459_v21 = vld [vmem:[%s5586_s1 + $0x7b8] ss:$12 sps:$4 sm:$0xff]  }
 0x11b   : > { %v848_v26 = vpop.f32.mrb[8].mxu1  ;;  %v5452_v29 = vadd.f32 %v5298_v23, %v728_v27  ;;  %v730_v31 = vpop.f32.mrb[2].mxu0  ;;  %2975 = vmatpush1.bf16.msra.mxu0 %v4450_v19  ;;  %v4462_v23 = vld [vmem:[%s5586_s1 + $0x82c] ss:$12 sps:$4 sm:$0xff]  }
 0x11c   : > { %v5449_v28 = vadd.f32 %v3898_v1, %v848_v26  ;;  %v4025_v30 = vpop.f32.mrb[9].mxu1  ;;  %v731_v35 = vpop.f32.mrb[3].mxu0  ;;  %2976 = vmatprep.subr.bf16.mxu0 %v4457_v22  ;;  %v4491_v1 = vld [vmem:[%s5586_s1 + $0x8b8] ss:$12 sps:$4 sm:$0xff]  }
 0x11d   : > { %v851_v34 = vpop.f32.mrb[10].mxu1  ;;  %3991 = vmatpush3.bf16.msra.mxu1 %v4454_v20 }
 0x11e   : > { %v4026_v37 = vpop.f32.mrb[11].mxu1  ;;  %3992 = vmatprep.subr.bf16.mxu1 %v4458_v24 }
 0x11f   : > { %2977 = vmatpush1.bf16.msra.mxu0 %v4455_v32 }
 0x120   : > { %2978 = vmatprep.subr.bf16.mxu0 %v4462_v23 }
 0x121   : > { %3993 = vmatpush3.bf16.msra.mxu1 %v4459_v21 }
 0x122   : > { %3994 = vmatprep.subr.bf16.mxu1 %v4463_v38 }
 0x123   : > { %2979 = vmatpush1.bf16.msra.mxu0 %v4460_v39 }
 0x124   : > { %2980 = vmatprep.subr.bf16.mxu0 %v4467_v42 }
 0x125   : > { %3995 = vmatpush3.bf16.msra.mxu1 %v4464_v41 }
 0x126   : > { %3996 = vmatprep.subr.bf16.mxu1 %v4468_v36 }
 0x127   : > { %2981 = vmatpush1.bf16.msra.mxu0 %v4465_v40 }
 0x128   : > { %2982 = vmatprep.subr.bf16.mxu0 %v4472_v44 }
 0x129   : > { %3997 = vmatpush3.bf16.msra.mxu1 %v4469_v43 }
 0x12a   : > { %3998 = vmatprep.subr.bf16.mxu1 %v4473_v45 }
 0x12b   : > { %v5502_v51 = vpop.f32.mrb[12].mxu1  ;;  %2983 = vmatpush1.bf16.msra.mxu0 %v4470_v46 }
 0x12c   : > { %v5504_v52 = vpop.f32.mrb[13].mxu1  ;;  %2984 = vmatprep.subr.bf16.mxu0 %v4477_v48 }
 0x12d   : > { %v1266_v54 = vpop.f32.mrb[14].mxu1  ;;  %3999 = vmatpush3.bf16.msra.mxu1 %v4474_v47 }
 0x12e   : > { %v1267_v58 = vpop.f32.mrb[15].mxu1  ;;  %4000 = vmatprep.subr.bf16.mxu1 %v4478_v49 }
 0x12f   : > { %2985 = vmatpush1.bf16.msra.mxu0 %v4475_v53 }
 0x130   : > { %2986 = vmatprep.subr.bf16.mxu0 %v4482_v57 }
 0x131   : > { %4001 = vmatpush3.bf16.msra.mxu1 %v4479_v55 }
 0x132   : > { %4002 = vmatprep.subr.bf16.mxu1 %v4483_v59 }
 0x133   : > { %2987 = vmatpush1.bf16.msra.mxu0 %v4480_v60 }
 0x134   : > { %2988 = vmatprep.subr.bf16.mxu0 %v4489_v62 }
 0x135   : > { %4003 = vmatpush3.bf16.msra.mxu1 %v4484_v61 }
 0x136   : > { %4063 = vmatprep.subr.bf16.mxu1 %v4512_v6 }
 0x137   : > { %2989 = vmatpush1.bf16.msra.mxu0 %v4487_v0 }
 0x138   : > { %3079 = vmatmul.mubr.bf16.vlgmr.msra.gmra.mrb[52].mxu1 %v2636_v63  ;;  %2990 = vmatprep.subr.bf16.mxu0 %v4493_v50 }
 0x139   : > { %4064 = vmatpush3.bf16.msra.mxu1 %v4490_v18  ;;  %4071 = vmatprep.mubr.msk.bf16.mxu1 %vm4513_vm1, %v4512_v6 }
 0x13a   : > { %4065 = vmatprep.subr.bf16.mxu1 %v4512_v6 }
 0x13b   : > { %2991 = vmatpush1.bf16.msra.mxu0 %v4491_v1 }
 0x13c   : > { %2992 = vmatprep.subr.bf16.mxu0 %v4497_v2 }
 0x13d   : > { %4066 = vmatpush3.bf16.msra.mxu1 %v4494_v3 }
 0x13e   : > { %4067 = vmatprep.subr.bf16.mxu1 %v4512_v6 }
 0x13f   : > { %2993 = vmatpush1.bf16.msra.mxu0 %v4495_v4 }
 0x140   : > { %2994 = vmatprep.subr.bf16.mxu0 %v4501_v7 }
 0x141   : > { %4068 = vmatpush3.bf16.msra.mxu1 %v4498_v5 }
 0x142   : > { %4069 = vmatprep.subr.bf16.mxu1 %v4512_v6 }
 0x143   : > { %2995 = vmatpush1.bf16.msra.mxu0 %v4499_v8 }
 0x145   : > { %4070 = vmatpush3.bf16.msra.mxu1 %v4502_v9 }
 0x146   : > { %2997 = vmatmul.mubr.bf16.vlgmr.msra.gmra.mrb[16].mxu0 %v2636_v63 }
 0x148   : > { %4072 = vmatmul.mubr.msk.bf16.vlgmr.msra.gmra.mrb[56].mxu1 %vm688_vm0, %v5421_v13 }
 0x14b   : > { %v3923_v10 = vpop.f32.mrb[16].mxu1 }
 0x14c   : > { %v3924_v11 = vpop.f32.mrb[17].mxu1 }
 0x14d   : > { %v3925_v12 = vadd.f32 %v3924_v11, %v3923_v10  ;;  %v3926_v33 = vpop.f32.mrb[18].mxu1 }
 0x14e   : > { %v3927_v14 = vpop.f32.mrb[19].mxu1 }
 0x14f   : > { %v1304_v15 = vadd.f32 %v3925_v12, %v5449_v28 }
 0x159   : > { %v1221_v16 = vpop.f32.mrb[4].mxu0 }
 0x15a   : > { %v1222_v19 = vadd.f32 %v1221_v16, %v5447_v25  ;;  %v1223_v22 = vpop.f32.mrb[5].mxu0 }
 0x15b   : > { %v1343_v20 = vpop.f32.mrb[20].mxu1  ;;  %v1224_v6 = vadd.f32 %v1223_v22, %v5452_v29  ;;  %v1225_v26 = vpop.f32.mrb[6].mxu0 }
 0x15c   : > { %v1344_v17 = vadd.f32 %v1343_v20, %v1304_v15  ;;  %v4037_v24 = vpop.f32.mrb[21].mxu1  ;;  %v1263_v27 = vadd.f32 %v5502_v51, %v1222_v19  ;;  %v1226_v30 = vpop.f32.mrb[7].mxu0  ;;  %v3129_v26 = vld [vmem:[%s5587_s2] sm:$0x7] }
 0x15d   : > { %v1346_v13 = vpop.f32.mrb[22].mxu1  ;;  %v1265_v31 = vadd.f32 %v5504_v52, %v1224_v6 }
 0x15e   : > { %v4038_v32 = vpop.f32.mrb[23].mxu1 }
 0x16b   : > { %v1843_v34 = vpop.f32.mrb[24].mxu1 }
 0x16c   : > { %v1845_v35 = vpop.f32.mrb[25].mxu1 }
 0x16d   : > { %v1847_v28 = vpop.f32.mrb[26].mxu1 }
 0x16e   : > { %v1848_v21 = vpop.f32.mrb[27].mxu1 }
 0x18b   : > { %v3950_v23 = vpop.f32.mrb[28].mxu1 }
 0x18c   : > { %v3951_v25 = vpop.f32.mrb[29].mxu1 }
 0x18d   : > { %v3952_v37 = vadd.f32 %v3951_v25, %v3950_v23  ;;  %v3953_v38 = vpop.f32.mrb[30].mxu1 }
 0x18e   : > { %v3954_v39 = vpop.f32.mrb[31].mxu1 }
 0x199   : > { %v1802_v41 = vpop.f32.mrb[8].mxu0 }
 0x19a   : > { %v1844_v29 = vadd.f32 %v1843_v34, %v1802_v41  ;;  %v1804_v36 = vpop.f32.mrb[9].mxu0 }
 0x19b   : > { %v1924_v42 = vpop.f32.mrb[32].mxu1  ;;  %v1846_v43 = vadd.f32 %v1845_v35, %v1804_v36  ;;  %v1806_v45 = vpop.f32.mrb[10].mxu0 }
 0x19c   : > { %v1925_v40 = vadd.f32 %v3952_v37, %v1924_v42  ;;  %v4049_v44 = vpop.f32.mrb[33].mxu1  ;;  %v1930_v46 = vadd.f32 %v1844_v29, %v1263_v27  ;;  %v1807_v48 = vpop.f32.mrb[11].mxu0 }
 0x19d   : > { %v1927_v47 = vpop.f32.mrb[34].mxu1  ;;  %v1931_v51 = vadd.f32 %v1846_v43, %v1265_v31 }
 0x19e   : > { %v1932_v49 = vadd.f32 %v1925_v40, %v1344_v17  ;;  %v4050_v52 = vpop.f32.mrb[35].mxu1  ;;  %v3131_v17 = vlaneseq }
 0x1a0   : > { %v3132_v6 = vshrl.u32 %v3131_v17, 7 }
 0x1a2   : > { %v3133_v24 = vsub.s32 0, %v3132_v6  ;;  %v3141_v27 = vsub.s32 2, %v3132_v6  ;;  %v3137_v13 = vsub.s32 1, %v3132_v6 }
 0x1a4   : > { %v3134_v32 = vrot.slane %v3129_v26, %v3133_v24  ;;  %v3142_v21 = vrot.slane %v3129_v26, %v3141_v27  ;;  %v3138_v25 = vrot.slane %v3129_v26, %v3137_v13 }
 0x1ab   : > { %v2455_v53 = vpop.f32.mrb[36].mxu1 }
 0x1ac   : > { %v2457_v54 = vpop.f32.mrb[37].mxu1 }
 0x1ad   : > { %v2459_v55 = vpop.f32.mrb[38].mxu1 }
 0x1ae   : > { %v2460_v57 = vpop.f32.mrb[39].mxu1 }
 0x1cb   : > { %v3977_v58 = vpop.f32.mrb[40].mxu1 }
 0x1cc   : > { %v3978_v59 = vpop.f32.mrb[41].mxu1 }
 0x1cd   : > { %v3979_v60 = vadd.f32 %v3978_v59, %v3977_v58  ;;  %v3980_v56 = vpop.f32.mrb[42].mxu1 }
 0x1ce   : > { %v3981_v61 = vpop.f32.mrb[43].mxu1 }
 0x1d9   : > { %v2414_v62 = vpop.f32.mrb[12].mxu0 }
 0x1da   : > { %v2456_v63 = vadd.f32 %v2455_v53, %v2414_v62  ;;  %v2416_v18 = vpop.f32.mrb[13].mxu0 }
 0x1db   : > { %v2536_v0 = vpop.f32.mrb[44].mxu1  ;;  %v2458_v1 = vadd.f32 %v2457_v54, %v2416_v18  ;;  %v2418_v2 = vpop.f32.mrb[14].mxu0 }
 0x1dc   : > { %v2537_v50 = vadd.f32 %v3979_v60, %v2536_v0  ;;  %v4061_v3 = vpop.f32.mrb[45].mxu1  ;;  %v2542_v4 = vadd.f32 %v2456_v63, %v1930_v46  ;;  %v2419_v7 = vpop.f32.mrb[15].mxu0 }
 0x1dd   : > { %v2539_v5 = vpop.f32.mrb[46].mxu1  ;;  %v2543_v9 = vadd.f32 %v2458_v1, %v1931_v51 }
 0x1de   : > { %v2544_v8 = vadd.f32 %v2537_v50, %v1932_v49  ;;  %v4062_v10 = vpop.f32.mrb[47].mxu1 }
 0x1eb   : > { %v3039_v11 = vpop.f32.mrb[48].mxu1 }
 0x1ec   : > { %v3041_v12 = vpop.f32.mrb[49].mxu1 }
 0x1ed   : > { %v3043_v33 = vpop.f32.mrb[50].mxu1 }
 0x1ee   : > { %v3044_v14 = vpop.f32.mrb[51].mxu1 }
 0x20b   : > { %v4004_v15 = vpop.f32.mrb[52].mxu1 }
 0x20c   : > { %v4005_v16 = vpop.f32.mrb[53].mxu1 }
 0x20d   : > { %v4006_v19 = vadd.f32 %v4005_v16, %v4004_v15  ;;  %v4007_v20 = vpop.f32.mrb[54].mxu1 }
 0x20e   : > { %v4008_v22 = vpop.f32.mrb[55].mxu1 }
 0x219   : > { %v2998_v30 = vpop.f32.mrb[16].mxu0 }
 0x21a   : > { %v3040_v31 = vadd.f32 %v3039_v11, %v2998_v30  ;;  %v3000_v35 = vpop.f32.mrb[17].mxu0 }
 0x21b   : > { %v3120_v34 = vpop.f32.mrb[56].mxu1  ;;  %v3042_v23 = vadd.f32 %v3041_v12, %v3000_v35  ;;  %v3002_v38 = vpop.f32.mrb[18].mxu0 }
 0x21c   : > { %v3121_v28 = vadd.f32 %v4006_v19, %v3120_v34  ;;  %v4073_v37 = vpop.f32.mrb[57].mxu1  ;;  %v3126_v39 = vadd.f32 %v3040_v31, %v2542_v4  ;;  %v3003_v29 = vpop.f32.mrb[19].mxu0 }
 0x21d   : > { %v3123_v41 = vpop.f32.mrb[58].mxu1  ;;  %v3127_v36 = vadd.f32 %v3042_v23, %v2543_v9 }
 0x21e   : > { %v3128_v42 = vadd.f32 %v3121_v28, %v2544_v8  ;;  %v4074_v40 = vpop.f32.mrb[59].mxu1  ;;  %v3146_v43 = vadd.f32 %v3134_v32, %v3126_v39 }
 0x21f   : > { %v3147_v45 = vadd.f32 %v3138_v25, %v3127_v36 }
 0x220   : > { %v3148_v44 = vadd.f32 %v3142_v21, %v3128_v42  ;;  %v3149_v46 = vmax.f32 %v3146_v43, 0.0 }
 0x221   : > { %v3150_v48 = vmax.f32 %v3147_v45, 0.0 }
 0x222   : > { %v3151_v47 = vmax.f32 %v3148_v44, 0.0 }
 0x223   : > { %v3878_v51 = vpack.c.bf16 %v3150_v48, %v3149_v46 }
 0x224   : > { %v3879_v49 = vpack.c.bf16 %v3151_v47, %v3151_v47 }
 0x225   : > { %3165 = vst [vmem:[%s170_s17] sm:$0x77] %v3878_v51 }
 0x226   : > { %3166 = vst [vmem:[%s170_s17 + $0x8] sm:$0x7] %v3879_v49 }
 0x227 PF: > { %s13_s12 = sadd.s32 1, %s4509_s12  }
 0x228   : > { %p10_p4 = scmp.ge.s32.totalorder %s13_s12, 4  }
 0x22a   :  { %12 = sbr.rel (!%p10_p4) target bundleno = 1 (0x1), region = 66 }

// kernel: cnn_forward.5
= control target key start
LH: loop header
LB: loop body
LE: loop exit
PB: predicated region body
PF: predicated region fallthrough
CT: control target
= control target key end

     0   :  { %8 = vsyncpa [#allocation3], 0  ;;  %s8498_s0 = inlined_call_operand.vmem [shape: bf16[2,24,384], index: 0, kind: input, shape index: {}]   ;;  %s8499_s1 = inlined_call_operand.hbm [shape: bf16[5,384,640], index: 1, kind: input, shape index: {}]   ;;  %s8500_s2 = inlined_call_operand.hbm [shape: f32[1,640], index: 2, kind: input, shape index: {}]   ;;  %s8501_s3 = inlined_call_operand.vmem [shape: bf16[2,20,640], index: 3, kind: output, shape index: {}]  }
   0x1   :  { %9 = vsyncpa [#allocation5], 0  ;;  %s8005_s12 = smov 0  }
   0x2 LB: > { %s8011_s13 = sadd.s32 4294967295, %s7978_s12   ;;  %p6002_p0 = scmp.ge.s32.totalorder %s7978_s12, 1  ;;  %s7978_s12 = sphi %s8005_s12, %s15_s12  }
   0x3   : > { %p114_p1 = scmp.lt.s32.totalorder %s7978_s12, 3  ;;  %s7980_s14 = smov [#allocation2]  }
   0x4   : > { %s126_s15 = sshll.u32 %s7980_s14, 4  ;;  %p8502_p3 = scmp.eq.s32.totalorder %s8011_s13, 0  ;;  %s127_s15 = int_to_ptr.vmem [resolvable:$true] %s126_s15 }
   0x5   : > { %p8015_p2 = pnand %p6002_p0, %p114_p1  ;;  %s7981_s17 = smov [#allocation4]  }
   0x6   : > { %s140_s18 = sshll.u32 %s7981_s17, 4  ;;  %s7908_s22 = scalar_lea.hbm %s8499_s1, 76800  ;;  %s8028_s18 = int_to_ptr.vmem [resolvable:$true] %s140_s18 }
   0x7   : > { %s8504_s16 = scalar_select %p8015_p2, 1, 0 }
   0x8   : > { %p7021_p4 = pneg %p8015_p2  ;;  %p7909_p6 = scmp.ne.s32.totalorder %s8499_s1, %s7908_s22 }
   0x9   : > { %p7915_p10 = scmp.lt.u32.totalorder %s7908_s22, %s8499_s1 }
   0xa   : > { %p8024_p5 = pnand %p8502_p3, %p7021_p4 }
   0xc   : > { %p7910_p7 = pneg %p8024_p5 }
   0xe   : > { %p7911_p8 = pnand %p7910_p7, %p7909_p6 }
  0x10   : > { %p7912_p9 = pneg %p7911_p8 }
  0x12   : > { %p7917_p11 = pnand %p7915_p10, %p7912_p9 }
  0x14   : > { %7920 = shalt.err (!%p7917_p11)
}
  0x15   : > { %s7921_s27 = scalar_lea.vmem %s127_s15, 76800  ;;  %p7929_p1 = scmp.lt.s32.totalorder %s127_s15, %s127_s15 }
  0x16   : > { %p7922_p12 = scmp.ne.s32.totalorder %s127_s15, %s7921_s27  ;;  %p7930_p4 = scmp.lt.s32.totalorder %s7921_s27, %s7921_s27 }
  0x18   : > { %p7924_p13 = pnand %p7922_p12, %p7910_p7  ;;  %p7931_p3 = por %p7930_p4, %p7929_p1 }
  0x1a   : > { %p7925_p0 = pneg %p7924_p13 }
  0x1c   : > { %p7932_p2 = pnand %p7931_p3, %p7925_p0 }
  0x1e   : > { %7935 = shalt.err (!%p7932_p2)
}
  0x1f   : > { %s7982_s28 = smov 320   ;;  %s7983_s29 = smov 20  }
  0x20   : > { %7024 = dma.hbm_to_vmem [thread:$0]  (!%p8024_p5), %s8499_s1, 76800, %s127_s15, [#allocation3], %s7982_s28, %s7982_s28, %s7983_s29  }
  0x21   : > { %s7936_s7 = scalar_lea.hbm %s8500_s2, 80 }
  0x22   : > { %p7937_p6 = scmp.ne.s32.totalorder %s8500_s2, %s7936_s7  ;;  %p7943_p8 = scmp.lt.u32.totalorder %s7936_s7, %s8500_s2 }
  0x24   : > { %p7939_p2 = pnand %p7937_p6, %p7910_p7 }
  0x26   : > { %p7940_p3 = pneg %p7939_p2 }
  0x28   : > { %p7945_p9 = pnand %p7943_p8, %p7940_p3 }
  0x2a   : > { %7948 = shalt.err (!%p7945_p9)
}
  0x2b   : > { %s7949_s14 = scalar_lea.vmem %s8028_s18, 80  ;;  %s7956_s15 = scalar_lea.vmem %s8028_s18, 96 }
  0x2c   : > { %p7950_p10 = scmp.ne.s32.totalorder %s8028_s18, %s7949_s14  ;;  %p7957_p13 = scmp.lt.s32.totalorder %s8028_s18, %s8028_s18 }
  0x2d   : > { %p7958_p0 = scmp.lt.s32.totalorder %s7956_s15, %s7949_s14 }
  0x2e   : > { %p7952_p11 = pnand %p7950_p10, %p7910_p7 }
  0x2f   : > { %p7959_p1 = por %p7958_p0, %p7957_p13 }
  0x30   : > { %p7953_p12 = pneg %p7952_p11 }
  0x32   : > { %p7960_p4 = pnand %p7959_p1, %p7953_p12 }
  0x34   : > { %7963 = shalt.err (!%p7960_p4)
}
  0x35   : > { %7027 = dma.hbm_to_vmem [thread:$0]  (!%p8024_p5), %s8500_s2, 80, %s8028_s18, [#allocation5]  }
  0x36   : > { %p8506_p6 = scmp.ne.s32.totalorder %s8504_s16, 0 }
  0x37   : > { %p8507_p7 = scmp.eq.s32.totalorder (!%p8506_p6), %s8011_s13, 0 }
  0x38   : > { %161 = sbr.rel (%p8506_p6) target bundleno = 943 (0x3af), region = 32 }
  0x3f   : > { %7969 = dma.done.wait (%p8507_p7), [#allocation3], 76800   ;;  %p8508_p2 = pmov %p8507_p7 }
  0x41   : > { %7971 = vsyncadd (%p8508_p2), [#allocation3], 4294890496  ;;  %p8509_p3 = pmov %p8508_p2 }
  0x42   : > { %p8510_p8 = pmov %p8508_p2 }
  0x43   : > { %7973 = dma.done.wait (%p8509_p3), [#allocation5], 80  }
  0x44   : > { %7975 = vsyncadd (%p8510_p8), [#allocation5], 4294967216  ;;  %v7045_v0 = vld [vmem:[#allocation2 + $0x3c4] ss:$20 sps:$4 sm:$0xff]   ;;  %v7047_v1 = vld [vmem:[#allocation2 + $0x3cc] ss:$20 sps:$4 sm:$0xff]  }
  0x45   : > { %1194 = vmatprep.subr.bf16.mxu0 %v7045_v0  ;;  %v7049_v2 = vld [vmem:[#allocation2 + $0x3c0] ss:$20 sps:$4 sm:$0xff]   ;;  %v7050_v3 = vld [vmem:[#allocation2 + $0x3c8] ss:$20 sps:$4 sm:$0xff]   ;;  %1296 = vmatprep.subr.bf16.mxu1 %v7047_v1  ;;  %v7056_v7 = vld [vmem:[#allocation2 + $0x3f0] ss:$20 sps:$4 sm:$0xff]  }
  0x46   : > { %v7051_v4 = vld [vmem:[#allocation2 + $0x3ec] ss:$20 sps:$4 sm:$0xff]   ;;  %1195 = vmatpush1.bf16.msra.mxu0 %v7049_v2  ;;  %1297 = vmatpush1.bf16.msra.mxu1 %v7050_v3  ;;  %v7053_v5 = vld [vmem:[#allocation2 + $0x3f4] ss:$20 sps:$4 sm:$0xff]   ;;  %v7059_v9 = vld [vmem:[#allocation2 + $0x41c] ss:$20 sps:$4 sm:$0xff]  }
  0x47   : > { %v7055_v6 = vld [vmem:[#allocation2 + $0x3e8] ss:$20 sps:$4 sm:$0xff]   ;;  %1196 = vmatprep.subr.bf16.mxu0 %v7051_v4  ;;  %1298 = vmatprep.subr.bf16.mxu1 %v7053_v5  ;;  %v7061_v10 = vld [vmem:[#allocation2 + $0x410] ss:$20 sps:$4 sm:$0xff]   ;;  %v7062_v11 = vld [vmem:[#allocation2 + $0x418] ss:$20 sps:$4 sm:$0xff]  }
  0x48   : > { %v7057_v8 = vld [vmem:[#allocation2 + $0x414] ss:$20 sps:$4 sm:$0xff]   ;;  %v7063_v12 = vld [vmem:[#allocation2 + $0x43c] ss:$20 sps:$4 sm:$0xff]   ;;  %v7065_v13 = vld [vmem:[#allocation2 + $0x444] ss:$20 sps:$4 sm:$0xff]  }
  0x49   : > { %v7067_v14 = vld [vmem:[#allocation2 + $0x438] ss:$20 sps:$4 sm:$0xff]   ;;  %v7068_v15 = vld [vmem:[#allocation2 + $0x440] ss:$20 sps:$4 sm:$0xff]   ;;  %v7074_v19 = vld [vmem:[#allocation2 + $0x468] ss:$20 sps:$4 sm:$0xff]  }
  0x4a   : > { %1197 = vmatpush1.bf16.msra.mxu0 %v7055_v6  ;;  %1299 = vmatpush1.bf16.msra.mxu1 %v7056_v7  ;;  %v7069_v16 = vld [vmem:[#allocation2 + $0x464] ss:$20 sps:$4 sm:$0xff]   ;;  %v7071_v17 = vld [vmem:[#allocation2 + $0x46c] ss:$20 sps:$4 sm:$0xff]   ;;  %v7077_v21 = vld [vmem:[#allocation2 + $0x494] ss:$20 sps:$4 sm:$0xff]  }
  0x4b   : > { %1198 = vmatprep.subr.bf16.mxu0 %v7057_v8  ;;  %1300 = vmatprep.subr.bf16.mxu1 %v7059_v9  ;;  %v7073_v18 = vld [vmem:[#allocation2 + $0x460] ss:$20 sps:$4 sm:$0xff]   ;;  %v7079_v22 = vld [vmem:[#allocation2 + $0x488] ss:$20 sps:$4 sm:$0xff]   ;;  %v7080_v23 = vld [vmem:[#allocation2 + $0x490] ss:$20 sps:$4 sm:$0xff]  }
  0x4c   : > { %v7075_v20 = vld [vmem:[#allocation2 + $0x48c] ss:$20 sps:$4 sm:$0xff]   ;;  %v7081_v24 = vld [vmem:[#allocation2 + $0x4b4] ss:$20 sps:$4 sm:$0xff]   ;;  %v7083_v25 = vld [vmem:[#allocation2 + $0x4bc] ss:$20 sps:$4 sm:$0xff]  }
  0x4d   : > { %v7085_v26 = vld [vmem:[#allocation2 + $0x4b0] ss:$20 sps:$4 sm:$0xff]   ;;  %v7086_v27 = vld [vmem:[#allocation2 + $0x4b8] ss:$20 sps:$4 sm:$0xff]   ;;  %p189_p5 = scmp.lt.s32.totalorder %s8011_s13, 1  ;;  %vm2587_vm1 = vcmask 1046528  }
  0x4e   : > { %1199 = vmatpush1.bf16.msra.mxu0 %v7061_v10  ;;  %1301 = vmatpush1.bf16.msra.mxu1 %v7062_v11  ;;  %v7087_v28 = vld [vmem:[#allocation2 + $0x4dc] ss:$20 sps:$4 sm:$0xff]   ;;  %v7089_v29 = vld [vmem:[#allocation2 + $0x4e4] ss:$20 sps:$4 sm:$0xff]   ;;  %v7092_v31 = vld [vmem:[#allocation2 + $0x4e0] ss:$20 sps:$4 sm:$0xff]  }
  0x4f   : > { %1200 = vmatprep.subr.bf16.mxu0 %v7063_v12  ;;  %1302 = vmatprep.subr.bf16.mxu1 %v7065_v13  ;;  %v7091_v30 = vld [vmem:[#allocation2 + $0x4d8] ss:$20 sps:$4 sm:$0xff]   ;;  %v7097_v34 = vld [vmem:[#allocation2 + $0x500] ss:$20 sps:$4 sm:$0xff]   ;;  %v7098_v35 = vld [vmem:[#allocation2 + $0x508] ss:$20 sps:$4 sm:$0xff]  }
  0x50   : > { %v7093_v32 = vld [vmem:[#allocation2 + $0x504] ss:$20 sps:$4 sm:$0xff]   ;;  %v7095_v33 = vld [vmem:[#allocation2 + $0x50c] ss:$20 sps:$4 sm:$0xff]   ;;  %s8512_s13 = smov (!%p189_p5, %s8011_s13), 1  ;;  %vm4849_vm3 = vcmask 1045504  }
  0x51   : > { %v7099_v36 = vld [vmem:[#allocation2 + $0x52c] ss:$20 sps:$4 sm:$0xff]   ;;  %v7101_v37 = vld [vmem:[#allocation2 + $0x534] ss:$20 sps:$4 sm:$0xff]   ;;  %s7011_s16 = smul.u32 36, %s8512_s13 }
  0x52   : > { %1201 = vmatpush1.bf16.msra.mxu0 %v7067_v14  ;;  %1303 = vmatpush1.bf16.msra.mxu1 %v7068_v15  ;;  %v7103_v38 = vld [vmem:[#allocation2 + $0x528] ss:$20 sps:$4 sm:$0xff]   ;;  %v7104_v39 = vld [vmem:[#allocation2 + $0x530] ss:$20 sps:$4 sm:$0xff]   ;;  %v7110_v43 = vld [vmem:[#allocation2 + $0x558] ss:$20 sps:$4 sm:$0xff]  }
  0x53   : > { %1202 = vmatprep.subr.bf16.mxu0 %v7069_v16  ;;  %1304 = vmatprep.subr.bf16.mxu1 %v7071_v17  ;;  %v7105_v40 = vld [vmem:[#allocation2 + $0x554] ss:$20 sps:$4 sm:$0xff]   ;;  %v7107_v41 = vld [vmem:[#allocation2 + $0x55c] ss:$20 sps:$4 sm:$0xff]   ;;  %s8096_s21 = scalar_lea.vmem %s8498_s0, %s7011_s16  ;;  %v7113_v45 = vld [vmem:[#allocation2 + $0x584] ss:$20 sps:$4 sm:$0xff]  }
  0x54   : > { %v7109_v42 = vld [vmem:[#allocation2 + $0x550] ss:$20 sps:$4 sm:$0xff]   ;;  %v7115_v46 = vld [vmem:[#allocation2 + $0x578] ss:$20 sps:$4 sm:$0xff]   ;;  %v7116_v50 = vld [vmem:[#allocation2 + $0x580] ss:$20 sps:$4 sm:$0xff]  }
  0x55   : > { %v7111_v44 = vld [vmem:[#allocation2 + $0x57c] ss:$20 sps:$4 sm:$0xff]   ;;  %v200_v47 = vld [vmem:[%s8096_s21] sm:$0xff]  ;;  %v7125_v0 = vld [vmem:[#allocation2 + $0x5d4] ss:$20 sps:$4 sm:$0xff]   ;;  %s7012_s22 = smul.u32 60, %s8512_s13 }
  0x56   : > { %1203 = vmatpush1.bf16.msra.mxu0 %v7073_v18  ;;  %1305 = vmatpush1.bf16.msra.mxu1 %v7074_v19  ;;  %v202_v48 = vld [vmem:[%s8096_s21 + $0xc] sm:$0xff]  ;;  %v350_v49 = vld [vmem:[%s8096_s21 + $0x18] sm:$0x77]  ;;  %v7121_v58 = vld [vmem:[#allocation2 + $0x5a0] ss:$20 sps:$4 sm:$0xff]  }
  0x57   : > { %1204 = vmatprep.subr.bf16.mxu0 %v7075_v20  ;;  %1306 = vmatprep.subr.bf16.mxu1 %v7077_v21  ;;  %v7117_v51 = vld [vmem:[#allocation2 + $0x5a4] ss:$20 sps:$4 sm:$0xff]   ;;  %v8101_v52 = vcombine.high %v200_v47, %v202_v48  ;;  %v8103_v53 = vcombine.high %v350_v49, %v350_v49  ;;  %v7119_v54 = vld [vmem:[#allocation2 + $0x5ac] ss:$20 sps:$4 sm:$0xff]   ;;  %v7122_v59 = vld [vmem:[#allocation2 + $0x5a8] ss:$20 sps:$4 sm:$0xff]   ;;  %v8108_v62 = vcombine.low %v200_v47, %v202_v48  ;;  %s8475_s13 = scalar_lea.vmem %s8501_s3, %s7012_s22 }
  0x58   : > { %v7123_v63 = vld [vmem:[#allocation2 + $0x5cc] ss:$20 sps:$4 sm:$0xff]   ;;  %vm518_vm0 = vsmask.f32 7424  ;;  %v7127_v2 = vld [vmem:[#allocation2 + $0x5c8] ss:$20 sps:$4 sm:$0xff]   ;;  %v8113_v5 = vcombine.low %v350_v49, %v350_v49 }
  0x59   : > { %v532_v55 = vshrl.u32 %v8101_v52, 16  ;;  %v534_v56 = vshll.u32 %v8101_v52, 16  ;;  %v539_v57 = vshll.u32 %v8103_v53, 16  ;;  %v7128_v3 = vld [vmem:[#allocation2 + $0x5d0] ss:$20 sps:$4 sm:$0xff]   ;;  %v522_v6 = vshll.u32 %v8108_v62, 16 }
  0x5a   : > { %1205 = vmatpush1.bf16.msra.mxu0 %v7079_v22  ;;  %1307 = vmatpush1.bf16.msra.mxu1 %v7080_v23  ;;  %v7129_v7 = vld [vmem:[#allocation2 + $0x5f4] ss:$20 sps:$4 sm:$0xff]   ;;  %v7131_v8 = vld [vmem:[#allocation2 + $0x5fc] ss:$20 sps:$4 sm:$0xff]   ;;  %v7134_v10 = vld [vmem:[#allocation2 + $0x5f8] ss:$20 sps:$4 sm:$0xff]  }
  0x5b   : > { %1206 = vmatprep.subr.bf16.mxu0 %v7081_v24  ;;  %1308 = vmatprep.subr.bf16.mxu1 %v7083_v25  ;;  %v536_v60 = vrot.slane %v534_v56, 1  ;;  %v541_v61 = vrot.slane %v539_v57, 1  ;;  %v7133_v9 = vld [vmem:[#allocation2 + $0x5f0] ss:$20 sps:$4 sm:$0xff]   ;;  %v520_v11 = vshrl.u32 %v8108_v62, 16  ;;  %v524_v12 = vrot.slane %v522_v6, 1 }
  0x5c   : > { %v527_v13 = vshll.u32 %v8113_v5, 16  ;;  %v7135_v14 = vld [vmem:[#allocation2 + $0x61c] ss:$20 sps:$4 sm:$0xff]   ;;  %v7137_v15 = vld [vmem:[#allocation2 + $0x624] ss:$20 sps:$4 sm:$0xff]   ;;  %v558_v22 = vshrl.u32 %v8103_v53, 16 }
  0x5d   : > { %v537_v1 = vor.u32 %v536_v60, %v532_v55  ;;  %v7139_v16 = vld [vmem:[#allocation2 + $0x618] ss:$20 sps:$4 sm:$0xff]   ;;  %v7140_v17 = vld [vmem:[#allocation2 + $0x620] ss:$20 sps:$4 sm:$0xff]   ;;  %v525_v18 = vor.u32 %v524_v12, %v520_v11  ;;  %v7146_v24 = vld [vmem:[#allocation2 + $0x648] ss:$20 sps:$4 sm:$0xff]  }
  0x5e   : > { %1207 = vmatpush1.bf16.msra.mxu0 %v7085_v26  ;;  %1309 = vmatpush1.bf16.msra.mxu1 %v7086_v27  ;;  %v529_v19 = vrot.slane %v527_v13, 1  ;;  %v7145_v20 = vld [vmem:[#allocation2 + $0x644] ss:$20 sps:$4 sm:$0xff]   ;;  %v7148_v21 = vld [vmem:[#allocation2 + $0x64c] ss:$20 sps:$4 sm:$0xff]  }
  0x5f   : > { %1208 = vmatprep.subr.bf16.mxu0 %v7087_v28  ;;  %1310 = vmatprep.subr.bf16.mxu1 %v7089_v29  ;;  %v8111_v4 = vsel %vm518_vm0, %v537_v1, %v541_v61  ;;  %v7143_v23 = vld [vmem:[#allocation2 + $0x640] ss:$20 sps:$4 sm:$0xff]   ;;  %v8124_v28 = vor.u32 %v558_v22, %v541_v61  ;;  %v7151_v29 = vld [vmem:[#allocation2 + $0x668] ss:$20 sps:$4 sm:$0xff]   ;;  %v7184_v60 = vld [vmem:[#allocation2 + $0x738] ss:$20 sps:$4 sm:$0xff]  }
  0x60   : > { %1226 = vmatprep.mubr.bf16.mxu0 %v8111_v4  ;;  %1328 = vmatprep.mubr.bf16.mxu1 %v8111_v4  ;;  %v8122_v25 = vsel %vm518_vm0, %v525_v18, %v529_v19  ;;  %v7153_v26 = vld [vmem:[#allocation2 + $0x66c] ss:$20 sps:$4 sm:$0xff]   ;;  %v7156_v27 = vld [vmem:[#allocation2 + $0x674] ss:$20 sps:$4 sm:$0xff]   ;;  %v7189_v61 = vld [vmem:[#allocation2 + $0x75c] ss:$20 sps:$4 sm:$0xff]  }
  0x61   : > { %v7172_v47 = vld [vmem:[#allocation2 + $0x6e8] ss:$20 sps:$4 sm:$0xff]   ;;  %v7177_v48 = vld [vmem:[#allocation2 + $0x70c] ss:$20 sps:$4 sm:$0xff]   ;;  %v7197_v12 = vld [vmem:[#allocation2 + $0x3d0] ss:$20 sps:$4 sm:$0xff]  }
  0x62   : > { %1209 = vmatpush1.bf16.msra.mxu0 %v7091_v30  ;;  %1311 = vmatpush1.bf16.msra.mxu1 %v7092_v31  ;;  %v555_v30 = vshrl.u32 %v8113_v5, 16  ;;  %v7154_v31 = vld [vmem:[#allocation2 + $0x670] ss:$20 sps:$4 sm:$0xff]   ;;  %v7194_v55 = vld [vmem:[%s8096_s21 + $0x20] ss:$0 sps:$4 sm:$0x77]  }
  0x63   : > { %1210 = vmatprep.subr.bf16.mxu0 %v7093_v32  ;;  %1312 = vmatprep.subr.bf16.mxu1 %v7095_v33  ;;  %v7159_v32 = vld [vmem:[#allocation2 + $0x694] ss:$20 sps:$4 sm:$0xff]   ;;  %v7162_v33 = vld [vmem:[#allocation2 + $0x69c] ss:$20 sps:$4 sm:$0xff]   ;;  %v551_v1 = vshll.u32 %v7194_v55, 16 }
  0x64   : > { %v7183_v56 = vld [vmem:[#allocation2 + $0x734] ss:$20 sps:$4 sm:$0xff]   ;;  %v7198_v13 = vld [vmem:[#allocation2 + $0x538] ss:$20 sps:$4 sm:$0xff]   ;;  %vm3697_vm2 = vsmask.f32 6400 }
  0x65   : > { %v7190_v6 = vld [vmem:[#allocation2 + $0x760] ss:$20 sps:$4 sm:$0xff]   ;;  %v7205_v22 = vld [vmem:[#allocation2 + $0x6c8] ss:$20 sps:$4 sm:$0xff]  }
  0x66   : > { %1211 = vmatpush1.bf16.msra.mxu0 %v7097_v34  ;;  %1313 = vmatpush1.bf16.msra.mxu1 %v7098_v35  ;;  %v7157_v34 = vld [vmem:[#allocation2 + $0x690] ss:$20 sps:$4 sm:$0xff]   ;;  %v7160_v35 = vld [vmem:[#allocation2 + $0x698] ss:$20 sps:$4 sm:$0xff]   ;;  %v7202_v18 = vld [vmem:[#allocation2 + $0x6a0] ss:$20 sps:$4 sm:$0xff]  }
  0x67   : > { %1212 = vmatprep.subr.bf16.mxu0 %v7099_v36  ;;  %1314 = vmatprep.subr.bf16.mxu1 %v7101_v37  ;;  %v8131_v36 = vor.u32 %v555_v30, %v529_v19  ;;  %v7165_v37 = vld [vmem:[#allocation2 + $0x6bc] ss:$20 sps:$4 sm:$0xff]   ;;  %v7211_v30 = vld [vmem:[#allocation2 + $0x718] ss:$20 sps:$4 sm:$0xff]  }
  0x6a   : > { %1213 = vmatpush1.bf16.msra.mxu0 %v7103_v38  ;;  %1315 = vmatpush1.bf16.msra.mxu1 %v7104_v39  ;;  %v7168_v38 = vld [vmem:[#allocation2 + $0x6c4] ss:$20 sps:$4 sm:$0xff]  }
  0x6b   : > { %1214 = vmatprep.subr.bf16.mxu0 %v7105_v40  ;;  %1316 = vmatprep.subr.bf16.mxu1 %v7107_v41  ;;  %v7163_v39 = vld [vmem:[#allocation2 + $0x6b8] ss:$20 sps:$4 sm:$0xff]   ;;  %v7166_v40 = vld [vmem:[#allocation2 + $0x6c0] ss:$20 sps:$4 sm:$0xff]  }
  0x6c   : > { %v7171_v41 = vld [vmem:[#allocation2 + $0x6e4] ss:$20 sps:$4 sm:$0xff]  }
  0x6e   : > { %1215 = vmatpush1.bf16.msra.mxu0 %v7109_v42  ;;  %1317 = vmatpush1.bf16.msra.mxu1 %v7110_v43  ;;  %v7174_v42 = vld [vmem:[#allocation2 + $0x6ec] ss:$20 sps:$4 sm:$0xff]   ;;  %v201_v43 = vld [vmem:[%s8096_s21 + $0x8] sm:$0xf] }
  0x6f   : > { %1216 = vmatprep.subr.bf16.mxu0 %v7111_v44  ;;  %1318 = vmatprep.subr.bf16.mxu1 %v7113_v45  ;;  %v203_v44 = vld [vmem:[%s8096_s21 + $0x14] sm:$0xf] }
  0x70   : > { %v7169_v45 = vld [vmem:[#allocation2 + $0x6e0] ss:$20 sps:$4 sm:$0xff]   ;;  %v8139_v49 = vcombine.low %v201_v43, %v203_v44  ;;  %v7225_v44 = vld [vmem:[#allocation2 + $0x28] ss:$20 sps:$4 sm:$0xff]  }
  0x71   : > { %v7230_v43 = vld [vmem:[#allocation2 + $0x34] ss:$20 sps:$4 sm:$0xff]  }
  0x72   : > { %1217 = vmatpush1.bf16.msra.mxu0 %v7115_v46  ;;  %1319 = vmatpush1.bf16.msra.mxu1 %v7116_v50  ;;  %v7984_v46 = vmov 0   ;;  %v7180_v50 = vld [vmem:[#allocation2 + $0x714] ss:$20 sps:$4 sm:$0xff]   ;;  %v546_v57 = vshll.u32 %v8139_v49, 16 }
  0x73   : > { %1218 = vmatprep.subr.bf16.mxu0 %v7117_v51  ;;  %1320 = vmatprep.subr.bf16.mxu1 %v7119_v54  ;;  %v7175_v51 = vld [vmem:[#allocation2 + $0x708] ss:$20 sps:$4 sm:$0xff]   ;;  %v7178_v54 = vld [vmem:[#allocation2 + $0x710] ss:$20 sps:$4 sm:$0xff]  }
  0x76   : > { %1219 = vmatpush1.bf16.msra.mxu0 %v7121_v58  ;;  %1321 = vmatpush1.bf16.msra.mxu1 %v7122_v59  ;;  %v7186_v58 = vld [vmem:[#allocation2 + $0x73c] ss:$20 sps:$4 sm:$0xff]  }
  0x77   : > { %1220 = vmatprep.subr.bf16.mxu0 %v7123_v63  ;;  %1322 = vmatprep.subr.bf16.mxu1 %v7125_v0  ;;  %v7181_v59 = vld [vmem:[#allocation2 + $0x730] ss:$20 sps:$4 sm:$0xff]   ;;  %v544_v63 = vshrl.u32 %v8139_v49, 16  ;;  %v548_v0 = vrot.slane %v546_v57, 1 }
  0x78   : > { %v7245_v57 = vld [vmem:[#allocation2 + $0xa4] ss:$20 sps:$4 sm:$0xff]  }
  0x7a   : > { %1221 = vmatpush1.bf16.msra.mxu0 %v7127_v2  ;;  %1323 = vmatpush1.bf16.msra.mxu1 %v7128_v3  ;;  %v7192_v2 = vld [vmem:[#allocation2 + $0x764] ss:$20 sps:$4 sm:$0xff]  }
  0x7b   : > { %1222 = vmatprep.subr.bf16.mxu0 %v7129_v7  ;;  %1324 = vmatprep.subr.bf16.mxu1 %v7131_v8  ;;  %v7187_v3 = vld [vmem:[#allocation2 + $0x758] ss:$20 sps:$4 sm:$0xff]   ;;  %v549_v7 = vor.u32 %v548_v0, %v544_v63  ;;  %v553_v8 = vrot.slane %v551_v1, 1  ;;  %v7252_v63 = vld [vmem:[#allocation2 + $0xd0] ss:$20 sps:$4 sm:$0xff]  }
  0x7c   : > { %v7257_v0 = vld [vmem:[#allocation2 + $0xf4] ss:$20 sps:$4 sm:$0xff]   ;;  %v7260_v1 = vld [vmem:[#allocation2 + $0xfc] ss:$20 sps:$4 sm:$0xff]  }
  0x7d   : > { %v554_v11 = vsel %vm518_vm0, %v549_v7, %v553_v8  ;;  %v7266_v7 = vld [vmem:[#allocation2 + $0x124] ss:$20 sps:$4 sm:$0xff]  }
  0x7e   : > { %1223 = vmatpush1.bf16.msra.mxu0 %v7133_v9  ;;  %1325 = vmatpush1.bf16.msra.mxu1 %v7134_v10  ;;  %v7195_v9 = vld [vmem:[#allocation2 + $0x510] ss:$20 sps:$4 sm:$0xff]  }
  0x7f   : > { %1224 = vmatprep.subr.bf16.mxu0 %v7135_v14  ;;  %1326 = vmatprep.subr.bf16.mxu1 %v7137_v15  ;;  %v7196_v10 = vld [vmem:[#allocation2 + $0x650] ss:$20 sps:$4 sm:$0xff]   ;;  %v7199_v14 = vld [vmem:[#allocation2 + $0x678] ss:$20 sps:$4 sm:$0xff]   ;;  %v561_v15 = vshrl.u32 %v7194_v55, 16 }
  0x80   : > { %v7237_v55 = vld [vmem:[#allocation2 + $0x78] ss:$20 sps:$4 sm:$0xff]  }
  0x81   : > { %v563_v19 = vor.u32 %v561_v15, %v553_v8  ;;  %v7261_v8 = vld [vmem:[#allocation2 + $0x118] ss:$20 sps:$4 sm:$0xff]   ;;  %v7278_v15 = vld [vmem:[#allocation2 + $0x174] ss:$20 sps:$4 sm:$0xff]  }
  0x82   : > { %1225 = vmatpush1.bf16.msra.mxu0 %v7139_v16  ;;  %1327 = vmatpush1.bf16.msra.mxu1 %v7140_v17  ;;  %v7200_v16 = vld [vmem:[#allocation2 + $0x3f8] ss:$20 sps:$4 sm:$0xff]   ;;  %v7201_v17 = vld [vmem:[#allocation2 + $0x560] ss:$20 sps:$4 sm:$0xff]  }
  0x83   : > { %1245 = vmatprep.subr.bf16.mxu0 %v7145_v20  ;;  %1347 = vmatprep.subr.bf16.mxu1 %v7148_v21  ;;  %v7203_v20 = vld [vmem:[#allocation2 + $0x420] ss:$20 sps:$4 sm:$0xff]   ;;  %v7204_v21 = vld [vmem:[#allocation2 + $0x588] ss:$20 sps:$4 sm:$0xff]  }
  0x85   : > { %1227 = vmatmul.mubr.bf16.vlgmr.msra.gmra.mrb[0].mxu0 %v8122_v25  ;;  %1329 = vmatmul.mubr.bf16.vlgmr.msra.gmra.mrb[0].mxu1 %v8122_v25 }
  0x86   : > { %1246 = vmatpush1.bf16.msra.mxu0 %v7143_v23  ;;  %1348 = vmatpush1.bf16.msra.mxu1 %v7146_v24  ;;  %v7206_v23 = vld [vmem:[#allocation2 + $0x448] ss:$20 sps:$4 sm:$0xff]   ;;  %v7207_v24 = vld [vmem:[#allocation2 + $0x5b0] ss:$20 sps:$4 sm:$0xff]  }
  0x87   : > { %1247 = vmatprep.subr.bf16.mxu0 %v7153_v26  ;;  %1349 = vmatprep.subr.bf16.mxu1 %v7156_v27  ;;  %v7208_v26 = vld [vmem:[#allocation2 + $0x6f0] ss:$20 sps:$4 sm:$0xff]  }
  0x88   : > { %1236 = vmatprep.mubr.bf16.mxu0 %v8124_v28  ;;  %1338 = vmatprep.mubr.bf16.mxu1 %v8124_v28  ;;  %v7209_v27 = vld [vmem:[#allocation2 + $0x470] ss:$20 sps:$4 sm:$0xff]  }
  0x8a   : > { %1248 = vmatpush1.bf16.msra.mxu0 %v7151_v29  ;;  %1350 = vmatpush1.bf16.msra.mxu1 %v7154_v31  ;;  %v7210_v29 = vld [vmem:[#allocation2 + $0x5d8] ss:$20 sps:$4 sm:$0xff]  }
  0x8b   : > { %1249 = vmatprep.subr.bf16.mxu0 %v7159_v32  ;;  %1351 = vmatprep.subr.bf16.mxu1 %v7162_v33  ;;  %v7212_v31 = vld [vmem:[#allocation2 + $0x498] ss:$20 sps:$4 sm:$0xff]   ;;  %v7213_v32 = vld [vmem:[#allocation2 + $0x600] ss:$20 sps:$4 sm:$0xff]  }
  0x8c   : > { %v7214_v33 = vld [vmem:[#allocation2 + $0x740] ss:$20 sps:$4 sm:$0xff]  }
  0x8d   : > { %1237 = vmatmul.mubr.bf16.gmra.mrb[4].mxu0 %v8131_v36  ;;  %1339 = vmatmul.mubr.bf16.gmra.mrb[4].mxu1 %v8131_v36 }
  0x8e   : > { %1250 = vmatpush1.bf16.msra.mxu0 %v7157_v34  ;;  %1352 = vmatpush1.bf16.msra.mxu1 %v7160_v35  ;;  %v7215_v34 = vld [vmem:[#allocation2 + $0x4c0] ss:$20 sps:$4 sm:$0xff]   ;;  %v7217_v35 = vld [vmem:[#allocation2 + $0x768] ss:$20 sps:$4 sm:$0xff]  }
  0x8f   : > { %1251 = vmatprep.subr.bf16.mxu0 %v7165_v37  ;;  %1353 = vmatprep.subr.bf16.mxu1 %v7168_v38  ;;  %v7218_v37 = vld [vmem:[#allocation2 + $0x4e8] ss:$20 sps:$4 sm:$0xff]   ;;  %v7221_v38 = vld [vmem:[#allocation2 + $0x4] ss:$20 sps:$4 sm:$0xff]  }
  0x90   : > { %1277 = vmatprep.mubr.bf16.mxu0 %v7984_v46  ;;  %1379 = vmatprep.mubr.bf16.mxu1 %v7984_v46 }
  0x92   : > { %1252 = vmatpush1.bf16.msra.mxu0 %v7163_v39  ;;  %1354 = vmatpush1.bf16.msra.mxu1 %v7166_v40  ;;  %v7224_v39 = vld [vmem:[#allocation2 + $0xc] ss:$20 sps:$4 sm:$0xff]  }
  0x93   : > { %1253 = vmatprep.subr.bf16.mxu0 %v7171_v41  ;;  %1355 = vmatprep.subr.bf16.mxu1 %v7174_v42  ;;  %v7219_v40 = vld [vmem:[#allocation2] ss:$20 sps:$4 sm:$0xff]   ;;  %v7222_v41 = vld [vmem:[#allocation2 + $0x8] ss:$20 sps:$4 sm:$0xff]  }
  0x94   : > { %v7227_v42 = vld [vmem:[#allocation2 + $0x2c] ss:$20 sps:$4 sm:$0xff]  }
  0x96   : > { %1254 = vmatpush1.bf16.msra.mxu0 %v7169_v45  ;;  %1356 = vmatpush1.bf16.msra.mxu1 %v7172_v47  ;;  %v7228_v45 = vld [vmem:[#allocation2 + $0x30] ss:$20 sps:$4 sm:$0xff]   ;;  %v7233_v47 = vld [vmem:[#allocation2 + $0x54] ss:$20 sps:$4 sm:$0xff]  }
  0x97   : > { %1255 = vmatprep.subr.bf16.mxu0 %v7177_v48  ;;  %1357 = vmatprep.subr.bf16.mxu1 %v7180_v50  ;;  %v7236_v48 = vld [vmem:[#allocation2 + $0x5c] ss:$20 sps:$4 sm:$0xff]  }
  0x98   : > { %v7231_v50 = vld [vmem:[#allocation2 + $0x50] ss:$20 sps:$4 sm:$0xff]  }
  0x9a   : > { %1256 = vmatpush1.bf16.msra.mxu0 %v7175_v51  ;;  %1358 = vmatpush1.bf16.msra.mxu1 %v7178_v54  ;;  %v7234_v51 = vld [vmem:[#allocation2 + $0x58] ss:$20 sps:$4 sm:$0xff]  }
  0x9b   : > { %1257 = vmatprep.subr.bf16.mxu0 %v7183_v56  ;;  %1359 = vmatprep.subr.bf16.mxu1 %v7186_v58  ;;  %v7242_v54 = vld [vmem:[#allocation2 + $0x84] ss:$20 sps:$4 sm:$0xff]   ;;  %v7240_v56 = vld [vmem:[#allocation2 + $0x80] ss:$20 sps:$4 sm:$0xff]  }
  0x9c   : > { %v7243_v58 = vld [vmem:[#allocation2 + $0xa0] ss:$20 sps:$4 sm:$0xff]  }
  0x9e   : > { %1258 = vmatpush1.bf16.msra.mxu0 %v7181_v59  ;;  %1360 = vmatpush1.bf16.msra.mxu1 %v7184_v60  ;;  %v7246_v59 = vld [vmem:[#allocation2 + $0xa8] ss:$20 sps:$4 sm:$0xff]   ;;  %v7251_v60 = vld [vmem:[#allocation2 + $0xcc] ss:$20 sps:$4 sm:$0xff]  }
  0x9f   : > { %1259 = vmatprep.subr.bf16.mxu0 %v7189_v61  ;;  %1361 = vmatprep.subr.bf16.mxu1 %v7192_v2  ;;  %v7254_v61 = vld [vmem:[#allocation2 + $0xd4] ss:$20 sps:$4 sm:$0xff]   ;;  %v7255_v2 = vld [vmem:[#allocation2 + $0xf0] ss:$20 sps:$4 sm:$0xff]  }
  0xa2   : > { %1260 = vmatpush1.bf16.msra.mxu0 %v7187_v3  ;;  %1362 = vmatpush1.bf16.msra.mxu1 %v7190_v6  ;;  %v7258_v3 = vld [vmem:[#allocation2 + $0xf8] ss:$20 sps:$4 sm:$0xff]   ;;  %v7263_v6 = vld [vmem:[#allocation2 + $0x11c] ss:$20 sps:$4 sm:$0xff]  }
  0xa3   : > { %6649 = vmatprep.subr.bf16.mxu0 %v7195_v9  ;;  %6839 = vmatprep.subr.bf16.mxu1 %v7196_v10  ;;  %v7264_v9 = vld [vmem:[#allocation2 + $0x120] ss:$20 sps:$4 sm:$0xff]  }
  0xa5   : > { %1278 = vmatmul.mubr.bf16.vlgmr.msra.gmra.mrb[0].mxu0 %v554_v11  ;;  %1380 = vmatmul.mubr.bf16.vlgmr.msra.gmra.mrb[0].mxu1 %v554_v11 }
  0xa6   : > { %6650 = vmatpush3.bf16.msra.mxu0 %v7197_v12  ;;  %6840 = vmatpush3.bf16.msra.mxu1 %v7196_v10  ;;  %v7269_v10 = vld [vmem:[#allocation2 + $0x144] ss:$20 sps:$4 sm:$0xff]   ;;  %v7267_v12 = vld [vmem:[#allocation2 + $0x140] ss:$20 sps:$4 sm:$0xff]  }
  0xa7   : > { %6651 = vmatprep.subr.bf16.mxu0 %v7198_v13  ;;  %6841 = vmatprep.subr.bf16.mxu1 %v7199_v14  ;;  %v7270_v13 = vld [vmem:[#allocation2 + $0x148] ss:$20 sps:$4 sm:$0xff]  }
  0xa8   : > { %1287 = vmatprep.mubr.bf16.mxu0 %v7984_v46  ;;  %1389 = vmatprep.mubr.bf16.mxu1 %v7984_v46 }
  0xaa   : > { %6652 = vmatpush3.bf16.msra.mxu0 %v7200_v16  ;;  %6842 = vmatpush3.bf16.msra.mxu1 %v7199_v14  ;;  %v7275_v14 = vld [vmem:[#allocation2 + $0x16c] ss:$20 sps:$4 sm:$0xff]   ;;  %v7273_v16 = vld [vmem:[#allocation2 + $0x168] ss:$20 sps:$4 sm:$0xff]  }
  0xab   : > { %6653 = vmatprep.subr.bf16.mxu0 %v7201_v17  ;;  %6843 = vmatprep.subr.bf16.mxu1 %v7202_v18  ;;  %v7276_v17 = vld [vmem:[#allocation2 + $0x170] ss:$20 sps:$4 sm:$0xff]  }
  0xad   : > { %1288 = vmatmul.mubr.bf16.gmra.mrb[8].mxu0 %v563_v19  ;;  %1390 = vmatmul.mubr.bf16.gmra.mrb[8].mxu1 %v563_v19 }
  0xae   : > { %6654 = vmatpush3.bf16.msra.mxu0 %v7203_v20  ;;  %6844 = vmatpush3.bf16.msra.mxu1 %v7202_v18  ;;  %v7281_v18 = vld [vmem:[#allocation2 + $0x194] ss:$20 sps:$4 sm:$0xff]   ;;  %v7279_v20 = vld [vmem:[#allocation2 + $0x190] ss:$20 sps:$4 sm:$0xff]  }
  0xaf   : > { %6655 = vmatprep.subr.bf16.mxu0 %v7204_v21  ;;  %6845 = vmatprep.subr.bf16.mxu1 %v7205_v22  ;;  %v7282_v21 = vld [vmem:[#allocation2 + $0x198] ss:$20 sps:$4 sm:$0xff]  }
  0xb0   : > { %1430 = vmatprep.mubr.bf16.mxu0 %v8111_v4  ;;  %6855 = vmatprep.mubr.bf16.mxu1 %v554_v11  ;;  %v7216_v4 = vld [vmem:[#allocation2 + $0x628] ss:$20 sps:$4 sm:$0xff]   ;;  %v7272_v11 = vld [vmem:[#allocation2 + $0x14c] ss:$20 sps:$4 sm:$0xff]  }
  0xb2   : > { %6656 = vmatpush3.bf16.msra.mxu0 %v7206_v23  ;;  %6846 = vmatpush3.bf16.msra.mxu1 %v7205_v22  ;;  %v7287_v22 = vld [vmem:[#allocation2 + $0x1bc] ss:$20 sps:$4 sm:$0xff]   ;;  %v7290_v23 = vld [vmem:[#allocation2 + $0x1c4] ss:$20 sps:$4 sm:$0xff]  }
  0xb3   : > { %6657 = vmatprep.subr.bf16.mxu0 %v7207_v24  ;;  %6847 = vmatprep.subr.bf16.mxu1 %v7208_v26  ;;  %v7285_v24 = vld [vmem:[#allocation2 + $0x1b8] ss:$20 sps:$4 sm:$0xff]  }
  0xb6   : > { %6658 = vmatpush3.bf16.msra.mxu0 %v7209_v27  ;;  %6848 = vmatpush3.bf16.msra.mxu1 %v7208_v26  ;;  %v7288_v26 = vld [vmem:[#allocation2 + $0x1c0] ss:$20 sps:$4 sm:$0xff]   ;;  %v7293_v27 = vld [vmem:[#allocation2 + $0x1e4] ss:$20 sps:$4 sm:$0xff]  }
  0xb7   : > { %6659 = vmatprep.subr.bf16.mxu0 %v7210_v29  ;;  %6849 = vmatprep.subr.bf16.mxu1 %v7211_v30  ;;  %v7296_v29 = vld [vmem:[#allocation2 + $0x1ec] ss:$20 sps:$4 sm:$0xff]  }
  0xba   : > { %6660 = vmatpush3.bf16.msra.mxu0 %v7212_v31  ;;  %6850 = vmatpush3.bf16.msra.mxu1 %v7211_v30  ;;  %v7291_v30 = vld [vmem:[#allocation2 + $0x1e0] ss:$20 sps:$4 sm:$0xff]   ;;  %v7294_v31 = vld [vmem:[#allocation2 + $0x1e8] ss:$20 sps:$4 sm:$0xff]  }
  0xbb   : > { %6661 = vmatprep.subr.bf16.mxu0 %v7213_v32  ;;  %6851 = vmatprep.subr.bf16.mxu1 %v7214_v33  ;;  %v7299_v32 = vld [vmem:[#allocation2 + $0x20c] ss:$20 sps:$4 sm:$0xff]  }
  0xbe   : > { %6662 = vmatpush3.bf16.msra.mxu0 %v7215_v34  ;;  %6852 = vmatpush3.bf16.msra.mxu1 %v7214_v33  ;;  %v7302_v33 = vld [vmem:[#allocation2 + $0x214] ss:$20 sps:$4 sm:$0xff]  }
  0xbf   : > { %6663 = vmatprep.subr.bf16.mxu0 %v7216_v4  ;;  %6853 = vmatprep.subr.bf16.mxu1 %v7217_v35  ;;  %v7297_v34 = vld [vmem:[#allocation2 + $0x208] ss:$20 sps:$4 sm:$0xff]   ;;  %v7300_v4 = vld [vmem:[#allocation2 + $0x210] ss:$20 sps:$4 sm:$0xff]  }
  0xc2   : > { %6664 = vmatpush3.bf16.msra.mxu0 %v7218_v37  ;;  %6854 = vmatpush3.bf16.msra.mxu1 %v7217_v35  ;;  %v7305_v35 = vld [vmem:[#allocation2 + $0x234] ss:$20 sps:$4 sm:$0xff]   ;;  %v7308_v37 = vld [vmem:[#allocation2 + $0x23c] ss:$20 sps:$4 sm:$0xff]  }
  0xc3   : > { %2132 = vmatprep.subr.bf16.mxu0 %v7221_v38  ;;  %2234 = vmatprep.subr.bf16.mxu1 %v7224_v39  ;;  %v7303_v38 = vld [vmem:[#allocation2 + $0x230] ss:$20 sps:$4 sm:$0xff]   ;;  %v7306_v39 = vld [vmem:[#allocation2 + $0x238] ss:$20 sps:$4 sm:$0xff]  }
  0xc5   : > { %1431 = vmatmul.mubr.bf16.vlgmr.msra.gmra.mrb[12].mxu0 %v8122_v25  ;;  %6856 = vmatmul.mubr.bf16.vlgmr.msra.gmra.mrb[12].mxu1 %v563_v19  ;;  %v7239_v25 = vld [vmem:[#allocation2 + $0x7c] ss:$20 sps:$4 sm:$0xff]  }
  0xc6   : > { %2133 = vmatpush1.bf16.msra.mxu0 %v7219_v40  ;;  %2235 = vmatpush1.bf16.msra.mxu1 %v7222_v41  ;;  %v7284_v19 = vld [vmem:[#allocation2 + $0x19c] ss:$20 sps:$4 sm:$0xff]   ;;  %v7314_v41 = vld [vmem:[#allocation2 + $0x264] ss:$20 sps:$4 sm:$0xff]  }
  0xc7   : > { %2134 = vmatprep.subr.bf16.mxu0 %v7227_v42  ;;  %2236 = vmatprep.subr.bf16.mxu1 %v7230_v43  ;;  %v7311_v40 = vld [vmem:[#allocation2 + $0x25c] ss:$20 sps:$4 sm:$0xff]   ;;  %v7309_v42 = vld [vmem:[#allocation2 + $0x258] ss:$20 sps:$4 sm:$0xff]   ;;  %v7312_v43 = vld [vmem:[#allocation2 + $0x260] ss:$20 sps:$4 sm:$0xff]  }
  0xc8   : > { %1438 = vmatprep.mubr.bf16.mxu0 %v8124_v28  ;;  %2266 = vmatprep.mubr.bf16.mxu1 %v8101_v52  ;;  %v7248_v28 = vld [vmem:[#allocation2 + $0xac] ss:$20 sps:$4 sm:$0xff]  }
  0xca   : > { %2135 = vmatpush1.bf16.msra.mxu0 %v7225_v44  ;;  %2237 = vmatpush1.bf16.msra.mxu1 %v7228_v45  ;;  %v7317_v44 = vld [vmem:[#allocation2 + $0x284] ss:$20 sps:$4 sm:$0xff]   ;;  %v7320_v45 = vld [vmem:[#allocation2 + $0x28c] ss:$20 sps:$4 sm:$0xff]  }
  0xcb   : > { %2136 = vmatprep.subr.bf16.mxu0 %v7233_v47  ;;  %2238 = vmatprep.subr.bf16.mxu1 %v7236_v48  ;;  %v7315_v47 = vld [vmem:[#allocation2 + $0x280] ss:$20 sps:$4 sm:$0xff]   ;;  %v7318_v48 = vld [vmem:[#allocation2 + $0x288] ss:$20 sps:$4 sm:$0xff]  }
  0xcd   : > { %1439 = vmatmul.mubr.bf16.gmra.mrb[16].mxu0 %v8131_v36  ;;  %v7249_v36 = vld [vmem:[#allocation2 + $0xc8] ss:$20 sps:$4 sm:$0xff]  }
  0xce   : > { %2137 = vmatpush1.bf16.msra.mxu0 %v7231_v50  ;;  %2239 = vmatpush1.bf16.msra.mxu1 %v7234_v51  ;;  %v204_v50 = vld [vmem:[%s8096_s21 + $0x18] sm:$0x33]  ;;  %v7323_v51 = vld [vmem:[#allocation2 + $0x2ac] ss:$20 sps:$4 sm:$0xff]  }
  0xcf   : > { %2138 = vmatprep.subr.bf16.mxu0 %v7239_v25  ;;  %2240 = vmatprep.subr.bf16.mxu1 %v7242_v54  ;;  %v7326_v25 = vld [vmem:[#allocation2 + $0x2b4] ss:$20 sps:$4 sm:$0xff]   ;;  %v8154_v54 = vcombine.high %v204_v50, %v204_v50 }
  0xd0   : > { %2164 = vmatprep.mubr.bf16.mxu0 %v8101_v52 }
  0xd2   : > { %2139 = vmatpush1.bf16.msra.mxu0 %v7237_v55  ;;  %2241 = vmatpush1.bf16.msra.mxu1 %v7240_v56  ;;  %v7321_v55 = vld [vmem:[#allocation2 + $0x2a8] ss:$20 sps:$4 sm:$0xff]   ;;  %v7324_v56 = vld [vmem:[#allocation2 + $0x2b0] ss:$20 sps:$4 sm:$0xff]  }
  0xd3   : > { %2140 = vmatprep.subr.bf16.mxu0 %v7245_v57  ;;  %2242 = vmatprep.subr.bf16.mxu1 %v7248_v28  ;;  %v7331_v57 = vld [vmem:[#allocation2 + $0x2d4] ss:$20 sps:$4 sm:$0xff]   ;;  %v7334_v28 = vld [vmem:[#allocation2 + $0x2dc] ss:$20 sps:$4 sm:$0xff]  }
  0xd6   : > { %2141 = vmatpush1.bf16.msra.mxu0 %v7243_v58  ;;  %2243 = vmatpush1.bf16.msra.mxu1 %v7246_v59  ;;  %v8160_v58 = vcombine.low %v204_v50, %v204_v50  ;;  %v7329_v59 = vld [vmem:[#allocation2 + $0x2d0] ss:$20 sps:$4 sm:$0xff]   ;;  %v7395_v50 = vld [vmem:[#allocation2 + $0x78c] ss:$20 sps:$4 sm:$0xff]  }
  0xd7   : > { %2142 = vmatprep.subr.bf16.mxu0 %v7251_v60  ;;  %2244 = vmatprep.subr.bf16.mxu1 %v7254_v61  ;;  %v7332_v60 = vld [vmem:[#allocation2 + $0x2d8] ss:$20 sps:$4 sm:$0xff]   ;;  %v7337_v61 = vld [vmem:[#allocation2 + $0x2fc] ss:$20 sps:$4 sm:$0xff]  }
  0xda   : > { %2143 = vmatpush1.bf16.msra.mxu0 %v7249_v36  ;;  %2245 = vmatpush1.bf16.msra.mxu1 %v7252_v63  ;;  %v7340_v36 = vld [vmem:[#allocation2 + $0x304] ss:$20 sps:$4 sm:$0xff]  }
  0xdb   : > { %2144 = vmatprep.subr.bf16.mxu0 %v7257_v0  ;;  %2246 = vmatprep.subr.bf16.mxu1 %v7260_v1  ;;  %v7335_v63 = vld [vmem:[#allocation2 + $0x2f8] ss:$20 sps:$4 sm:$0xff]   ;;  %v7338_v0 = vld [vmem:[#allocation2 + $0x300] ss:$20 sps:$4 sm:$0xff]  }
  0xdc   : > { %v7343_v1 = vld [vmem:[#allocation2 + $0x324] ss:$20 sps:$4 sm:$0xff]  }
  0xde   : > { %2145 = vmatpush1.bf16.msra.mxu0 %v7255_v2  ;;  %2247 = vmatpush1.bf16.msra.mxu1 %v7258_v3  ;;  %v7346_v2 = vld [vmem:[#allocation2 + $0x32c] ss:$20 sps:$4 sm:$0xff]  }
  0xdf   : > { %2146 = vmatprep.subr.bf16.mxu0 %v7263_v6  ;;  %2248 = vmatprep.subr.bf16.mxu1 %v7266_v7  ;;  %v7341_v3 = vld [vmem:[#allocation2 + $0x320] ss:$20 sps:$4 sm:$0xff]   ;;  %v7344_v6 = vld [vmem:[#allocation2 + $0x328] ss:$20 sps:$4 sm:$0xff]  }
  0xe0   : > { %v7349_v7 = vld [vmem:[#allocation2 + $0x34c] ss:$20 sps:$4 sm:$0xff]  }
  0xe2   : > { %2147 = vmatpush1.bf16.msra.mxu0 %v7261_v8  ;;  %2249 = vmatpush1.bf16.msra.mxu1 %v7264_v9  ;;  %v7352_v8 = vld [vmem:[#allocation2 + $0x354] ss:$20 sps:$4 sm:$0xff]  }
  0xe3   : > { %2148 = vmatprep.subr.bf16.mxu0 %v7269_v10  ;;  %2250 = vmatprep.subr.bf16.mxu1 %v7272_v11  ;;  %v7347_v9 = vld [vmem:[#allocation2 + $0x348] ss:$20 sps:$4 sm:$0xff]   ;;  %v7350_v10 = vld [vmem:[#allocation2 + $0x350] ss:$20 sps:$4 sm:$0xff]  }
  0xe4   : > { %v7355_v11 = vld [vmem:[#allocation2 + $0x374] ss:$20 sps:$4 sm:$0xff]  }
  0xe6   : > { %2149 = vmatpush1.bf16.msra.mxu0 %v7267_v12  ;;  %2251 = vmatpush1.bf16.msra.mxu1 %v7270_v13  ;;  %v7358_v12 = vld [vmem:[#allocation2 + $0x37c] ss:$20 sps:$4 sm:$0xff]  }
  0xe7   : > { %2150 = vmatprep.subr.bf16.mxu0 %v7275_v14  ;;  %2252 = vmatprep.subr.bf16.mxu1 %v7278_v15  ;;  %v7353_v13 = vld [vmem:[#allocation2 + $0x370] ss:$20 sps:$4 sm:$0xff]   ;;  %v7356_v14 = vld [vmem:[#allocation2 + $0x378] ss:$20 sps:$4 sm:$0xff]  }
  0xe8   : > { %v7361_v15 = vld [vmem:[#allocation2 + $0x39c] ss:$20 sps:$4 sm:$0xff]  }
  0xea   : > { %2151 = vmatpush1.bf16.msra.mxu0 %v7273_v16  ;;  %2253 = vmatpush1.bf16.msra.mxu1 %v7276_v17  ;;  %v7364_v16 = vld [vmem:[#allocation2 + $0x3a4] ss:$20 sps:$4 sm:$0xff]  }
  0xeb   : > { %2152 = vmatprep.subr.bf16.mxu0 %v7281_v18  ;;  %2254 = vmatprep.subr.bf16.mxu1 %v7284_v19  ;;  %v7359_v17 = vld [vmem:[#allocation2 + $0x398] ss:$20 sps:$4 sm:$0xff]   ;;  %v7362_v18 = vld [vmem:[#allocation2 + $0x3a0] ss:$20 sps:$4 sm:$0xff]   ;;  %v7365_v19 = vld [vmem:[#allocation2 + $0x150] ss:$20 sps:$4 sm:$0xff]  }
  0xee   : > { %2153 = vmatpush1.bf16.msra.mxu0 %v7279_v20  ;;  %2255 = vmatpush1.bf16.msra.mxu1 %v7282_v21  ;;  %v7366_v20 = vld [vmem:[#allocation2 + $0x290] ss:$20 sps:$4 sm:$0xff]  }
  0xef   : > { %2154 = vmatprep.subr.bf16.mxu0 %v7287_v22  ;;  %2256 = vmatprep.subr.bf16.mxu1 %v7290_v23  ;;  %v7367_v21 = vld [vmem:[#allocation2 + $0x10] ss:$20 sps:$4 sm:$0xff]   ;;  %v7368_v22 = vld [vmem:[#allocation2 + $0x178] ss:$20 sps:$4 sm:$0xff]  }
  0xf0   : > { %v7369_v23 = vld [vmem:[#allocation2 + $0x2b8] ss:$20 sps:$4 sm:$0xff]  }
  0xf2   : > { %2155 = vmatpush1.bf16.msra.mxu0 %v7285_v24  ;;  %2257 = vmatpush1.bf16.msra.mxu1 %v7288_v26  ;;  %v7370_v24 = vld [vmem:[#allocation2 + $0x38] ss:$20 sps:$4 sm:$0xff]   ;;  %v7372_v26 = vld [vmem:[#allocation2 + $0x1a0] ss:$20 sps:$4 sm:$0xff]  }
  0xf3   : > { %2156 = vmatprep.subr.bf16.mxu0 %v7293_v27  ;;  %2258 = vmatprep.subr.bf16.mxu1 %v7296_v29  ;;  %v7373_v27 = vld [vmem:[#allocation2 + $0x2e0] ss:$20 sps:$4 sm:$0xff]  }
  0xf4   : > { %v7371_v29 = vld [vmem:[%s8096_s21 + $0x20] ss:$0 sps:$4 sm:$0x33]  }
  0xf6   : > { %2157 = vmatpush1.bf16.msra.mxu0 %v7291_v30  ;;  %2259 = vmatpush1.bf16.msra.mxu1 %v7294_v31  ;;  %v7374_v30 = vld [vmem:[#allocation2 + $0x60] ss:$20 sps:$4 sm:$0xff]   ;;  %v7375_v31 = vld [vmem:[#allocation2 + $0x1c8] ss:$20 sps:$4 sm:$0xff]  }
  0xf7   : > { %2158 = vmatprep.subr.bf16.mxu0 %v7299_v32  ;;  %2260 = vmatprep.subr.bf16.mxu1 %v7302_v33  ;;  %v7376_v32 = vld [vmem:[#allocation2 + $0x308] ss:$20 sps:$4 sm:$0xff]  }
  0xf8   : > { %v7377_v33 = vld [vmem:[#allocation2 + $0x88] ss:$20 sps:$4 sm:$0xff]  }
  0xfa   : > { %2159 = vmatpush1.bf16.msra.mxu0 %v7297_v34  ;;  %2261 = vmatpush1.bf16.msra.mxu1 %v7300_v4  ;;  %v7378_v34 = vld [vmem:[#allocation2 + $0x1f0] ss:$20 sps:$4 sm:$0xff]  }
  0xfb   : > { %2160 = vmatprep.subr.bf16.mxu0 %v7305_v35  ;;  %2262 = vmatprep.subr.bf16.mxu1 %v7308_v37  ;;  %v7379_v4 = vld [vmem:[#allocation2 + $0x330] ss:$20 sps:$4 sm:$0xff]   ;;  %v7381_v37 = vld [vmem:[#allocation2 + $0x218] ss:$20 sps:$4 sm:$0xff]  }
  0xfc   : > { %v7380_v35 = vld [vmem:[#allocation2 + $0xb0] ss:$20 sps:$4 sm:$0xff]  }
  0xfe   : > { %2161 = vmatpush1.bf16.msra.mxu0 %v7303_v38  ;;  %2263 = vmatpush1.bf16.msra.mxu1 %v7306_v39  ;;  %v7382_v38 = vld [vmem:[#allocation2 + $0x358] ss:$20 sps:$4 sm:$0xff]  }
  0xff   : > { %2162 = vmatprep.subr.bf16.mxu0 %v7311_v40  ;;  %2264 = vmatprep.subr.bf16.mxu1 %v7314_v41  ;;  %v7383_v39 = vld [vmem:[#allocation2 + $0xd8] ss:$20 sps:$4 sm:$0xff]   ;;  %v7384_v40 = vld [vmem:[#allocation2 + $0x240] ss:$20 sps:$4 sm:$0xff]  }
 0x100   : > { %v7385_v41 = vld [vmem:[#allocation2 + $0x380] ss:$20 sps:$4 sm:$0xff]  }
 0x102   : > { %2163 = vmatpush1.bf16.msra.mxu0 %v7309_v42  ;;  %2265 = vmatpush1.bf16.msra.mxu1 %v7312_v43  ;;  %v7386_v42 = vld [vmem:[#allocation2 + $0x100] ss:$20 sps:$4 sm:$0xff]  }
 0x103   : > { %2183 = vmatprep.subr.bf16.mxu0 %v7317_v44  ;;  %2285 = vmatprep.subr.bf16.mxu1 %v7320_v45  ;;  %v8174_v43 = vld [vmem:[%s8096_s21] sm:$0xee]  ;;  %v7389_v44 = vld [vmem:[#allocation2 + $0x128] ss:$20 sps:$4 sm:$0xff]   ;;  %v8177_v45 = vld [vmem:[%s8096_s21 + $0xc] sm:$0xff] }
 0x105   : > { %2165 = vmatmul.mubr.bf16.vlgmr.msra.gmra.mrb[0].mxu0 %v8108_v62  ;;  %2267 = vmatmul.mubr.bf16.vlgmr.msra.gmra.mrb[0].mxu1 %v8108_v62 }
 0x106   : > { %2184 = vmatpush1.bf16.msra.mxu0 %v7315_v47  ;;  %2286 = vmatpush1.bf16.msra.mxu1 %v7318_v48  ;;  %v8181_v47 = vcombine.high %v8174_v43, %v8177_v45  ;;  %v7392_v48 = vld [vmem:[#allocation2 + $0x784] ss:$20 sps:$4 sm:$0xff]  }
 0x107   : > { %2185 = vmatprep.subr.bf16.mxu0 %v7323_v51  ;;  %2287 = vmatprep.subr.bf16.mxu1 %v7326_v25  ;;  %v7390_v51 = vld [vmem:[#allocation2 + $0x780] ss:$20 sps:$4 sm:$0xff]   ;;  %v7393_v25 = vld [vmem:[#allocation2 + $0x788] ss:$20 sps:$4 sm:$0xff]  }
 0x108   : > { %2174 = vmatprep.mubr.bf16.mxu0 %v8154_v54  ;;  %2276 = vmatprep.mubr.bf16.mxu1 %v8154_v54 }
 0x10a   : > { %2186 = vmatpush1.bf16.msra.mxu0 %v7321_v55  ;;  %2288 = vmatpush1.bf16.msra.mxu1 %v7324_v56  ;;  %v7398_v55 = vld [vmem:[#allocation2 + $0x7ac] ss:$20 sps:$4 sm:$0xff]   ;;  %v2591_v56 = vrot.slane %v8181_v47, 1 }
 0x10b   : > { %2187 = vmatprep.subr.bf16.mxu0 %v7331_v57  ;;  %2289 = vmatprep.subr.bf16.mxu1 %v7334_v28  ;;  %v8185_v57 = vrot.slane %v8103_v53, 1  ;;  %v7401_v28 = vld [vmem:[#allocation2 + $0x7b4] ss:$20 sps:$4 sm:$0xff]   ;;  %v7407_v53 = vld [vmem:[#allocation2 + $0x7dc] ss:$20 sps:$4 sm:$0xff]  }
 0x10d   : > { %2175 = vmatmul.mubr.bf16.gmra.mrb[20].mxu0 %v8160_v58  ;;  %2277 = vmatmul.mubr.bf16.gmra.mrb[16].mxu1 %v8160_v58 }
 0x10e   : > { %2188 = vmatpush1.bf16.msra.mxu0 %v7329_v59  ;;  %2290 = vmatpush1.bf16.msra.mxu1 %v7332_v60  ;;  %v7396_v59 = vld [vmem:[#allocation2 + $0x7a8] ss:$20 sps:$4 sm:$0xff]   ;;  %v7399_v60 = vld [vmem:[#allocation2 + $0x7b0] ss:$20 sps:$4 sm:$0xff]  }
 0x10f   : > { %2189 = vmatprep.subr.bf16.mxu0 %v7337_v61  ;;  %2291 = vmatprep.subr.bf16.mxu1 %v7340_v36  ;;  %v8190_v61 = vsel %vm2587_vm1, %v2591_v56, %v8185_v57  ;;  %v7404_v36 = vld [vmem:[#allocation2 + $0x7d4] ss:$20 sps:$4 sm:$0xff]  }
 0x110   : > { %2215 = vmatprep.mubr.bf16.mxu0 %v7984_v46  ;;  %2317 = vmatprep.mubr.bf16.mxu1 %v7984_v46  ;;  %v7473_v56 = vld [vmem:[#allocation2 + $0x994] ss:$20 sps:$4 sm:$0xff]  }
 0x112   : > { %2190 = vmatpush1.bf16.msra.mxu0 %v7335_v63  ;;  %2292 = vmatpush1.bf16.msra.mxu1 %v7338_v0  ;;  %v7402_v63 = vld [vmem:[#allocation2 + $0x7d0] ss:$20 sps:$4 sm:$0xff]   ;;  %v7405_v0 = vld [vmem:[#allocation2 + $0x7d8] ss:$20 sps:$4 sm:$0xff]  }
 0x113   : > { %2191 = vmatprep.subr.bf16.mxu0 %v7343_v1  ;;  %2293 = vmatprep.subr.bf16.mxu1 %v7346_v2  ;;  %v7413_v1 = vld [vmem:[#allocation2 + $0x804] ss:$20 sps:$4 sm:$0xff]  }
 0x114   : > { %v7408_v2 = vld [vmem:[#allocation2 + $0x7f8] ss:$20 sps:$4 sm:$0xff]  }
 0x116   : > { %2192 = vmatpush1.bf16.msra.mxu0 %v7341_v3  ;;  %2294 = vmatpush1.bf16.msra.mxu1 %v7344_v6  ;;  %v7411_v3 = vld [vmem:[#allocation2 + $0x800] ss:$20 sps:$4 sm:$0xff]   ;;  %v7416_v6 = vld [vmem:[#allocation2 + $0x824] ss:$20 sps:$4 sm:$0xff]  }
 0x117   : > { %2193 = vmatprep.subr.bf16.mxu0 %v7349_v7  ;;  %2295 = vmatprep.subr.bf16.mxu1 %v7352_v8  ;;  %v7414_v7 = vld [vmem:[#allocation2 + $0x820] ss:$20 sps:$4 sm:$0xff]   ;;  %v7417_v8 = vld [vmem:[#allocation2 + $0x828] ss:$20 sps:$4 sm:$0xff]  }
 0x11a   : > { %2194 = vmatpush1.bf16.msra.mxu0 %v7347_v9  ;;  %2296 = vmatpush1.bf16.msra.mxu1 %v7350_v10  ;;  %v7422_v9 = vld [vmem:[#allocation2 + $0x84c] ss:$20 sps:$4 sm:$0xff]   ;;  %v7425_v10 = vld [vmem:[#allocation2 + $0x854] ss:$20 sps:$4 sm:$0xff]  }
 0x11b   : > { %2195 = vmatprep.subr.bf16.mxu0 %v7355_v11  ;;  %2297 = vmatprep.subr.bf16.mxu1 %v7358_v12  ;;  %v7423_v11 = vld [vmem:[#allocation2 + $0x850] ss:$20 sps:$4 sm:$0xff]   ;;  %v7428_v12 = vld [vmem:[#allocation2 + $0x874] ss:$20 sps:$4 sm:$0xff]  }
 0x11e   : > { %2196 = vmatpush1.bf16.msra.mxu0 %v7353_v13  ;;  %2298 = vmatpush1.bf16.msra.mxu1 %v7356_v14  ;;  %v7431_v13 = vld [vmem:[#allocation2 + $0x87c] ss:$20 sps:$4 sm:$0xff]  }
 0x11f   : > { %2197 = vmatprep.subr.bf16.mxu0 %v7361_v15  ;;  %2299 = vmatprep.subr.bf16.mxu1 %v7364_v16  ;;  %v7426_v14 = vld [vmem:[#allocation2 + $0x870] ss:$20 sps:$4 sm:$0xff]   ;;  %v7429_v15 = vld [vmem:[#allocation2 + $0x878] ss:$20 sps:$4 sm:$0xff]  }
 0x120   : > { %v7434_v16 = vld [vmem:[#allocation2 + $0x89c] ss:$20 sps:$4 sm:$0xff]  }
 0x122   : > { %2198 = vmatpush1.bf16.msra.mxu0 %v7359_v17  ;;  %2300 = vmatpush1.bf16.msra.mxu1 %v7362_v18  ;;  %v7437_v17 = vld [vmem:[#allocation2 + $0x8a4] ss:$20 sps:$4 sm:$0xff]  }
 0x123   : > { %6687 = vmatprep.subr.bf16.mxu0 %v7365_v19  ;;  %6859 = vmatprep.subr.bf16.mxu1 %v7366_v20  ;;  %v7432_v18 = vld [vmem:[#allocation2 + $0x898] ss:$20 sps:$4 sm:$0xff]   ;;  %v7435_v19 = vld [vmem:[#allocation2 + $0x8a0] ss:$20 sps:$4 sm:$0xff]  }
 0x125   : > { %2216 = vmatmul.mubr.bf16.vlgmr.msra.gmra.mrb[0].mxu0 %v8139_v49  ;;  %2318 = vmatmul.mubr.bf16.vlgmr.msra.gmra.mrb[0].mxu1 %v8139_v49 }
 0x126   : > { %6688 = vmatpush3.bf16.msra.mxu0 %v7367_v21  ;;  %6860 = vmatpush3.bf16.msra.mxu1 %v7366_v20  ;;  %v7440_v20 = vld [vmem:[#allocation2 + $0x8c4] ss:$20 sps:$4 sm:$0xff]   ;;  %v7443_v21 = vld [vmem:[#allocation2 + $0x8cc] ss:$20 sps:$4 sm:$0xff]  }
 0x127   : > { %6689 = vmatprep.subr.bf16.mxu0 %v7368_v22  ;;  %6861 = vmatprep.subr.bf16.mxu1 %v7369_v23 }
 0x128   : > { %2225 = vmatprep.mubr.bf16.mxu0 %v7984_v46  ;;  %2327 = vmatprep.mubr.bf16.mxu1 %v7984_v46 }
 0x12a   : > { %6690 = vmatpush3.bf16.msra.mxu0 %v7370_v24  ;;  %6862 = vmatpush3.bf16.msra.mxu1 %v7369_v23  ;;  %v7438_v24 = vld [vmem:[#allocation2 + $0x8c0] ss:$20 sps:$4 sm:$0xff]  }
 0x12b   : > { %6691 = vmatprep.subr.bf16.mxu0 %v7372_v26  ;;  %6863 = vmatprep.subr.bf16.mxu1 %v7373_v27 }
 0x12d   : > { %2226 = vmatmul.mubr.bf16.gmra.mrb[24].mxu0 %v7371_v29  ;;  %2328 = vmatmul.mubr.bf16.gmra.mrb[20].mxu1 %v7371_v29 }
 0x12e   : > { %6692 = vmatpush3.bf16.msra.mxu0 %v7374_v30  ;;  %6864 = vmatpush3.bf16.msra.mxu1 %v7373_v27  ;;  %v7446_v30 = vld [vmem:[#allocation2 + $0x8ec] ss:$20 sps:$4 sm:$0xff]  }
 0x12f   : > { %6693 = vmatprep.subr.bf16.mxu0 %v7375_v31  ;;  %6865 = vmatprep.subr.bf16.mxu1 %v7376_v32 }
 0x130   : > { %2368 = vmatprep.mubr.bf16.mxu0 %v8101_v52  ;;  %6875 = vmatprep.mubr.bf16.mxu1 %v8139_v49  ;;  %v7387_v52 = vld [vmem:[#allocation2 + $0x268] ss:$20 sps:$4 sm:$0xff]  }
 0x131   : > { %v7388_v49 = vld [vmem:[#allocation2 + $0x3a8] ss:$20 sps:$4 sm:$0xff]  }
 0x132   : > { %6694 = vmatpush3.bf16.msra.mxu0 %v7377_v33  ;;  %6866 = vmatpush3.bf16.msra.mxu1 %v7376_v32  ;;  %v7449_v33 = vld [vmem:[#allocation2 + $0x8f4] ss:$20 sps:$4 sm:$0xff]  }
 0x133   : > { %6695 = vmatprep.subr.bf16.mxu0 %v7378_v34  ;;  %6867 = vmatprep.subr.bf16.mxu1 %v7379_v4 }
 0x136   : > { %6696 = vmatpush3.bf16.msra.mxu0 %v7380_v35  ;;  %6868 = vmatpush3.bf16.msra.mxu1 %v7379_v4  ;;  %v7444_v35 = vld [vmem:[#allocation2 + $0x8e8] ss:$20 sps:$4 sm:$0xff]  }
 0x137   : > { %6697 = vmatprep.subr.bf16.mxu0 %v7381_v37  ;;  %6869 = vmatprep.subr.bf16.mxu1 %v7382_v38  ;;  %v7447_v37 = vld [vmem:[#allocation2 + $0x8f0] ss:$20 sps:$4 sm:$0xff]  }
 0x13a   : > { %6698 = vmatpush3.bf16.msra.mxu0 %v7383_v39  ;;  %6870 = vmatpush3.bf16.msra.mxu1 %v7382_v38  ;;  %v7452_v38 = vld [vmem:[#allocation2 + $0x914] ss:$20 sps:$4 sm:$0xff]   ;;  %v7455_v39 = vld [vmem:[#allocation2 + $0x91c] ss:$20 sps:$4 sm:$0xff]  }
 0x13b   : > { %6699 = vmatprep.subr.bf16.mxu0 %v7384_v40  ;;  %6871 = vmatprep.subr.bf16.mxu1 %v7385_v41  ;;  %v7450_v40 = vld [vmem:[#allocation2 + $0x910] ss:$20 sps:$4 sm:$0xff]  }
 0x13e   : > { %6700 = vmatpush3.bf16.msra.mxu0 %v7386_v42  ;;  %6872 = vmatpush3.bf16.msra.mxu1 %v7385_v41  ;;  %v7453_v41 = vld [vmem:[#allocation2 + $0x918] ss:$20 sps:$4 sm:$0xff]   ;;  %v7458_v42 = vld [vmem:[#allocation2 + $0x93c] ss:$20 sps:$4 sm:$0xff]  }
 0x13f   : > { %6701 = vmatprep.subr.bf16.mxu0 %v7387_v52  ;;  %6873 = vmatprep.subr.bf16.mxu1 %v7388_v49  ;;  %v7461_v52 = vld [vmem:[#allocation2 + $0x944] ss:$20 sps:$4 sm:$0xff]  }
 0x142   : > { %6702 = vmatpush3.bf16.msra.mxu0 %v7389_v44  ;;  %6874 = vmatpush3.bf16.msra.mxu1 %v7388_v49  ;;  %v7456_v49 = vld [vmem:[#allocation2 + $0x938] ss:$20 sps:$4 sm:$0xff]   ;;  %v7459_v44 = vld [vmem:[#allocation2 + $0x940] ss:$20 sps:$4 sm:$0xff]  }
 0x143   : > { %3227 = vmatprep.subr.bf16.mxu0 %v7392_v48  ;;  %3329 = vmatprep.subr.bf16.mxu1 %v7395_v50  ;;  %v7464_v48 = vld [vmem:[#allocation2 + $0x964] ss:$20 sps:$4 sm:$0xff]   ;;  %v7467_v50 = vld [vmem:[#allocation2 + $0x96c] ss:$20 sps:$4 sm:$0xff]  }
 0x145   : > { %2369 = vmatmul.mubr.bf16.vlgmr.msra.gmra.mrb[28].mxu0 %v8108_v62  ;;  %6876 = vmatmul.mubr.bf16.vlgmr.msra.gmra.mrb[24].mxu1 %v7371_v29  ;;  %v7410_v62 = vld [vmem:[#allocation2 + $0x7fc] ss:$20 sps:$4 sm:$0xff]  }
 0x146   : > { %3228 = vmatpush1.bf16.msra.mxu0 %v7390_v51  ;;  %3330 = vmatpush1.bf16.msra.mxu1 %v7393_v25  ;;  %v7441_v29 = vld [vmem:[#allocation2 + $0x8c8] ss:$20 sps:$4 sm:$0xff]   ;;  %v7462_v51 = vld [vmem:[#allocation2 + $0x960] ss:$20 sps:$4 sm:$0xff]  }
 0x147   : > { %3229 = vmatprep.subr.bf16.mxu0 %v7398_v55  ;;  %3331 = vmatprep.subr.bf16.mxu1 %v7401_v28  ;;  %v7465_v25 = vld [vmem:[#allocation2 + $0x968] ss:$20 sps:$4 sm:$0xff]   ;;  %v7470_v55 = vld [vmem:[#allocation2 + $0x98c] ss:$20 sps:$4 sm:$0xff]  }
 0x148   : > { %2376 = vmatprep.mubr.bf16.mxu0 %v8154_v54  ;;  %3361 = vmatprep.mubr.bf16.mxu1 %v8190_v61  ;;  %v7419_v54 = vld [vmem:[#allocation2 + $0x82c] ss:$20 sps:$4 sm:$0xff]   ;;  %v7468_v28 = vld [vmem:[#allocation2 + $0x988] ss:$20 sps:$4 sm:$0xff]  }
 0x14a   : > { %3230 = vmatpush1.bf16.msra.mxu0 %v7396_v59  ;;  %3332 = vmatpush1.bf16.msra.mxu1 %v7399_v60  ;;  %v7471_v59 = vld [vmem:[#allocation2 + $0x990] ss:$20 sps:$4 sm:$0xff]   ;;  %v7476_v60 = vld [vmem:[#allocation2 + $0x9b4] ss:$20 sps:$4 sm:$0xff]  }
 0x14b   : > { %3231 = vmatprep.subr.bf16.mxu0 %v7404_v36  ;;  %3333 = vmatprep.subr.bf16.mxu1 %v7407_v53  ;;  %v7479_v36 = vld [vmem:[#allocation2 + $0x9bc] ss:$20 sps:$4 sm:$0xff]  }
 0x14c   : > { %v7474_v53 = vld [vmem:[#allocation2 + $0x9b0] ss:$20 sps:$4 sm:$0xff]  }
 0x14d   : > { %2377 = vmatmul.mubr.bf16.gmra.mrb[32].mxu0 %v8160_v58  ;;  %v7420_v58 = vld [vmem:[#allocation2 + $0x848] ss:$20 sps:$4 sm:$0xff]  }
 0x14e   : > { %3232 = vmatpush1.bf16.msra.mxu0 %v7402_v63  ;;  %3334 = vmatpush1.bf16.msra.mxu1 %v7405_v0  ;;  %v7477_v63 = vld [vmem:[#allocation2 + $0x9b8] ss:$20 sps:$4 sm:$0xff]   ;;  %v8206_v0 = vcombine.low %v8174_v43, %v8177_v45 }
 0x14f   : > { %3233 = vmatprep.subr.bf16.mxu0 %v7410_v62  ;;  %3335 = vmatprep.subr.bf16.mxu1 %v7413_v1  ;;  %v7482_v62 = vld [vmem:[#allocation2 + $0x9dc] ss:$20 sps:$4 sm:$0xff]   ;;  %v7485_v1 = vld [vmem:[#allocation2 + $0x9e4] ss:$20 sps:$4 sm:$0xff]  }
 0x150   : > { %3259 = vmatprep.mubr.bf16.mxu0 %v8190_v61 }
 0x152   : > { %3234 = vmatpush1.bf16.msra.mxu0 %v7408_v2  ;;  %3336 = vmatpush1.bf16.msra.mxu1 %v7411_v3  ;;  %v7480_v2 = vld [vmem:[#allocation2 + $0x9d8] ss:$20 sps:$4 sm:$0xff]   ;;  %v7483_v3 = vld [vmem:[#allocation2 + $0x9e0] ss:$20 sps:$4 sm:$0xff]  }
 0x153   : > { %3235 = vmatprep.subr.bf16.mxu0 %v7416_v6  ;;  %3337 = vmatprep.subr.bf16.mxu1 %v7419_v54  ;;  %v2588_v6 = vrot.slane %v8206_v0, 1  ;;  %v8210_v54 = vrot.slane %v8113_v5, 1 }
 0x156   : > { %3236 = vmatpush1.bf16.msra.mxu0 %v7414_v7  ;;  %3338 = vmatpush1.bf16.msra.mxu1 %v7417_v8  ;;  %v7490_v7 = vld [vmem:[#allocation2 + $0xa04] ss:$20 sps:$4 sm:$0xff]   ;;  %v7493_v8 = vld [vmem:[#allocation2 + $0xa0c] ss:$20 sps:$4 sm:$0xff]  }
 0x157   : > { %3237 = vmatprep.subr.bf16.mxu0 %v7422_v9  ;;  %3339 = vmatprep.subr.bf16.mxu1 %v7425_v10 }
 0x15a   : > { %3238 = vmatpush1.bf16.msra.mxu0 %v7420_v58  ;;  %3340 = vmatpush1.bf16.msra.mxu1 %v7423_v11 }
 0x15b   : > { %3239 = vmatprep.subr.bf16.mxu0 %v7428_v12  ;;  %3341 = vmatprep.subr.bf16.mxu1 %v7431_v13  ;;  %v7488_v12 = vld [vmem:[#allocation2 + $0xa00] ss:$20 sps:$4 sm:$0xff]  }
 0x15e   : > { %3240 = vmatpush1.bf16.msra.mxu0 %v7426_v14  ;;  %3342 = vmatpush1.bf16.msra.mxu1 %v7429_v15  ;;  %v7491_v14 = vld [vmem:[#allocation2 + $0xa08] ss:$20 sps:$4 sm:$0xff]   ;;  %v8226_v15 = vsel %vm2587_vm1, %v2588_v6, %v8210_v54  ;;  %v7530_v6 = vld [vmem:[#allocation2 + $0xb18] ss:$20 sps:$4 sm:$0xff]  }
 0x15f   : > { %3241 = vmatprep.subr.bf16.mxu0 %v7434_v16  ;;  %3343 = vmatprep.subr.bf16.mxu1 %v7437_v17 }
 0x160   : > { %v8196_v22 = vpop.f32.mrb[4].mxu0  ;;  %v8198_v23 = vpop.f32.mrb[4].mxu1 }
 0x161   : > { %v8200_v26 = vpop.f32.mrb[5].mxu0  ;;  %v8202_v27 = vpop.f32.mrb[5].mxu1 }
 0x162   : > { %3242 = vmatpush1.bf16.msra.mxu0 %v7432_v18  ;;  %3344 = vmatpush1.bf16.msra.mxu1 %v7435_v19  ;;  %v1242_v31 = vpop.f32.mrb[6].mxu0  ;;  %v1344_v32 = vpop.f32.mrb[6].mxu1  ;;  %v7496_v18 = vld [vmem:[#allocation2 + $0xa2c] ss:$20 sps:$4 sm:$0xff]   ;;  %v7499_v19 = vld [vmem:[#allocation2 + $0xa34] ss:$20 sps:$4 sm:$0xff]  }
 0x163   : > { %3243 = vmatprep.subr.bf16.mxu0 %v7440_v20  ;;  %3345 = vmatprep.subr.bf16.mxu1 %v7443_v21  ;;  %v1243_v34 = vpop.f32.mrb[7].mxu0  ;;  %v1345_v4 = vpop.f32.mrb[7].mxu1  ;;  %v7511_v31 = vld [vmem:[#allocation2 + $0xa84] ss:$20 sps:$4 sm:$0xff]  }
 0x164   : > { %v7506_v32 = vld [vmem:[#allocation2 + $0xa78] ss:$20 sps:$4 sm:$0xff]  }
 0x165   : > { %v7514_v34 = vld [vmem:[#allocation2 + $0xaa4] ss:$20 sps:$4 sm:$0xff]   ;;  %v7517_v4 = vld [vmem:[#allocation2 + $0xaac] ss:$20 sps:$4 sm:$0xff]  }
 0x166   : > { %3244 = vmatpush1.bf16.msra.mxu0 %v7438_v24  ;;  %3346 = vmatpush1.bf16.msra.mxu1 %v7441_v29  ;;  %v7502_v24 = vld [vmem:[#allocation2 + $0xa54] ss:$20 sps:$4 sm:$0xff]   ;;  %v7503_v29 = vld [vmem:[#allocation2 + $0xa58] ss:$20 sps:$4 sm:$0xff]  }
 0x167   : > { %3245 = vmatprep.subr.bf16.mxu0 %v7446_v30  ;;  %3347 = vmatprep.subr.bf16.mxu1 %v7449_v33  ;;  %v7508_v30 = vld [vmem:[#allocation2 + $0xa7c] ss:$20 sps:$4 sm:$0xff]   ;;  %v7509_v33 = vld [vmem:[#allocation2 + $0xa80] ss:$20 sps:$4 sm:$0xff]  }
 0x16a   : > { %3246 = vmatpush1.bf16.msra.mxu0 %v7444_v35  ;;  %3348 = vmatpush1.bf16.msra.mxu1 %v7447_v37  ;;  %v7512_v35 = vld [vmem:[#allocation2 + $0xaa0] ss:$20 sps:$4 sm:$0xff]   ;;  %v7515_v37 = vld [vmem:[#allocation2 + $0xaa8] ss:$20 sps:$4 sm:$0xff]  }
 0x16b   : > { %3247 = vmatprep.subr.bf16.mxu0 %v7452_v38  ;;  %3349 = vmatprep.subr.bf16.mxu1 %v7455_v39  ;;  %v7520_v38 = vld [vmem:[#allocation2 + $0xacc] ss:$20 sps:$4 sm:$0xff]   ;;  %v7523_v39 = vld [vmem:[#allocation2 + $0xad4] ss:$20 sps:$4 sm:$0xff]  }
 0x16e   : > { %3248 = vmatpush1.bf16.msra.mxu0 %v7450_v40  ;;  %3350 = vmatpush1.bf16.msra.mxu1 %v7453_v41  ;;  %v7518_v40 = vld [vmem:[#allocation2 + $0xac8] ss:$20 sps:$4 sm:$0xff]   ;;  %v7521_v41 = vld [vmem:[#allocation2 + $0xad0] ss:$20 sps:$4 sm:$0xff]  }
 0x16f   : > { %3249 = vmatprep.subr.bf16.mxu0 %v7458_v42  ;;  %3351 = vmatprep.subr.bf16.mxu1 %v7461_v52  ;;  %v7526_v42 = vld [vmem:[#allocation2 + $0xaf4] ss:$20 sps:$4 sm:$0xff]   ;;  %v7529_v52 = vld [vmem:[#allocation2 + $0xafc] ss:$20 sps:$4 sm:$0xff]  }
 0x172   : > { %3250 = vmatpush1.bf16.msra.mxu0 %v7456_v49  ;;  %3352 = vmatpush1.bf16.msra.mxu1 %v7459_v44  ;;  %v2433_v49 = vld [vmem:[%s8096_s21 + $0x8] sm:$0xe] }
 0x173   : > { %3251 = vmatprep.subr.bf16.mxu0 %v7464_v48  ;;  %3353 = vmatprep.subr.bf16.mxu1 %v7467_v50  ;;  %v7524_v50 = vld [vmem:[#allocation2 + $0xaf0] ss:$20 sps:$4 sm:$0xff]  }
 0x176   : > { %3252 = vmatpush1.bf16.msra.mxu0 %v7462_v51  ;;  %3354 = vmatpush1.bf16.msra.mxu1 %v7465_v25  ;;  %v7527_v51 = vld [vmem:[#allocation2 + $0xaf8] ss:$20 sps:$4 sm:$0xff]  }
 0x177   : > { %3253 = vmatprep.subr.bf16.mxu0 %v7470_v55  ;;  %3355 = vmatprep.subr.bf16.mxu1 %v7473_v56 }
 0x17a   : > { %3254 = vmatpush1.bf16.msra.mxu0 %v7468_v28  ;;  %3356 = vmatpush1.bf16.msra.mxu1 %v7471_v59 }
 0x17b   : > { %3255 = vmatprep.subr.bf16.mxu0 %v7476_v60  ;;  %3357 = vmatprep.subr.bf16.mxu1 %v7479_v36  ;;  %v7904_v60 = vld [vmem:[%s8096_s21 + $0x14] sm:$0xf] }
 0x17c   : > { %v8238_v36 = vcombine.low %v2433_v49, %v7904_v60  ;;  %v3719_v49 = vshll.u32 %v8181_v47, 16  ;;  %v7560_v60 = vld [vmem:[#allocation2 + $0x8a8] ss:$20 sps:$4 sm:$0xff]  }
 0x17e   : > { %3256 = vmatpush1.bf16.msra.mxu0 %v7474_v53  ;;  %3358 = vmatpush1.bf16.msra.mxu1 %v7477_v63 }
 0x17f   : > { %3257 = vmatprep.subr.bf16.mxu0 %v7482_v62  ;;  %3359 = vmatprep.subr.bf16.mxu1 %v7485_v1  ;;  %v7532_v62 = vld [vmem:[#allocation2 + $0xb1c] ss:$20 sps:$4 sm:$0xff]   ;;  %v7535_v1 = vld [vmem:[#allocation2 + $0xb24] ss:$20 sps:$4 sm:$0xff]  }
 0x180   : > { %v1289_v9 = vpop.f32.mrb[8].mxu0  ;;  %v1391_v43 = vpop.f32.mrb[8].mxu1 }
 0x181   : > { %v8213_v45 = vadd.f32 %v1289_v9, %v8196_v22  ;;  %v8216_v10 = vadd.f32 %v1391_v43, %v8198_v23  ;;  %v1291_v58 = vpop.f32.mrb[9].mxu0  ;;  %v1393_v11 = vpop.f32.mrb[9].mxu1  ;;  %v7494_v22 = vld [vmem:[#allocation2 + $0xa28] ss:$20 sps:$4 sm:$0xff]   ;;  %v7497_v23 = vld [vmem:[#allocation2 + $0xa30] ss:$20 sps:$4 sm:$0xff]  }
 0x182   : > { %v8219_v13 = vadd.f32 %v1291_v58, %v8200_v26  ;;  %v8222_v5 = vadd.f32 %v1393_v11, %v8202_v27  ;;  %3258 = vmatpush1.bf16.msra.mxu0 %v7480_v2  ;;  %3360 = vmatpush1.bf16.msra.mxu1 %v7483_v3  ;;  %v1293_v16 = vpop.f32.mrb[10].mxu0  ;;  %v1395_v17 = vpop.f32.mrb[10].mxu1  ;;  %v7505_v26 = vld [vmem:[#allocation2 + $0xa5c] ss:$20 sps:$4 sm:$0xff]   ;;  %v7533_v43 = vld [vmem:[#allocation2 + $0xb20] ss:$20 sps:$4 sm:$0xff]  }
 0x183   : > { %3278 = vmatprep.subr.bf16.mxu0 %v7490_v7  ;;  %3380 = vmatprep.subr.bf16.mxu1 %v7493_v8  ;;  %v1294_v20 = vpop.f32.mrb[11].mxu0  ;;  %v1396_v21 = vpop.f32.mrb[11].mxu1  ;;  %v7500_v27 = vld [vmem:[#allocation2 + $0xa50] ss:$20 sps:$4 sm:$0xff]   ;;  %v2594_v58 = vrot.slane %v8238_v36, 1 }
 0x184   : > { %v7905_v7 = vld [vmem:[%s8096_s21 + $0x20] ss:$0 sps:$4 sm:$0x77]   ;;  %v7537_v11 = vld [vmem:[#allocation2 + $0x8d0] ss:$20 sps:$4 sm:$0xff]  }
 0x185   : > { %3260 = vmatmul.mubr.bf16.vlgmr.msra.gmra.mrb[0].mxu0 %v8226_v15  ;;  %3362 = vmatmul.mubr.bf16.vlgmr.msra.gmra.mrb[0].mxu1 %v8226_v15  ;;  %v8243_v8 = vrot.slane %v7905_v7, 1  ;;  %v7539_v17 = vld [vmem:[#allocation2 + $0x790] ss:$20 sps:$4 sm:$0xff]   ;;  %v7540_v21 = vld [vmem:[#allocation2 + $0x8f8] ss:$20 sps:$4 sm:$0xff]  }
 0x186   : > { %3279 = vmatpush1.bf16.msra.mxu0 %v7488_v12  ;;  %3381 = vmatpush1.bf16.msra.mxu1 %v7491_v14  ;;  %v7538_v12 = vld [vmem:[#allocation2 + $0xa10] ss:$20 sps:$4 sm:$0xff]   ;;  %v7572_v7 = vld [vmem:[#allocation2 + $0xb74] ss:$20 sps:$4 sm:$0xff]  }
 0x187   : > { %3280 = vmatprep.subr.bf16.mxu0 %v7496_v18  ;;  %3382 = vmatprep.subr.bf16.mxu1 %v7499_v19  ;;  %v2596_v19 = vsel %vm2587_vm1, %v2594_v58, %v8243_v8  ;;  %v7567_v58 = vld [vmem:[#allocation2 + $0xb68] ss:$20 sps:$4 sm:$0xff]  }
 0x188   : > { %3269 = vmatprep.mubr.bf16.mxu0 %v8185_v57  ;;  %3371 = vmatprep.mubr.bf16.mxu1 %v8185_v57 }
 0x18a   : > { %3281 = vmatpush1.bf16.msra.mxu0 %v7494_v22  ;;  %3383 = vmatpush1.bf16.msra.mxu1 %v7497_v23  ;;  %v7541_v22 = vld [vmem:[#allocation2 + $0xa38] ss:$20 sps:$4 sm:$0xff]  }
 0x18b   : > { %3282 = vmatprep.subr.bf16.mxu0 %v7502_v24  ;;  %3384 = vmatprep.subr.bf16.mxu1 %v7505_v26  ;;  %v7542_v26 = vld [vmem:[#allocation2 + $0x7b8] ss:$20 sps:$4 sm:$0xff]  }
 0x18d   : > { %3270 = vmatmul.mubr.bf16.gmra.mrb[36].mxu0 %v8210_v54  ;;  %3372 = vmatmul.mubr.bf16.gmra.mrb[28].mxu1 %v8210_v54 }
 0x18e   : > { %3283 = vmatpush1.bf16.msra.mxu0 %v7500_v27  ;;  %3385 = vmatpush1.bf16.msra.mxu1 %v7503_v29  ;;  %v7543_v27 = vld [vmem:[#allocation2 + $0x920] ss:$20 sps:$4 sm:$0xff]  }
 0x18f   : > { %3284 = vmatprep.subr.bf16.mxu0 %v7508_v30  ;;  %3386 = vmatprep.subr.bf16.mxu1 %v7511_v31  ;;  %v7544_v29 = vld [vmem:[#allocation2 + $0xa60] ss:$20 sps:$4 sm:$0xff]   ;;  %v7546_v31 = vld [vmem:[#allocation2 + $0x948] ss:$20 sps:$4 sm:$0xff]  }
 0x190   : > { %3310 = vmatprep.mubr.bf16.mxu0 %v7984_v46  ;;  %3412 = vmatprep.mubr.bf16.mxu1 %v7984_v46  ;;  %v7545_v30 = vld [vmem:[#allocation2 + $0x7e0] ss:$20 sps:$4 sm:$0xff]  }
 0x192   : > { %3285 = vmatpush1.bf16.msra.mxu0 %v7506_v32  ;;  %3387 = vmatpush1.bf16.msra.mxu1 %v7509_v33  ;;  %v7547_v32 = vld [vmem:[#allocation2 + $0xa88] ss:$20 sps:$4 sm:$0xff]  }
 0x193   : > { %3286 = vmatprep.subr.bf16.mxu0 %v7514_v34  ;;  %3388 = vmatprep.subr.bf16.mxu1 %v7517_v4  ;;  %v7548_v33 = vld [vmem:[#allocation2 + $0x808] ss:$20 sps:$4 sm:$0xff]   ;;  %v7549_v34 = vld [vmem:[#allocation2 + $0x970] ss:$20 sps:$4 sm:$0xff]  }
 0x194   : > { %v7550_v4 = vld [vmem:[#allocation2 + $0xab0] ss:$20 sps:$4 sm:$0xff]  }
 0x196   : > { %3287 = vmatpush1.bf16.msra.mxu0 %v7512_v35  ;;  %3389 = vmatpush1.bf16.msra.mxu1 %v7515_v37  ;;  %v7551_v35 = vld [vmem:[#allocation2 + $0x830] ss:$20 sps:$4 sm:$0xff]   ;;  %v8258_v37 = vld [vmem:[%s8096_s21 + $0x18] sm:$0xff] }
 0x197   : > { %3288 = vmatprep.subr.bf16.mxu0 %v7520_v38  ;;  %3390 = vmatprep.subr.bf16.mxu1 %v7523_v39  ;;  %v7552_v38 = vld [vmem:[#allocation2 + $0x998] ss:$20 sps:$4 sm:$0xff]  }
 0x198   : > { %v6665_v44 = vpop.f32.mrb[12].mxu0  ;;  %v6857_v48 = vpop.f32.mrb[12].mxu1  ;;  %v7553_v39 = vld [vmem:[#allocation2 + $0xad8] ss:$20 sps:$4 sm:$0xff]  }
 0x199   : > { %v6666_v25 = vpop.f32.mrb[13].mxu0  ;;  %v1480_v55 = vpop.f32.mrb[13].mxu1 }
 0x19a   : > { %v6667_v56 = vadd.f32 %v6666_v25, %v6665_v44  ;;  %v6668_v28 = vpop.f32.mrb[14].mxu0  ;;  %3289 = vmatpush1.bf16.msra.mxu0 %v7518_v40  ;;  %3391 = vmatpush1.bf16.msra.mxu1 %v7521_v41  ;;  %v6858_v59 = vpop.f32.mrb[14].mxu1  ;;  %v8262_v40 = vcombine.high %v8258_v37, %v8258_v37  ;;  %v7554_v41 = vld [vmem:[#allocation2 + $0x858] ss:$20 sps:$4 sm:$0xff]   ;;  %v7559_v25 = vld [vmem:[#allocation2 + $0xb28] ss:$20 sps:$4 sm:$0xff]  }
 0x19b   : > { %v6669_v53 = vpop.f32.mrb[15].mxu0  ;;  %v1483_v63 = vpop.f32.mrb[15].mxu1  ;;  %3290 = vmatprep.subr.bf16.mxu0 %v7526_v42  ;;  %3392 = vmatprep.subr.bf16.mxu1 %v7529_v52  ;;  %v7555_v42 = vld [vmem:[#allocation2 + $0x9c0] ss:$20 sps:$4 sm:$0xff]   ;;  %v3716_v52 = vshrl.u32 %v8181_v47, 16 }
 0x19c   : > { %v6670_v2 = vadd.f32 %v6669_v53, %v6668_v28  ;;  %v8240_v3 = vadd.f32 %v6667_v56, %v1480_v55  ;;  %v3724_v44 = vshrl.u32 %v8262_v40, 16  ;;  %v3721_v56 = vrot.slane %v3719_v49, 2  ;;  %v7563_v47 = vld [vmem:[#allocation2 + $0xb44] ss:$20 sps:$4 sm:$0xff]   ;;  %v7566_v53 = vld [vmem:[#allocation2 + $0xb4c] ss:$20 sps:$4 sm:$0xff]  }
 0x19d   : > { %v3718_v55 = vrot.slane %v3716_v52, 1 }
 0x19e   : > { %v8245_v9 = vadd.f32 %v6670_v2, %v1483_v63  ;;  %3291 = vmatpush1.bf16.msra.mxu0 %v7524_v50  ;;  %3393 = vmatpush1.bf16.msra.mxu1 %v7527_v51  ;;  %v7557_v50 = vld [vmem:[#allocation2 + $0x880] ss:$20 sps:$4 sm:$0xff]   ;;  %v7558_v51 = vld [vmem:[#allocation2 + $0x9e8] ss:$20 sps:$4 sm:$0xff]   ;;  %v3726_v28 = vrot.slane %v3724_v44, 1 }
 0x19f   : > { %3292 = vmatprep.subr.bf16.mxu0 %v7532_v62  ;;  %3394 = vmatprep.subr.bf16.mxu1 %v7535_v1  ;;  %v7561_v63 = vld [vmem:[#allocation2 + $0xb40] ss:$20 sps:$4 sm:$0xff]   ;;  %v7564_v62 = vld [vmem:[#allocation2 + $0xb48] ss:$20 sps:$4 sm:$0xff]   ;;  %v3722_v1 = vor.u32 %v3721_v56, %v3718_v55 }
 0x1a0   : > { %v6671_v14 = vpop.f32.mrb[16].mxu0 }
 0x1a1   : > { %v6672_v16 = vpop.f32.mrb[17].mxu0 }
 0x1a2   : > { %v6673_v18 = vadd.f32 %v6672_v16, %v6671_v14  ;;  %3293 = vmatpush1.bf16.msra.mxu0 %v7530_v6  ;;  %3395 = vmatpush1.bf16.msra.mxu1 %v7533_v43  ;;  %v6674_v20 = vpop.f32.mrb[18].mxu0  ;;  %v7569_v6 = vld [vmem:[#allocation2 + $0xb6c] ss:$20 sps:$4 sm:$0xff]   ;;  %v7578_v14 = vld [vmem:[#allocation2 + $0xb9c] ss:$20 sps:$4 sm:$0xff]  }
 0x1a3   : > { %6725 = vmatprep.subr.bf16.mxu0 %v7537_v11  ;;  %6879 = vmatprep.subr.bf16.mxu1 %v7538_v12  ;;  %v6675_v23 = vpop.f32.mrb[19].mxu0  ;;  %v7570_v11 = vld [vmem:[#allocation2 + $0xb70] ss:$20 sps:$4 sm:$0xff]  }
 0x1a4   : > { %v8250_v24 = vadd.f32 %v6857_v48, %v6673_v18  ;;  %v3727_v48 = vshll.u32 %v8262_v40, 16  ;;  %v7573_v16 = vld [vmem:[#allocation2 + $0xb90] ss:$20 sps:$4 sm:$0xff]   ;;  %v7579_v18 = vld [vmem:[#allocation2 + $0xbb8] ss:$20 sps:$4 sm:$0xff]  }
 0x1a5   : > { %3311 = vmatmul.mubr.bf16.vlgmr.msra.gmra.mrb[0].mxu0 %v2596_v19  ;;  %3413 = vmatmul.mubr.bf16.vlgmr.msra.gmra.mrb[0].mxu1 %v2596_v19  ;;  %v7587_v20 = vld [vmem:[#allocation2 + $0xbe4] ss:$20 sps:$4 sm:$0xff]   ;;  %v7593_v23 = vld [vmem:[#allocation2 + $0xc0c] ss:$20 sps:$4 sm:$0xff]  }
 0x1a6   : > { %6726 = vmatpush3.bf16.msra.mxu0 %v7539_v17  ;;  %6880 = vmatpush3.bf16.msra.mxu1 %v7538_v12  ;;  %v3729_v59 = vrot.slane %v3727_v48, 2  ;;  %v7575_v12 = vld [vmem:[#allocation2 + $0xb94] ss:$20 sps:$4 sm:$0xff]   ;;  %v7576_v17 = vld [vmem:[#allocation2 + $0xb98] ss:$20 sps:$4 sm:$0xff]  }
 0x1a7   : > { %6727 = vmatprep.subr.bf16.mxu0 %v7540_v21  ;;  %6881 = vmatprep.subr.bf16.mxu1 %v7541_v22  ;;  %v7585_v21 = vld [vmem:[#allocation2 + $0xbe0] ss:$20 sps:$4 sm:$0xff]  }
 0x1a8   : > { %3320 = vmatprep.mubr.bf16.mxu0 %v7984_v46  ;;  %3422 = vmatprep.mubr.bf16.mxu1 %v7984_v46  ;;  %v8268_v2 = vor.u32 %v3729_v59, %v3726_v28  ;;  %v7620_v28 = vld [vmem:[#allocation2 + $0xcb4] ss:$20 sps:$4 sm:$0xff]  }
 0x1aa   : > { %6728 = vmatpush3.bf16.msra.mxu0 %v7542_v26  ;;  %6882 = vmatpush3.bf16.msra.mxu1 %v7541_v22  ;;  %v8274_v43 = vsel %vm3697_vm2, %v3722_v1, %v8268_v2  ;;  %v7588_v22 = vld [vmem:[#allocation2 + $0xbe8] ss:$20 sps:$4 sm:$0xff]   ;;  %v7632_v1 = vld [vmem:[#allocation2 + $0xd04] ss:$20 sps:$4 sm:$0xff]  }
 0x1ab   : > { %6729 = vmatprep.subr.bf16.mxu0 %v7543_v27  ;;  %6883 = vmatprep.subr.bf16.mxu1 %v7544_v29  ;;  %v7596_v26 = vld [vmem:[#allocation2 + $0xc14] ss:$20 sps:$4 sm:$0xff]   ;;  %v7594_v27 = vld [vmem:[#allocation2 + $0xc10] ss:$20 sps:$4 sm:$0xff]  }
 0x1ad   : > { %3321 = vmatmul.mubr.bf16.gmra.mrb[40].mxu0 %v8243_v8  ;;  %3423 = vmatmul.mubr.bf16.gmra.mrb[32].mxu1 %v8243_v8 }
 0x1ae   : > { %6730 = vmatpush3.bf16.msra.mxu0 %v7545_v30  ;;  %6884 = vmatpush3.bf16.msra.mxu1 %v7544_v29  ;;  %v7599_v29 = vld [vmem:[#allocation2 + $0xc34] ss:$20 sps:$4 sm:$0xff]   ;;  %v7602_v30 = vld [vmem:[#allocation2 + $0xc3c] ss:$20 sps:$4 sm:$0xff]  }
 0x1af   : > { %6731 = vmatprep.subr.bf16.mxu0 %v7546_v31  ;;  %6885 = vmatprep.subr.bf16.mxu1 %v7547_v32  ;;  %v7597_v31 = vld [vmem:[#allocation2 + $0xc30] ss:$20 sps:$4 sm:$0xff]  }
 0x1b0   : > { %3463 = vmatprep.mubr.bf16.mxu0 %v8190_v61  ;;  %6895 = vmatprep.mubr.bf16.mxu1 %v2596_v19  ;;  %v7556_v61 = vld [vmem:[#allocation2 + $0xb00] ss:$20 sps:$4 sm:$0xff]  }
 0x1b1   : > { %v7582_v19 = vld [vmem:[#allocation2 + $0xbc0] ss:$20 sps:$4 sm:$0xff]  }
 0x1b2   : > { %6732 = vmatpush3.bf16.msra.mxu0 %v7548_v33  ;;  %6886 = vmatpush3.bf16.msra.mxu1 %v7547_v32  ;;  %v7600_v32 = vld [vmem:[#allocation2 + $0xc38] ss:$20 sps:$4 sm:$0xff]   ;;  %v7605_v33 = vld [vmem:[#allocation2 + $0xc5c] ss:$20 sps:$4 sm:$0xff]  }
 0x1b3   : > { %6733 = vmatprep.subr.bf16.mxu0 %v7549_v34  ;;  %6887 = vmatprep.subr.bf16.mxu1 %v7550_v4  ;;  %v7608_v34 = vld [vmem:[#allocation2 + $0xc64] ss:$20 sps:$4 sm:$0xff]  }
 0x1b6   : > { %6734 = vmatpush3.bf16.msra.mxu0 %v7551_v35  ;;  %6888 = vmatpush3.bf16.msra.mxu1 %v7550_v4  ;;  %v7603_v4 = vld [vmem:[#allocation2 + $0xc58] ss:$20 sps:$4 sm:$0xff]   ;;  %v7606_v35 = vld [vmem:[#allocation2 + $0xc60] ss:$20 sps:$4 sm:$0xff]  }
 0x1b7   : > { %6735 = vmatprep.subr.bf16.mxu0 %v7552_v38  ;;  %6889 = vmatprep.subr.bf16.mxu1 %v7553_v39  ;;  %v7611_v38 = vld [vmem:[#allocation2 + $0xc84] ss:$20 sps:$4 sm:$0xff]  }
 0x1ba   : > { %6736 = vmatpush3.bf16.msra.mxu0 %v7554_v41  ;;  %6890 = vmatpush3.bf16.msra.mxu1 %v7553_v39  ;;  %v7614_v39 = vld [vmem:[#allocation2 + $0xc8c] ss:$20 sps:$4 sm:$0xff]  }
 0x1bb   : > { %6737 = vmatprep.subr.bf16.mxu0 %v7555_v42  ;;  %6891 = vmatprep.subr.bf16.mxu1 %v7556_v61 }
 0x1be   : > { %6738 = vmatpush3.bf16.msra.mxu0 %v7557_v50  ;;  %6892 = vmatpush3.bf16.msra.mxu1 %v7556_v61 }
 0x1bf   : > { %6739 = vmatprep.subr.bf16.mxu0 %v7558_v51  ;;  %6893 = vmatprep.subr.bf16.mxu1 %v7559_v25  ;;  %v7609_v51 = vld [vmem:[#allocation2 + $0xc80] ss:$20 sps:$4 sm:$0xff]  }
 0x1c2   : > { %6740 = vmatpush3.bf16.msra.mxu0 %v7560_v60  ;;  %6894 = vmatpush3.bf16.msra.mxu1 %v7559_v25  ;;  %v7612_v25 = vld [vmem:[#allocation2 + $0xc88] ss:$20 sps:$4 sm:$0xff]  }
 0x1c3   : > { %4379 = vmatprep.subr.bf16.mxu0 %v7563_v47  ;;  %4481 = vmatprep.subr.bf16.mxu1 %v7566_v53  ;;  %v7615_v60 = vld [vmem:[#allocation2 + $0xca8] ss:$20 sps:$4 sm:$0xff]   ;;  %v7621_v53 = vld [vmem:[#allocation2 + $0xcd0] ss:$20 sps:$4 sm:$0xff]  }
 0x1c4   : > { %v7626_v47 = vld [vmem:[#allocation2 + $0xcdc] ss:$20 sps:$4 sm:$0xff]  }
 0x1c5   : > { %3464 = vmatmul.mubr.bf16.vlgmr.msra.gmra.mrb[44].mxu0 %v8226_v15  ;;  %6896 = vmatmul.mubr.bf16.vlgmr.msra.gmra.mrb[36].mxu1 %v8243_v8  ;;  %v7581_v15 = vld [vmem:[#allocation2 + $0xbbc] ss:$20 sps:$4 sm:$0xff]   ;;  %v7584_v8 = vld [vmem:[#allocation2 + $0xbc4] ss:$20 sps:$4 sm:$0xff]  }
 0x1c6   : > { %4380 = vmatpush1.bf16.msra.mxu0 %v7561_v63  ;;  %4482 = vmatpush1.bf16.msra.mxu1 %v7564_v62  ;;  %v7624_v63 = vld [vmem:[#allocation2 + $0xcd8] ss:$20 sps:$4 sm:$0xff]   ;;  %v7629_v62 = vld [vmem:[#allocation2 + $0xcfc] ss:$20 sps:$4 sm:$0xff]  }
 0x1c7   : > { %4381 = vmatprep.subr.bf16.mxu0 %v7569_v6  ;;  %4483 = vmatprep.subr.bf16.mxu1 %v7572_v7  ;;  %v7627_v6 = vld [vmem:[#allocation2 + $0xcf8] ss:$20 sps:$4 sm:$0xff]   ;;  %v7630_v7 = vld [vmem:[#allocation2 + $0xd00] ss:$20 sps:$4 sm:$0xff]  }
 0x1c8   : > { %3471 = vmatprep.mubr.bf16.mxu0 %v8185_v57  ;;  %4513 = vmatprep.mubr.bf16.mxu1 %v8274_v43  ;;  %v7590_v57 = vld [vmem:[#allocation2 + $0xbec] ss:$20 sps:$4 sm:$0xff]  }
 0x1ca   : > { %4382 = vmatpush1.bf16.msra.mxu0 %v7567_v58  ;;  %4484 = vmatpush1.bf16.msra.mxu1 %v7570_v11  ;;  %v7635_v58 = vld [vmem:[#allocation2 + $0xd24] ss:$20 sps:$4 sm:$0xff]   ;;  %v7638_v11 = vld [vmem:[#allocation2 + $0xd2c] ss:$20 sps:$4 sm:$0xff]  }
 0x1cb   : > { %4383 = vmatprep.subr.bf16.mxu0 %v7575_v12  ;;  %4485 = vmatprep.subr.bf16.mxu1 %v7578_v14  ;;  %v7633_v12 = vld [vmem:[#allocation2 + $0xd20] ss:$20 sps:$4 sm:$0xff]   ;;  %v7636_v14 = vld [vmem:[#allocation2 + $0xd28] ss:$20 sps:$4 sm:$0xff]  }
 0x1cd   : > { %3472 = vmatmul.mubr.bf16.gmra.mrb[48].mxu0 %v8210_v54  ;;  %v7591_v54 = vld [vmem:[#allocation2 + $0xc08] ss:$20 sps:$4 sm:$0xff]  }
 0x1ce   : > { %4384 = vmatpush1.bf16.msra.mxu0 %v7573_v16  ;;  %4486 = vmatpush1.bf16.msra.mxu1 %v7576_v17  ;;  %v8294_v16 = vcombine.low %v8258_v37, %v8258_v37  ;;  %v7641_v17 = vld [vmem:[#allocation2 + $0xd4c] ss:$20 sps:$4 sm:$0xff]   ;;  %v7647_v37 = vld [vmem:[#allocation2 + $0xd74] ss:$20 sps:$4 sm:$0xff]  }
 0x1cf   : > { %4385 = vmatprep.subr.bf16.mxu0 %v7581_v15  ;;  %4487 = vmatprep.subr.bf16.mxu1 %v7584_v8  ;;  %v7644_v15 = vld [vmem:[#allocation2 + $0xd54] ss:$20 sps:$4 sm:$0xff]  }
 0x1d0   : > { %4411 = vmatprep.mubr.bf16.mxu0 %v8274_v43  ;;  %v7639_v8 = vld [vmem:[#allocation2 + $0xd48] ss:$20 sps:$4 sm:$0xff]  }
 0x1d2   : > { %4386 = vmatpush1.bf16.msra.mxu0 %v7579_v18  ;;  %4488 = vmatpush1.bf16.msra.mxu1 %v7582_v19  ;;  %v7642_v18 = vld [vmem:[#allocation2 + $0xd50] ss:$20 sps:$4 sm:$0xff]   ;;  %v3699_v19 = vshrl.u32 %v8206_v0, 16 }
 0x1d3   : > { %4387 = vmatprep.subr.bf16.mxu0 %v7587_v20  ;;  %4489 = vmatprep.subr.bf16.mxu1 %v7590_v57  ;;  %v3702_v20 = vshll.u32 %v8206_v0, 16  ;;  %v3707_v57 = vshrl.u32 %v8294_v16, 16  ;;  %v7656_v0 = vld [vmem:[#allocation2 + $0xda4] ss:$20 sps:$4 sm:$0xff]  }
 0x1d6   : > { %4388 = vmatpush1.bf16.msra.mxu0 %v7585_v21  ;;  %4490 = vmatpush1.bf16.msra.mxu1 %v7588_v22  ;;  %v3710_v21 = vshll.u32 %v8294_v16, 16  ;;  %v7650_v22 = vld [vmem:[#allocation2 + $0xd7c] ss:$20 sps:$4 sm:$0xff]  }
 0x1d7   : > { %4389 = vmatprep.subr.bf16.mxu0 %v7593_v23  ;;  %4491 = vmatprep.subr.bf16.mxu1 %v7596_v26  ;;  %v7645_v23 = vld [vmem:[#allocation2 + $0xd70] ss:$20 sps:$4 sm:$0xff]   ;;  %v7648_v26 = vld [vmem:[#allocation2 + $0xd78] ss:$20 sps:$4 sm:$0xff]  }
 0x1da   : > { %4390 = vmatpush1.bf16.msra.mxu0 %v7591_v54  ;;  %4492 = vmatpush1.bf16.msra.mxu1 %v7594_v27  ;;  %v3701_v54 = vrot.slane %v3699_v19, 1  ;;  %v3704_v27 = vrot.slane %v3702_v20, 2  ;;  %v3736_v19 = vshll.u32 %v8238_v36, 16  ;;  %v7689_v20 = vld [vmem:[#allocation2 + $0xe88] ss:$20 sps:$4 sm:$0xff]  }
 0x1db   : > { %4391 = vmatprep.subr.bf16.mxu0 %v7599_v29  ;;  %4493 = vmatprep.subr.bf16.mxu1 %v7602_v30  ;;  %v3709_v29 = vrot.slane %v3707_v57, 1  ;;  %v3712_v30 = vrot.slane %v3710_v21, 2  ;;  %v7692_v57 = vld [vmem:[#allocation2 + $0xe90] ss:$20 sps:$4 sm:$0xff]  }
 0x1de   : > { %4392 = vmatpush1.bf16.msra.mxu0 %v7597_v31  ;;  %4494 = vmatpush1.bf16.msra.mxu1 %v7600_v32  ;;  %v7653_v31 = vld [vmem:[#allocation2 + $0xd9c] ss:$20 sps:$4 sm:$0xff]   ;;  %v7651_v32 = vld [vmem:[#allocation2 + $0xd98] ss:$20 sps:$4 sm:$0xff]  }
 0x1df   : > { %4393 = vmatprep.subr.bf16.mxu0 %v7605_v33  ;;  %4495 = vmatprep.subr.bf16.mxu1 %v7608_v34  ;;  %v7654_v33 = vld [vmem:[#allocation2 + $0xda0] ss:$20 sps:$4 sm:$0xff]   ;;  %v3705_v34 = vor.u32 %v3704_v27, %v3701_v54 }
 0x1e0   : > { %v2176_v41 = vpop.f32.mrb[20].mxu0  ;;  %v2278_v42 = vpop.f32.mrb[16].mxu1 }
 0x1e1   : > { %v8281_v61 = vadd.f32 %v2176_v41, %v8213_v45  ;;  %v8284_v52 = vadd.f32 %v2278_v42, %v8216_v10  ;;  %v2178_v49 = vpop.f32.mrb[21].mxu0  ;;  %v2280_v44 = vpop.f32.mrb[17].mxu1  ;;  %v7617_v45 = vld [vmem:[#allocation2 + $0xcac] ss:$20 sps:$4 sm:$0xff]  }
 0x1e2   : > { %v8287_v48 = vadd.f32 %v2178_v49, %v8219_v13  ;;  %v8290_v50 = vadd.f32 %v2280_v44, %v8222_v5  ;;  %4394 = vmatpush1.bf16.msra.mxu0 %v7603_v4  ;;  %4496 = vmatpush1.bf16.msra.mxu1 %v7606_v35  ;;  %v2180_v55 = vpop.f32.mrb[22].mxu0  ;;  %v2282_v56 = vpop.f32.mrb[18].mxu1  ;;  %v7618_v13 = vld [vmem:[#allocation2 + $0xcb0] ss:$20 sps:$4 sm:$0xff]   ;;  %v7623_v5 = vld [vmem:[#allocation2 + $0xcd4] ss:$20 sps:$4 sm:$0xff]   ;;  %v8300_v4 = vor.u32 %v3712_v30, %v3709_v29 }
 0x1e3   : > { %4395 = vmatprep.subr.bf16.mxu0 %v7611_v38  ;;  %4497 = vmatprep.subr.bf16.mxu1 %v7614_v39  ;;  %v2181_v10 = vpop.f32.mrb[23].mxu0  ;;  %v2283_v59 = vpop.f32.mrb[19].mxu1  ;;  %v7661_v35 = vld [vmem:[#allocation2 + $0xdc4] ss:$20 sps:$4 sm:$0xff]   ;;  %v7664_v38 = vld [vmem:[#allocation2 + $0xdcc] ss:$20 sps:$4 sm:$0xff]  }
 0x1e4   : > { %v7659_v56 = vld [vmem:[#allocation2 + $0xdc0] ss:$20 sps:$4 sm:$0xff]   ;;  %v7695_v30 = vld [vmem:[#allocation2 + $0xeb0] ss:$20 sps:$4 sm:$0xff]  }
 0x1e5   : > { %v7670_v59 = vld [vmem:[#allocation2 + $0xdf4] ss:$20 sps:$4 sm:$0xff]  }
 0x1e6   : > { %4396 = vmatpush1.bf16.msra.mxu0 %v7609_v51  ;;  %4498 = vmatpush1.bf16.msra.mxu1 %v7612_v25 }
 0x1e7   : > { %4397 = vmatprep.subr.bf16.mxu0 %v7617_v45  ;;  %4499 = vmatprep.subr.bf16.mxu1 %v7620_v28  ;;  %v7662_v45 = vld [vmem:[#allocation2 + $0xdc8] ss:$20 sps:$4 sm:$0xff]   ;;  %v8316_v28 = vsel %vm3697_vm2, %v3705_v34, %v8300_v4 }
 0x1ea   : > { %4398 = vmatpush1.bf16.msra.mxu0 %v7615_v60  ;;  %4500 = vmatpush1.bf16.msra.mxu1 %v7618_v13  ;;  %v7668_v13 = vld [vmem:[#allocation2 + $0xdf0] ss:$20 sps:$4 sm:$0xff]  }
 0x1eb   : > { %4399 = vmatprep.subr.bf16.mxu0 %v7623_v5  ;;  %4501 = vmatprep.subr.bf16.mxu1 %v7626_v47  ;;  %v7673_v5 = vld [vmem:[#allocation2 + $0xe14] ss:$20 sps:$4 sm:$0xff]   ;;  %v7676_v47 = vld [vmem:[#allocation2 + $0xe1c] ss:$20 sps:$4 sm:$0xff]  }
 0x1ee   : > { %4400 = vmatpush1.bf16.msra.mxu0 %v7621_v53  ;;  %4502 = vmatpush1.bf16.msra.mxu1 %v7624_v63  ;;  %v7671_v53 = vld [vmem:[#allocation2 + $0xe10] ss:$20 sps:$4 sm:$0xff]   ;;  %v7674_v63 = vld [vmem:[#allocation2 + $0xe18] ss:$20 sps:$4 sm:$0xff]  }
 0x1ef   : > { %4401 = vmatprep.subr.bf16.mxu0 %v7629_v62  ;;  %4503 = vmatprep.subr.bf16.mxu1 %v7632_v1  ;;  %v7679_v62 = vld [vmem:[#allocation2 + $0xe3c] ss:$20 sps:$4 sm:$0xff]   ;;  %v7682_v1 = vld [vmem:[#allocation2 + $0xe44] ss:$20 sps:$4 sm:$0xff]  }
 0x1f2   : > { %4402 = vmatpush1.bf16.msra.mxu0 %v7627_v6  ;;  %4504 = vmatpush1.bf16.msra.mxu1 %v7630_v7  ;;  %v7677_v6 = vld [vmem:[#allocation2 + $0xe38] ss:$20 sps:$4 sm:$0xff]   ;;  %v7680_v7 = vld [vmem:[#allocation2 + $0xe40] ss:$20 sps:$4 sm:$0xff]  }
 0x1f3   : > { %4403 = vmatprep.subr.bf16.mxu0 %v7635_v58  ;;  %4505 = vmatprep.subr.bf16.mxu1 %v7638_v11  ;;  %v7685_v58 = vld [vmem:[#allocation2 + $0xe64] ss:$20 sps:$4 sm:$0xff]   ;;  %v7688_v11 = vld [vmem:[#allocation2 + $0xe6c] ss:$20 sps:$4 sm:$0xff]  }
 0x1f6   : > { %4404 = vmatpush1.bf16.msra.mxu0 %v7633_v12  ;;  %4506 = vmatpush1.bf16.msra.mxu1 %v7636_v14  ;;  %v7683_v12 = vld [vmem:[#allocation2 + $0xe60] ss:$20 sps:$4 sm:$0xff]   ;;  %v7686_v14 = vld [vmem:[#allocation2 + $0xe68] ss:$20 sps:$4 sm:$0xff]  }
 0x1f7   : > { %4405 = vmatprep.subr.bf16.mxu0 %v7641_v17  ;;  %4507 = vmatprep.subr.bf16.mxu1 %v7644_v15  ;;  %v8327_v17 = vld [vmem:[%s8096_s21 + $0x20] ss:$0 sps:$4 sm:$0xff]  }
 0x1f8   : > { %v7691_v15 = vld [vmem:[#allocation2 + $0xe8c] ss:$20 sps:$4 sm:$0xff]   ;;  %v3741_v21 = vshrl.u32 %v8327_v17, 16 }
 0x1fa   : > { %4406 = vmatpush1.bf16.msra.mxu0 %v7639_v8  ;;  %4508 = vmatpush1.bf16.msra.mxu1 %v7642_v18  ;;  %v7694_v8 = vld [vmem:[#allocation2 + $0xe94] ss:$20 sps:$4 sm:$0xff]   ;;  %v3733_v18 = vshrl.u32 %v8238_v36, 16 }
 0x1fb   : > { %4407 = vmatprep.subr.bf16.mxu0 %v7647_v37  ;;  %4509 = vmatprep.subr.bf16.mxu1 %v7650_v22  ;;  %v3744_v37 = vshll.u32 %v8327_v17, 16  ;;  %v7697_v22 = vld [vmem:[#allocation2 + $0xeb4] ss:$20 sps:$4 sm:$0xff]  }
 0x1fe   : > { %4408 = vmatpush1.bf16.msra.mxu0 %v7645_v23  ;;  %4510 = vmatpush1.bf16.msra.mxu1 %v7648_v26  ;;  %v7700_v23 = vld [vmem:[#allocation2 + $0xebc] ss:$20 sps:$4 sm:$0xff]  }
 0x1ff   : > { %4409 = vmatprep.subr.bf16.mxu0 %v7653_v31  ;;  %4511 = vmatprep.subr.bf16.mxu1 %v7656_v0  ;;  %v3735_v31 = vrot.slane %v3733_v18, 1  ;;  %v3738_v0 = vrot.slane %v3736_v19, 2  ;;  %v7718_v18 = vld [vmem:[#allocation2 + $0xe48] ss:$20 sps:$4 sm:$0xff]  }
 0x200   : > { %v2227_v39 = vpop.f32.mrb[24].mxu0  ;;  %v2329_v41 = vpop.f32.mrb[20].mxu1  ;;  %v7719_v19 = vld [vmem:[#allocation2 + $0xbc8] ss:$20 sps:$4 sm:$0xff]  }
 0x201   : > { %v8303_v42 = vadd.f32 %v2227_v39, %v8281_v61  ;;  %v8306_v49 = vadd.f32 %v2329_v41, %v8284_v52  ;;  %v2229_v44 = vpop.f32.mrb[25].mxu0  ;;  %v2331_v51 = vpop.f32.mrb[21].mxu1  ;;  %v7667_v52 = vld [vmem:[#allocation2 + $0xdec] ss:$20 sps:$4 sm:$0xff]  }
 0x202   : > { %v8309_v25 = vadd.f32 %v2229_v44, %v8287_v48  ;;  %v8312_v55 = vadd.f32 %v2331_v51, %v8290_v50  ;;  %4410 = vmatpush1.bf16.msra.mxu0 %v7651_v32  ;;  %4512 = vmatpush1.bf16.msra.mxu1 %v7654_v33  ;;  %v2231_v61 = vpop.f32.mrb[26].mxu0  ;;  %v2333_v10 = vpop.f32.mrb[22].mxu1  ;;  %v7665_v50 = vld [vmem:[#allocation2 + $0xde8] ss:$20 sps:$4 sm:$0xff]   ;;  %v7698_v33 = vld [vmem:[#allocation2 + $0xeb8] ss:$20 sps:$4 sm:$0xff]  }
 0x203   : > { %4430 = vmatprep.subr.bf16.mxu0 %v7661_v35  ;;  %4532 = vmatprep.subr.bf16.mxu1 %v7664_v38  ;;  %v2232_v60 = vpop.f32.mrb[27].mxu0  ;;  %v2334_v48 = vpop.f32.mrb[23].mxu1  ;;  %v3743_v35 = vrot.slane %v3741_v21, 1  ;;  %v3746_v38 = vrot.slane %v3744_v37, 2  ;;  %v7703_v44 = vld [vmem:[#allocation2 + $0xedc] ss:$20 sps:$4 sm:$0xff]   ;;  %v3739_v61 = vor.u32 %v3738_v0, %v3735_v31 }
 0x204   : > { %v7706_v51 = vld [vmem:[#allocation2 + $0xee4] ss:$20 sps:$4 sm:$0xff]   ;;  %v7704_v60 = vld [vmem:[#allocation2 + $0xee0] ss:$20 sps:$4 sm:$0xff]   ;;  %v8355_v31 = vld [vmem:[%s8096_s21 + $0xc] sm:$0xff] }
 0x205   : > { %4412 = vmatmul.mubr.bf16.vlgmr.msra.gmra.mrb[0].mxu0 %v8316_v28  ;;  %4514 = vmatmul.mubr.bf16.vlgmr.msra.gmra.mrb[0].mxu1 %v8316_v28  ;;  %v8337_v48 = vor.u32 %v3746_v38, %v3743_v35  ;;  %v7722_v21 = vld [vmem:[#allocation2 + $0xbf0] ss:$20 sps:$4 sm:$0xff]   ;;  %v7723_v37 = vld [vmem:[#allocation2 + $0xd58] ss:$20 sps:$4 sm:$0xff]   ;;  %v8360_v35 = vrot.slane %v8262_v40, 2 }
 0x206   : > { %4431 = vmatpush1.bf16.msra.mxu0 %v7659_v56  ;;  %4533 = vmatpush1.bf16.msra.mxu1 %v7662_v45  ;;  %v7732_v38 = vld [vmem:[#allocation2 + $0xf00] ss:$20 sps:$4 sm:$0xff]   ;;  %v7738_v40 = vld [vmem:[#allocation2 + $0xf28] ss:$20 sps:$4 sm:$0xff]  }
 0x207   : > { %4432 = vmatprep.subr.bf16.mxu0 %v7667_v52  ;;  %4534 = vmatprep.subr.bf16.mxu1 %v7670_v59  ;;  %v7701_v59 = vld [vmem:[#allocation2 + $0xed8] ss:$20 sps:$4 sm:$0xff]  }
 0x208   : > { %4421 = vmatprep.mubr.bf16.mxu0 %v8268_v2  ;;  %4523 = vmatprep.mubr.bf16.mxu1 %v8268_v2 }
 0x20a   : > { %4433 = vmatpush1.bf16.msra.mxu0 %v7665_v50  ;;  %4535 = vmatpush1.bf16.msra.mxu1 %v7668_v13  ;;  %v7708_v50 = vld [vmem:[#allocation2 + $0xc90] ss:$20 sps:$4 sm:$0xff]  }
 0x20b   : > { %4434 = vmatprep.subr.bf16.mxu0 %v7673_v5  ;;  %4536 = vmatprep.subr.bf16.mxu1 %v7676_v47  ;;  %v7709_v13 = vld [vmem:[#allocation2 + $0xdd0] ss:$20 sps:$4 sm:$0xff]  }
 0x20d   : > { %4422 = vmatmul.mubr.bf16.gmra.mrb[52].mxu0 %v8300_v4  ;;  %4524 = vmatmul.mubr.bf16.gmra.mrb[40].mxu1 %v8300_v4 }
 0x20e   : > { %4435 = vmatpush1.bf16.msra.mxu0 %v7671_v53  ;;  %4537 = vmatpush1.bf16.msra.mxu1 %v7674_v63  ;;  %v3748_v63 = vsel %vm3697_vm2, %v3739_v61, %v8337_v48  ;;  %v7749_v61 = vld [vmem:[#allocation2 + $0xf5c] ss:$20 sps:$4 sm:$0xff]  }
 0x20f   : > { %4436 = vmatprep.subr.bf16.mxu0 %v7679_v62  ;;  %4538 = vmatprep.subr.bf16.mxu1 %v7682_v1  ;;  %v7710_v62 = vld [vmem:[#allocation2 + $0xb50] ss:$20 sps:$4 sm:$0xff]   ;;  %v7711_v1 = vld [vmem:[#allocation2 + $0xcb8] ss:$20 sps:$4 sm:$0xff]  }
 0x210   : > { %4462 = vmatprep.mubr.bf16.mxu0 %v7984_v46  ;;  %4564 = vmatprep.mubr.bf16.mxu1 %v7984_v46 }
 0x212   : > { %4437 = vmatpush1.bf16.msra.mxu0 %v7677_v6  ;;  %4539 = vmatpush1.bf16.msra.mxu1 %v7680_v7  ;;  %v7712_v6 = vld [vmem:[#allocation2 + $0xdf8] ss:$20 sps:$4 sm:$0xff]  }
 0x213   : > { %4438 = vmatprep.subr.bf16.mxu0 %v7685_v58  ;;  %4540 = vmatprep.subr.bf16.mxu1 %v7688_v11 }
 0x216   : > { %4439 = vmatpush1.bf16.msra.mxu0 %v7683_v12  ;;  %4541 = vmatpush1.bf16.msra.mxu1 %v7686_v14  ;;  %v7713_v12 = vld [vmem:[#allocation2 + $0xb78] ss:$20 sps:$4 sm:$0xff]   ;;  %v7714_v14 = vld [vmem:[#allocation2 + $0xce0] ss:$20 sps:$4 sm:$0xff]  }
 0x217   : > { %4440 = vmatprep.subr.bf16.mxu0 %v7691_v15  ;;  %4542 = vmatprep.subr.bf16.mxu1 %v7694_v8  ;;  %v7715_v15 = vld [vmem:[#allocation2 + $0xe20] ss:$20 sps:$4 sm:$0xff]  }
 0x218   : > { %v6703_v26 = vpop.f32.mrb[28].mxu0  ;;  %v6877_v54 = vpop.f32.mrb[24].mxu1  ;;  %v7716_v8 = vld [vmem:[#allocation2 + $0xba0] ss:$20 sps:$4 sm:$0xff]  }
 0x219   : > { %v6704_v27 = vpop.f32.mrb[29].mxu0  ;;  %v2418_v29 = vpop.f32.mrb[25].mxu1 }
 0x21a   : > { %v6705_v36 = vadd.f32 %v6704_v27, %v6703_v26  ;;  %v6706_v32 = vpop.f32.mrb[30].mxu0  ;;  %4441 = vmatpush1.bf16.msra.mxu0 %v7689_v20  ;;  %4543 = vmatpush1.bf16.msra.mxu1 %v7692_v57  ;;  %v6878_v34 = vpop.f32.mrb[26].mxu1  ;;  %v7720_v20 = vld [vmem:[#allocation2 + $0xd30] ss:$20 sps:$4 sm:$0xff]   ;;  %v7726_v26 = vld [vmem:[#allocation2 + $0xd80] ss:$20 sps:$4 sm:$0xff]  }
 0x21b   : > { %v6707_v39 = vpop.f32.mrb[31].mxu0  ;;  %4442 = vmatprep.subr.bf16.mxu0 %v7697_v22  ;;  %4544 = vmatprep.subr.bf16.mxu1 %v7700_v23  ;;  %v2421_v41 = vpop.f32.mrb[27].mxu1  ;;  %v7721_v57 = vld [vmem:[#allocation2 + $0xe70] ss:$20 sps:$4 sm:$0xff]   ;;  %v7724_v22 = vld [vmem:[#allocation2 + $0xe98] ss:$20 sps:$4 sm:$0xff]  }
 0x21c   : > { %v6708_v56 = vadd.f32 %v6707_v39, %v6706_v32  ;;  %v2371_v45 = vadd.f32 %v6705_v36, %v8240_v3  ;;  %v7725_v23 = vld [vmem:[#allocation2 + $0xc18] ss:$20 sps:$4 sm:$0xff]   ;;  %v8352_v27 = vld [vmem:[%s8096_s21] sm:$0xcc]  ;;  %v7731_v36 = vld [vmem:[#allocation2 + $0xc68] ss:$20 sps:$4 sm:$0xff]  }
 0x21d   : > { %v6507_v0 = vcombine.high %v8352_v27, %v8355_v31  ;;  %v7734_v32 = vld [vmem:[#allocation2 + $0xf04] ss:$20 sps:$4 sm:$0xff]   ;;  %v7735_v39 = vld [vmem:[#allocation2 + $0xf08] ss:$20 sps:$4 sm:$0xff]  }
 0x21e   : > { %v8334_v10 = vadd.f32 %v2418_v29, %v2371_v45  ;;  %4443 = vmatpush1.bf16.msra.mxu0 %v7695_v30  ;;  %4545 = vmatpush1.bf16.msra.mxu1 %v7698_v33  ;;  %v2374_v52 = vadd.f32 %v6708_v56, %v8245_v9  ;;  %v7729_v29 = vld [vmem:[#allocation2 + $0xda8] ss:$20 sps:$4 sm:$0xff]   ;;  %v7737_v33 = vld [vmem:[#allocation2 + $0xf0c] ss:$20 sps:$4 sm:$0xff]   ;;  %v7741_v56 = vld [vmem:[#allocation2 + $0xf30] ss:$20 sps:$4 sm:$0xff]  }
 0x21f   : > { %4444 = vmatprep.subr.bf16.mxu0 %v7703_v44  ;;  %4546 = vmatprep.subr.bf16.mxu1 %v7706_v51  ;;  %v7730_v30 = vld [vmem:[#allocation2 + $0xee8] ss:$20 sps:$4 sm:$0xff]   ;;  %v4853_v34 = vrot.slane %v6507_v0, 2  ;;  %v7789_v0 = vld [vmem:[#allocation2 + $0x1070] ss:$20 sps:$4 sm:$0xff]  }
 0x220   : > { %v8339_v5 = vadd.f32 %v2421_v41, %v2374_v52  ;;  %v6709_v47 = vpop.f32.mrb[32].mxu0  ;;  %v7740_v41 = vld [vmem:[#allocation2 + $0xf2c] ss:$20 sps:$4 sm:$0xff]   ;;  %v7743_v44 = vld [vmem:[#allocation2 + $0xf34] ss:$20 sps:$4 sm:$0xff]  }
 0x221   : > { %v6710_v53 = vpop.f32.mrb[33].mxu0  ;;  %v8366_v51 = vsel %vm4849_vm3, %v4853_v34, %v8360_v35  ;;  %v7746_v45 = vld [vmem:[#allocation2 + $0xf54] ss:$20 sps:$4 sm:$0xff]   ;;  %v7747_v52 = vld [vmem:[#allocation2 + $0xf58] ss:$20 sps:$4 sm:$0xff]  }
 0x222   : > { %v6711_v3 = vadd.f32 %v6710_v53, %v6709_v47  ;;  %4445 = vmatpush1.bf16.msra.mxu0 %v7701_v59  ;;  %4547 = vmatpush1.bf16.msra.mxu1 %v7704_v60  ;;  %v6712_v9 = vpop.f32.mrb[34].mxu0  ;;  %v7752_v59 = vld [vmem:[#allocation2 + $0xf7c] ss:$20 sps:$4 sm:$0xff]   ;;  %v7755_v60 = vld [vmem:[#allocation2 + $0xf84] ss:$20 sps:$4 sm:$0xff]  }
 0x223   : > { %6763 = vmatprep.subr.bf16.mxu0 %v7708_v50  ;;  %6899 = vmatprep.subr.bf16.mxu1 %v7709_v13  ;;  %v6713_v7 = vpop.f32.mrb[35].mxu0  ;;  %v7753_v50 = vld [vmem:[#allocation2 + $0xf80] ss:$20 sps:$4 sm:$0xff]   ;;  %v7759_v53 = vld [vmem:[#allocation2 + $0xfa8] ss:$20 sps:$4 sm:$0xff]  }
 0x224   : > { %v2379_v58 = vadd.f32 %v6711_v3, %v8250_v24  ;;  %v7717_v24 = vld [vmem:[#allocation2 + $0xd08] ss:$20 sps:$4 sm:$0xff]   ;;  %v7756_v47 = vld [vmem:[#allocation2 + $0xfa0] ss:$20 sps:$4 sm:$0xff]   ;;  %v7771_v7 = vld [vmem:[#allocation2 + $0xff8] ss:$20 sps:$4 sm:$0xff]  }
 0x225   : > { %4463 = vmatmul.mubr.bf16.vlgmr.msra.gmra.mrb[0].mxu0 %v3748_v63  ;;  %4565 = vmatmul.mubr.bf16.vlgmr.msra.gmra.mrb[0].mxu1 %v3748_v63  ;;  %v7764_v3 = vld [vmem:[#allocation2 + $0xfcc] ss:$20 sps:$4 sm:$0xff]   ;;  %v7770_v9 = vld [vmem:[#allocation2 + $0xff4] ss:$20 sps:$4 sm:$0xff]  }
 0x226   : > { %v8344_v11 = vadd.f32 %v6877_v54, %v2379_v58  ;;  %6764 = vmatpush3.bf16.msra.mxu0 %v7710_v62  ;;  %6900 = vmatpush3.bf16.msra.mxu1 %v7709_v13  ;;  %v7727_v54 = vld [vmem:[#allocation2 + $0xec0] ss:$20 sps:$4 sm:$0xff]   ;;  %v7758_v13 = vld [vmem:[#allocation2 + $0xfa4] ss:$20 sps:$4 sm:$0xff]   ;;  %v7776_v58 = vld [vmem:[#allocation2 + $0x101c] ss:$20 sps:$4 sm:$0xff]  }
 0x227   : > { %6765 = vmatprep.subr.bf16.mxu0 %v7711_v1  ;;  %6901 = vmatprep.subr.bf16.mxu1 %v7712_v6  ;;  %v7765_v62 = vld [vmem:[#allocation2 + $0xfd0] ss:$20 sps:$4 sm:$0xff]   ;;  %v7795_v34 = vld [vmem:[#allocation2 + $0x1098] ss:$20 sps:$4 sm:$0xff]  }
 0x228   : > { %4472 = vmatprep.mubr.bf16.mxu0 %v7984_v46  ;;  %4574 = vmatprep.mubr.bf16.mxu1 %v7984_v46  ;;  %v7773_v1 = vld [vmem:[#allocation2 + $0xffc] ss:$20 sps:$4 sm:$0xff]  }
 0x22a   : > { %6766 = vmatpush3.bf16.msra.mxu0 %v7713_v12  ;;  %6902 = vmatpush3.bf16.msra.mxu1 %v7712_v6  ;;  %v7768_v6 = vld [vmem:[#allocation2 + $0xff0] ss:$20 sps:$4 sm:$0xff]  }
 0x22b   : > { %6767 = vmatprep.subr.bf16.mxu0 %v7714_v14  ;;  %6903 = vmatprep.subr.bf16.mxu1 %v7715_v15  ;;  %v7779_v12 = vld [vmem:[#allocation2 + $0x1024] ss:$20 sps:$4 sm:$0xff]  }
 0x22c   : > { %v7774_v14 = vld [vmem:[#allocation2 + $0x1018] ss:$20 sps:$4 sm:$0xff]  }
 0x22d   : > { %4473 = vmatmul.mubr.bf16.gmra.mrb[56].mxu0 %v8337_v48  ;;  %4575 = vmatmul.mubr.bf16.gmra.mrb[44].mxu1 %v8337_v48 }
 0x22e   : > { %6768 = vmatpush3.bf16.msra.mxu0 %v7716_v8  ;;  %6904 = vmatpush3.bf16.msra.mxu1 %v7715_v15  ;;  %v7777_v15 = vld [vmem:[#allocation2 + $0x1020] ss:$20 sps:$4 sm:$0xff]   ;;  %v7782_v8 = vld [vmem:[#allocation2 + $0x1044] ss:$20 sps:$4 sm:$0xff]  }
 0x22f   : > { %6769 = vmatprep.subr.bf16.mxu0 %v7717_v24  ;;  %6905 = vmatprep.subr.bf16.mxu1 %v7718_v18  ;;  %v7785_v24 = vld [vmem:[#allocation2 + $0x104c] ss:$20 sps:$4 sm:$0xff]  }
 0x230   : > { %4615 = vmatprep.mubr.bf16.mxu0 %v8274_v43  ;;  %6915 = vmatprep.mubr.bf16.mxu1 %v3748_v63  ;;  %v7728_v43 = vld [vmem:[#allocation2 + $0xc40] ss:$20 sps:$4 sm:$0xff]  }
 0x231   : > { %v7767_v63 = vld [vmem:[#allocation2 + $0xfd4] ss:$20 sps:$4 sm:$0xff]  }
 0x232   : > { %6770 = vmatpush3.bf16.msra.mxu0 %v7719_v19  ;;  %6906 = vmatpush3.bf16.msra.mxu1 %v7718_v18 }
 0x233   : > { %6771 = vmatprep.subr.bf16.mxu0 %v7720_v20  ;;  %6907 = vmatprep.subr.bf16.mxu1 %v7721_v57 }
 0x236   : > { %6772 = vmatpush3.bf16.msra.mxu0 %v7722_v21  ;;  %6908 = vmatpush3.bf16.msra.mxu1 %v7721_v57  ;;  %v7780_v21 = vld [vmem:[#allocation2 + $0x1040] ss:$20 sps:$4 sm:$0xff]  }
 0x237   : > { %6773 = vmatprep.subr.bf16.mxu0 %v7723_v37  ;;  %6909 = vmatprep.subr.bf16.mxu1 %v7724_v22  ;;  %v7783_v37 = vld [vmem:[#allocation2 + $0x1048] ss:$20 sps:$4 sm:$0xff]  }
 0x23a   : > { %6774 = vmatpush3.bf16.msra.mxu0 %v7725_v23  ;;  %6910 = vmatpush3.bf16.msra.mxu1 %v7724_v22 }
 0x23b   : > { %6775 = vmatprep.subr.bf16.mxu0 %v7726_v26  ;;  %6911 = vmatprep.subr.bf16.mxu1 %v7727_v54  ;;  %v7788_v26 = vld [vmem:[#allocation2 + $0x106c] ss:$20 sps:$4 sm:$0xff]  }
 0x23e   : > { %6776 = vmatpush3.bf16.msra.mxu0 %v7728_v43  ;;  %6912 = vmatpush3.bf16.msra.mxu1 %v7727_v54  ;;  %v7791_v54 = vld [vmem:[#allocation2 + $0x1074] ss:$20 sps:$4 sm:$0xff]  }
 0x23f   : > { %6777 = vmatprep.subr.bf16.mxu0 %v7729_v29  ;;  %6913 = vmatprep.subr.bf16.mxu1 %v7730_v30 }
 0x242   : > { %6778 = vmatpush3.bf16.msra.mxu0 %v7731_v36  ;;  %6914 = vmatpush3.bf16.msra.mxu1 %v7730_v30  ;;  %v7786_v30 = vld [vmem:[#allocation2 + $0x1068] ss:$20 sps:$4 sm:$0xff]  }
 0x243   : > { %5489 = vmatprep.subr.bf16.mxu0 %v7734_v32  ;;  %5591 = vmatprep.subr.bf16.mxu1 %v7737_v33  ;;  %v7794_v36 = vld [vmem:[#allocation2 + $0x1094] ss:$20 sps:$4 sm:$0xff]   ;;  %v7797_v32 = vld [vmem:[#allocation2 + $0x109c] ss:$20 sps:$4 sm:$0xff]  }
 0x244   : > { %v7792_v33 = vld [vmem:[#allocation2 + $0x1090] ss:$20 sps:$4 sm:$0xff]  }
 0x245   : > { %4616 = vmatmul.mubr.bf16.vlgmr.msra.gmra.mrb[60].mxu0 %v8316_v28  ;;  %6916 = vmatmul.mubr.bf16.vlgmr.msra.gmra.mrb[48].mxu1 %v8337_v48  ;;  %v7744_v28 = vld [vmem:[#allocation2 + $0xf50] ss:$20 sps:$4 sm:$0xff]   ;;  %v7750_v48 = vld [vmem:[#allocation2 + $0xf78] ss:$20 sps:$4 sm:$0xff]  }
 0x246   : > { %5490 = vmatpush1.bf16.msra.mxu0 %v7732_v38  ;;  %5592 = vmatpush1.bf16.msra.mxu1 %v7735_v39  ;;  %v7800_v38 = vld [vmem:[#allocation2 + $0x10bc] ss:$20 sps:$4 sm:$0xff]   ;;  %v7803_v39 = vld [vmem:[#allocation2 + $0x10c4] ss:$20 sps:$4 sm:$0xff]  }
 0x247   : > { %5491 = vmatprep.subr.bf16.mxu0 %v7740_v41  ;;  %5593 = vmatprep.subr.bf16.mxu1 %v7743_v44  ;;  %v7798_v41 = vld [vmem:[#allocation2 + $0x10b8] ss:$20 sps:$4 sm:$0xff]   ;;  %v7801_v44 = vld [vmem:[#allocation2 + $0x10c0] ss:$20 sps:$4 sm:$0xff]  }
 0x248   : > { %4623 = vmatprep.mubr.bf16.mxu0 %v8268_v2  ;;  %5623 = vmatprep.mubr.bf16.mxu1 %v8366_v51  ;;  %v7761_v2 = vld [vmem:[#allocation2 + $0xfac] ss:$20 sps:$4 sm:$0xff]  }
 0x24a   : > { %5492 = vmatpush1.bf16.msra.mxu0 %v7738_v40  ;;  %5594 = vmatpush1.bf16.msra.mxu1 %v7741_v56  ;;  %v7806_v40 = vld [vmem:[#allocation2 + $0x10e4] ss:$20 sps:$4 sm:$0xff]   ;;  %v7809_v56 = vld [vmem:[#allocation2 + $0x10ec] ss:$20 sps:$4 sm:$0xff]  }
 0x24b   : > { %5493 = vmatprep.subr.bf16.mxu0 %v7746_v45  ;;  %5595 = vmatprep.subr.bf16.mxu1 %v7749_v61  ;;  %v7804_v45 = vld [vmem:[#allocation2 + $0x10e0] ss:$20 sps:$4 sm:$0xff]   ;;  %v7807_v61 = vld [vmem:[#allocation2 + $0x10e8] ss:$20 sps:$4 sm:$0xff]  }
 0x24d   : > { %4624 = vmatmul.mubr.bf16.gmra.mrb[64].mxu0 %v8300_v4  ;;  %v7762_v4 = vld [vmem:[#allocation2 + $0xfc8] ss:$20 sps:$4 sm:$0xff]  }
 0x24e   : > { %5494 = vmatpush1.bf16.msra.mxu0 %v7744_v28  ;;  %5596 = vmatpush1.bf16.msra.mxu1 %v7747_v52  ;;  %v7812_v28 = vld [vmem:[#allocation2 + $0x110c] ss:$20 sps:$4 sm:$0xff]   ;;  %v7815_v52 = vld [vmem:[#allocation2 + $0x1114] ss:$20 sps:$4 sm:$0xff]  }
 0x24f   : > { %5495 = vmatprep.subr.bf16.mxu0 %v7752_v59  ;;  %5597 = vmatprep.subr.bf16.mxu1 %v7755_v60  ;;  %v7810_v59 = vld [vmem:[#allocation2 + $0x1108] ss:$20 sps:$4 sm:$0xff]   ;;  %v7813_v60 = vld [vmem:[#allocation2 + $0x1110] ss:$20 sps:$4 sm:$0xff]  }
 0x250   : > { %5521 = vmatprep.mubr.bf16.mxu0 %v8366_v51 }
 0x252   : > { %5496 = vmatpush1.bf16.msra.mxu0 %v7750_v48  ;;  %5598 = vmatpush1.bf16.msra.mxu1 %v7753_v50  ;;  %v7818_v48 = vld [vmem:[#allocation2 + $0x1134] ss:$20 sps:$4 sm:$0xff]   ;;  %v7821_v50 = vld [vmem:[#allocation2 + $0x113c] ss:$20 sps:$4 sm:$0xff]  }
 0x253   : > { %5497 = vmatprep.subr.bf16.mxu0 %v7758_v13  ;;  %5599 = vmatprep.subr.bf16.mxu1 %v7761_v2  ;;  %v7816_v13 = vld [vmem:[#allocation2 + $0x1130] ss:$20 sps:$4 sm:$0xff]   ;;  %v7819_v2 = vld [vmem:[#allocation2 + $0x1138] ss:$20 sps:$4 sm:$0xff]  }
 0x256   : > { %5498 = vmatpush1.bf16.msra.mxu0 %v7756_v47  ;;  %5600 = vmatpush1.bf16.msra.mxu1 %v7759_v53  ;;  %v6506_v47 = vcombine.low %v8352_v27, %v8355_v31  ;;  %v7824_v53 = vld [vmem:[#allocation2 + $0x115c] ss:$20 sps:$4 sm:$0xff]  }
 0x257   : > { %5499 = vmatprep.subr.bf16.mxu0 %v7764_v3  ;;  %5601 = vmatprep.subr.bf16.mxu1 %v7767_v63  ;;  %v7827_v3 = vld [vmem:[#allocation2 + $0x1164] ss:$20 sps:$4 sm:$0xff]  }
 0x258   : > { %v7822_v63 = vld [vmem:[#allocation2 + $0x1158] ss:$20 sps:$4 sm:$0xff]  }
 0x25a   : > { %5500 = vmatpush1.bf16.msra.mxu0 %v7762_v4  ;;  %5602 = vmatpush1.bf16.msra.mxu1 %v7765_v62  ;;  %v7825_v4 = vld [vmem:[#allocation2 + $0x1160] ss:$20 sps:$4 sm:$0xff]   ;;  %v4850_v62 = vrot.slane %v6506_v47, 2 }
 0x25b   : > { %5501 = vmatprep.subr.bf16.mxu0 %v7770_v9  ;;  %5603 = vmatprep.subr.bf16.mxu1 %v7773_v1  ;;  %v8383_v9 = vrot.slane %v8294_v16, 2  ;;  %v7832_v1 = vld [vmem:[#allocation2 + $0x1184] ss:$20 sps:$4 sm:$0xff]   ;;  %v7830_v16 = vld [vmem:[#allocation2 + $0x1180] ss:$20 sps:$4 sm:$0xff]  }
 0x25e   : > { %5502 = vmatpush1.bf16.msra.mxu0 %v7768_v6  ;;  %5604 = vmatpush1.bf16.msra.mxu1 %v7771_v7  ;;  %v7835_v6 = vld [vmem:[#allocation2 + $0x118c] ss:$20 sps:$4 sm:$0xff]  }
 0x25f   : > { %5503 = vmatprep.subr.bf16.mxu0 %v7776_v58  ;;  %5605 = vmatprep.subr.bf16.mxu1 %v7779_v12 }
 0x260   : > { %v8372_v18 = vpop.f32.mrb[36].mxu0  ;;  %v8374_v19 = vpop.f32.mrb[28].mxu1 }
 0x261   : > { %v8376_v20 = vpop.f32.mrb[37].mxu0  ;;  %v8378_v57 = vpop.f32.mrb[29].mxu1 }
 0x262   : > { %5504 = vmatpush1.bf16.msra.mxu0 %v7774_v14  ;;  %5606 = vmatpush1.bf16.msra.mxu1 %v7777_v15  ;;  %v3275_v22 = vpop.f32.mrb[38].mxu0  ;;  %v3377_v23 = vpop.f32.mrb[30].mxu1 }
 0x263   : > { %5505 = vmatprep.subr.bf16.mxu0 %v7782_v8  ;;  %5607 = vmatprep.subr.bf16.mxu1 %v7785_v24  ;;  %v3276_v43 = vpop.f32.mrb[39].mxu0  ;;  %v3378_v29 = vpop.f32.mrb[31].mxu1  ;;  %v7833_v24 = vld [vmem:[#allocation2 + $0x1188] ss:$20 sps:$4 sm:$0xff]  }
 0x264   : > { %v7844_v29 = vld [vmem:[#allocation2 + $0x11d4] ss:$20 sps:$4 sm:$0xff]  }
 0x266   : > { %5506 = vmatpush1.bf16.msra.mxu0 %v7780_v21  ;;  %5608 = vmatpush1.bf16.msra.mxu1 %v7783_v37  ;;  %v8391_v21 = vsel %vm4849_vm3, %v4850_v62, %v8383_v9 }
 0x267   : > { %5507 = vmatprep.subr.bf16.mxu0 %v7788_v26  ;;  %5609 = vmatprep.subr.bf16.mxu1 %v7791_v54 }
 0x26a   : > { %5508 = vmatpush1.bf16.msra.mxu0 %v7786_v30  ;;  %5610 = vmatpush1.bf16.msra.mxu1 %v7789_v0  ;;  %v7847_v30 = vld [vmem:[#allocation2 + $0x11dc] ss:$20 sps:$4 sm:$0xff]  }
 0x26b   : > { %5509 = vmatprep.subr.bf16.mxu0 %v7794_v36  ;;  %5611 = vmatprep.subr.bf16.mxu1 %v7797_v32  ;;  %v7850_v0 = vld [vmem:[#allocation2 + $0x11fc] ss:$20 sps:$4 sm:$0xff]   ;;  %v7853_v36 = vld [vmem:[#allocation2 + $0x1204] ss:$20 sps:$4 sm:$0xff]  }
 0x26c   : > { %v7848_v32 = vld [vmem:[#allocation2 + $0x11f8] ss:$20 sps:$4 sm:$0xff]  }
 0x26e   : > { %5510 = vmatpush1.bf16.msra.mxu0 %v7792_v33  ;;  %5612 = vmatpush1.bf16.msra.mxu1 %v7795_v34  ;;  %v7851_v33 = vld [vmem:[#allocation2 + $0x1200] ss:$20 sps:$4 sm:$0xff]   ;;  %v7856_v34 = vld [vmem:[#allocation2 + $0x1224] ss:$20 sps:$4 sm:$0xff]  }
 0x26f   : > { %5511 = vmatprep.subr.bf16.mxu0 %v7800_v38  ;;  %5613 = vmatprep.subr.bf16.mxu1 %v7803_v39  ;;  %v7859_v38 = vld [vmem:[#allocation2 + $0x122c] ss:$20 sps:$4 sm:$0xff]  }
 0x270   : > { %v7854_v39 = vld [vmem:[#allocation2 + $0x1220] ss:$20 sps:$4 sm:$0xff]  }
 0x272   : > { %5512 = vmatpush1.bf16.msra.mxu0 %v7798_v41  ;;  %5614 = vmatpush1.bf16.msra.mxu1 %v7801_v44  ;;  %v7857_v41 = vld [vmem:[#allocation2 + $0x1228] ss:$20 sps:$4 sm:$0xff]   ;;  %v7862_v44 = vld [vmem:[#allocation2 + $0x124c] ss:$20 sps:$4 sm:$0xff]  }
 0x273   : > { %5513 = vmatprep.subr.bf16.mxu0 %v7806_v40  ;;  %5615 = vmatprep.subr.bf16.mxu1 %v7809_v56  ;;  %v7865_v40 = vld [vmem:[#allocation2 + $0x1254] ss:$20 sps:$4 sm:$0xff]  }
 0x274   : > { %v7860_v56 = vld [vmem:[#allocation2 + $0x1248] ss:$20 sps:$4 sm:$0xff]  }
 0x276   : > { %5514 = vmatpush1.bf16.msra.mxu0 %v7804_v45  ;;  %5616 = vmatpush1.bf16.msra.mxu1 %v7807_v61  ;;  %v7863_v45 = vld [vmem:[#allocation2 + $0x1250] ss:$20 sps:$4 sm:$0xff]   ;;  %v7868_v61 = vld [vmem:[#allocation2 + $0x1274] ss:$20 sps:$4 sm:$0xff]  }
 0x277   : > { %5515 = vmatprep.subr.bf16.mxu0 %v7812_v28  ;;  %5617 = vmatprep.subr.bf16.mxu1 %v7815_v52  ;;  %v7871_v28 = vld [vmem:[#allocation2 + $0x127c] ss:$20 sps:$4 sm:$0xff]   ;;  %v4695_v52 = vld [vmem:[%s8096_s21 + $0x8] sm:$0xc] }
 0x27a   : > { %5516 = vmatpush1.bf16.msra.mxu0 %v7810_v59  ;;  %5618 = vmatpush1.bf16.msra.mxu1 %v7813_v60 }
 0x27b   : > { %5517 = vmatprep.subr.bf16.mxu0 %v7818_v48  ;;  %5619 = vmatprep.subr.bf16.mxu1 %v7821_v50 }
 0x27e   : > { %5518 = vmatpush1.bf16.msra.mxu0 %v7816_v13  ;;  %5620 = vmatpush1.bf16.msra.mxu1 %v7819_v2 }
 0x27f   : > { %5519 = vmatprep.subr.bf16.mxu0 %v7824_v53  ;;  %5621 = vmatprep.subr.bf16.mxu1 %v7827_v3  ;;  %v7866_v53 = vld [vmem:[#allocation2 + $0x1270] ss:$20 sps:$4 sm:$0xff]   ;;  %v7869_v3 = vld [vmem:[#allocation2 + $0x1278] ss:$20 sps:$4 sm:$0xff]  }
 0x280   : > { %v3322_v7 = vpop.f32.mrb[40].mxu0  ;;  %v3424_v58 = vpop.f32.mrb[32].mxu1 }
 0x281   : > { %v3323_v27 = vadd.f32 %v3322_v7, %v8372_v18  ;;  %v3425_v31 = vadd.f32 %v3424_v58, %v8374_v19  ;;  %v3324_v12 = vpop.f32.mrb[41].mxu0  ;;  %v3426_v14 = vpop.f32.mrb[33].mxu1  ;;  %v7877_v7 = vld [vmem:[#allocation2 + $0x12a4] ss:$20 sps:$4 sm:$0xff]  }
 0x282   : > { %v3325_v15 = vadd.f32 %v3324_v12, %v8376_v20  ;;  %v3427_v8 = vadd.f32 %v3426_v14, %v8378_v57  ;;  %5520 = vmatpush1.bf16.msra.mxu0 %v7822_v63  ;;  %5622 = vmatpush1.bf16.msra.mxu1 %v7825_v4  ;;  %v3326_v37 = vpop.f32.mrb[42].mxu0  ;;  %v3428_v22 = vpop.f32.mrb[34].mxu1  ;;  %v7838_v20 = vld [vmem:[#allocation2 + $0x11ac] ss:$20 sps:$4 sm:$0xff]   ;;  %v7841_v57 = vld [vmem:[#allocation2 + $0x11b4] ss:$20 sps:$4 sm:$0xff]  }
 0x283   : > { %v8394_v18 = vadd.f32 %v3323_v27, %v8303_v42  ;;  %v8397_v19 = vadd.f32 %v3425_v31, %v8306_v49  ;;  %5540 = vmatprep.subr.bf16.mxu0 %v7832_v1  ;;  %5642 = vmatprep.subr.bf16.mxu1 %v7835_v6  ;;  %v3327_v23 = vpop.f32.mrb[43].mxu0  ;;  %v3429_v26 = vpop.f32.mrb[35].mxu1  ;;  %v7836_v42 = vld [vmem:[#allocation2 + $0x11a8] ss:$20 sps:$4 sm:$0xff]   ;;  %v7839_v49 = vld [vmem:[#allocation2 + $0x11b0] ss:$20 sps:$4 sm:$0xff]  }
 0x284   : > { %v8400_v54 = vadd.f32 %v3325_v15, %v8309_v25  ;;  %v8403_v43 = vadd.f32 %v3427_v8, %v8312_v55  ;;  %v7842_v25 = vld [vmem:[#allocation2 + $0x11d0] ss:$20 sps:$4 sm:$0xff]   ;;  %v7845_v55 = vld [vmem:[#allocation2 + $0x11d8] ss:$20 sps:$4 sm:$0xff]   ;;  %v7907_v63 = vld [vmem:[%s8096_s21 + $0x14] sm:$0xf] }
 0x285   : > { %5522 = vmatmul.mubr.bf16.vlgmr.msra.gmra.mrb[0].mxu0 %v8391_v21  ;;  %5624 = vmatmul.mubr.bf16.vlgmr.msra.gmra.mrb[0].mxu1 %v8391_v21  ;;  %v6508_v4 = vcombine.low %v4695_v52, %v7907_v63  ;;  %v7874_v6 = vld [vmem:[#allocation2 + $0x129c] ss:$20 sps:$4 sm:$0xff]   ;;  %v7872_v14 = vld [vmem:[#allocation2 + $0x1298] ss:$20 sps:$4 sm:$0xff]   ;;  %v7875_v15 = vld [vmem:[#allocation2 + $0x12a0] ss:$20 sps:$4 sm:$0xff]  }
 0x286   : > { %5541 = vmatpush1.bf16.msra.mxu0 %v7830_v16  ;;  %5643 = vmatpush1.bf16.msra.mxu1 %v7833_v24  ;;  %v8419_v16 = vrot.slane %v8327_v17, 2  ;;  %v7879_v24 = vld [vmem:[#allocation2 + $0x1050] ss:$20 sps:$4 sm:$0xff]   ;;  %v7882_v17 = vld [vmem:[#allocation2 + $0x1078] ss:$20 sps:$4 sm:$0xff]  }
 0x287   : > { %5542 = vmatprep.subr.bf16.mxu0 %v7838_v20  ;;  %5644 = vmatprep.subr.bf16.mxu1 %v7841_v57  ;;  %v4856_v8 = vrot.slane %v6508_v4, 2  ;;  %v7881_v37 = vld [vmem:[#allocation2 + $0x1190] ss:$20 sps:$4 sm:$0xff]  }
 0x288   : > { %5531 = vmatprep.mubr.bf16.mxu0 %v8360_v35  ;;  %5633 = vmatprep.mubr.bf16.mxu1 %v8360_v35  ;;  %v7880_v26 = vld [vmem:[#allocation2 + $0xf10] ss:$20 sps:$4 sm:$0xff]  }
 0x289   : > { %v4858_v23 = vsel %vm4849_vm3, %v4856_v8, %v8419_v16 }
 0x28a   : > { %5543 = vmatpush1.bf16.msra.mxu0 %v7836_v42  ;;  %5645 = vmatpush1.bf16.msra.mxu1 %v7839_v49  ;;  %v7884_v49 = vld [vmem:[#allocation2 + $0x11b8] ss:$20 sps:$4 sm:$0xff]  }
 0x28b   : > { %5544 = vmatprep.subr.bf16.mxu0 %v7844_v29  ;;  %5646 = vmatprep.subr.bf16.mxu1 %v7847_v30 }
 0x28d   : > { %5532 = vmatmul.mubr.bf16.gmra.mrb[68].mxu0 %v8383_v9  ;;  %5634 = vmatmul.mubr.bf16.gmra.mrb[52].mxu1 %v8383_v9 }
 0x28e   : > { %5545 = vmatpush1.bf16.msra.mxu0 %v7842_v25  ;;  %5647 = vmatpush1.bf16.msra.mxu1 %v7845_v55  ;;  %v7883_v25 = vld [vmem:[#allocation2 + $0xf38] ss:$20 sps:$4 sm:$0xff]   ;;  %v7885_v55 = vld [vmem:[#allocation2 + $0x10a0] ss:$20 sps:$4 sm:$0xff]  }
 0x28f   : > { %5546 = vmatprep.subr.bf16.mxu0 %v7850_v0  ;;  %5648 = vmatprep.subr.bf16.mxu1 %v7853_v36  ;;  %v7887_v0 = vld [vmem:[#allocation2 + $0x11e0] ss:$20 sps:$4 sm:$0xff]  }
 0x290   : > { %5572 = vmatprep.mubr.bf16.mxu0 %v7984_v46  ;;  %5674 = vmatprep.mubr.bf16.mxu1 %v7984_v46  ;;  %v7886_v36 = vld [vmem:[#allocation2 + $0xf60] ss:$20 sps:$4 sm:$0xff]  }
 0x292   : > { %5547 = vmatpush1.bf16.msra.mxu0 %v7848_v32  ;;  %5649 = vmatpush1.bf16.msra.mxu1 %v7851_v33  ;;  %v7888_v32 = vld [vmem:[#allocation2 + $0x10c8] ss:$20 sps:$4 sm:$0xff]  }
 0x293   : > { %5548 = vmatprep.subr.bf16.mxu0 %v7856_v34  ;;  %5650 = vmatprep.subr.bf16.mxu1 %v7859_v38  ;;  %v7890_v33 = vld [vmem:[#allocation2 + $0x1208] ss:$20 sps:$4 sm:$0xff]   ;;  %v7891_v34 = vld [vmem:[#allocation2 + $0x10f0] ss:$20 sps:$4 sm:$0xff]  }
 0x294   : > { %v7893_v38 = vld [vmem:[#allocation2 + $0x1230] ss:$20 sps:$4 sm:$0xff]  }
 0x296   : > { %5549 = vmatpush1.bf16.msra.mxu0 %v7854_v39  ;;  %5651 = vmatpush1.bf16.msra.mxu1 %v7857_v41  ;;  %v7894_v39 = vld [vmem:[#allocation2 + $0x1118] ss:$20 sps:$4 sm:$0xff]  }
 0x297   : > { %5550 = vmatprep.subr.bf16.mxu0 %v7862_v44  ;;  %5652 = vmatprep.subr.bf16.mxu1 %v7865_v40  ;;  %v7896_v41 = vld [vmem:[#allocation2 + $0x1258] ss:$20 sps:$4 sm:$0xff]   ;;  %v7897_v40 = vld [vmem:[#allocation2 + $0x1140] ss:$20 sps:$4 sm:$0xff]  }
 0x298   : > { %v6741_v59 = vpop.f32.mrb[44].mxu0  ;;  %v6897_v60 = vpop.f32.mrb[36].mxu1  ;;  %v7895_v44 = vld [vmem:[#allocation2 + $0xfd8] ss:$20 sps:$4 sm:$0xff]  }
 0x299   : > { %v6742_v48 = vpop.f32.mrb[45].mxu0  ;;  %v3513_v50 = vpop.f32.mrb[37].mxu1 }
 0x29a   : > { %v6743_v13 = vadd.f32 %v6742_v48, %v6741_v59  ;;  %v6744_v2 = vpop.f32.mrb[46].mxu0  ;;  %5551 = vmatpush1.bf16.msra.mxu0 %v7860_v56  ;;  %5653 = vmatpush1.bf16.msra.mxu1 %v7863_v45  ;;  %v6898_v47 = vpop.f32.mrb[38].mxu1  ;;  %v7899_v56 = vld [vmem:[#allocation2 + $0x1280] ss:$20 sps:$4 sm:$0xff]  }
 0x29b   : > { %v6745_v62 = vpop.f32.mrb[47].mxu0  ;;  %v3516_v1 = vpop.f32.mrb[39].mxu1  ;;  %5552 = vmatprep.subr.bf16.mxu0 %v7868_v61  ;;  %5654 = vmatprep.subr.bf16.mxu1 %v7871_v28  ;;  %v7898_v45 = vld [vmem:[#allocation2 + $0x1000] ss:$20 sps:$4 sm:$0xff]   ;;  %v7902_v61 = vld [vmem:[#allocation2 + $0x12a8] ss:$20 sps:$4 sm:$0xff]  }
 0x29c   : > { %v6746_v58 = vadd.f32 %v6745_v62, %v6744_v2  ;;  %v3514_v27 = vadd.f32 %v6743_v13, %v3513_v50  ;;  %v7901_v28 = vld [vmem:[#allocation2 + $0x1028] ss:$20 sps:$4 sm:$0xff]  }
 0x29e   : > { %v8416_v31 = vadd.f32 %v3514_v27, %v8334_v10  ;;  %v3517_v12 = vadd.f32 %v6746_v58, %v3516_v1  ;;  %5553 = vmatpush1.bf16.msra.mxu0 %v7866_v53  ;;  %5655 = vmatpush1.bf16.msra.mxu1 %v7869_v3 }
 0x29f   : > { %5554 = vmatprep.subr.bf16.mxu0 %v7874_v6  ;;  %5656 = vmatprep.subr.bf16.mxu1 %v7877_v7 }
 0x2a0   : > { %v8422_v22 = vadd.f32 %v3517_v12, %v8339_v5  ;;  %v6747_v20 = vpop.f32.mrb[48].mxu0 }
 0x2a1   : > { %v6748_v57 = vpop.f32.mrb[49].mxu0 }
 0x2a2   : > { %v6749_v10 = vadd.f32 %v6748_v57, %v6747_v20  ;;  %5555 = vmatpush1.bf16.msra.mxu0 %v7872_v14  ;;  %5657 = vmatpush1.bf16.msra.mxu1 %v7875_v15  ;;  %v6750_v42 = vpop.f32.mrb[50].mxu0 }
 0x2a3   : > { %6801 = vmatprep.subr.bf16.mxu0 %v7879_v24  ;;  %6919 = vmatprep.subr.bf16.mxu1 %v7881_v37  ;;  %v6751_v29 = vpop.f32.mrb[51].mxu0 }
 0x2a4   : > { %v3522_v30 = vadd.f32 %v6897_v60, %v6749_v10 }
 0x2a5   : > { %5573 = vmatmul.mubr.bf16.vlgmr.msra.gmra.mrb[0].mxu0 %v4858_v23  ;;  %5675 = vmatmul.mubr.bf16.vlgmr.msra.gmra.mrb[0].mxu1 %v4858_v23 }
 0x2a6   : > { %v8427_v5 = vadd.f32 %v3522_v30, %v8344_v11  ;;  %6802 = vmatpush3.bf16.msra.mxu0 %v7880_v26  ;;  %6920 = vmatpush3.bf16.msra.mxu1 %v7881_v37  ;;  %v7889_v11 = vld [vmem:[#allocation2 + $0xf88] ss:$20 sps:$4 sm:$0xff]  }
 0x2a7   : > { %6803 = vmatprep.subr.bf16.mxu0 %v7882_v17  ;;  %6921 = vmatprep.subr.bf16.mxu1 %v7884_v49 }
 0x2a8   : > { %5582 = vmatprep.mubr.bf16.mxu0 %v7984_v46  ;;  %5684 = vmatprep.mubr.bf16.mxu1 %v7984_v46  ;;  %v7892_v46 = vld [vmem:[#allocation2 + $0xfb0] ss:$20 sps:$4 sm:$0xff]  }
 0x2aa   : > { %6804 = vmatpush3.bf16.msra.mxu0 %v7883_v25  ;;  %6922 = vmatpush3.bf16.msra.mxu1 %v7884_v49 }
 0x2ab   : > { %6805 = vmatprep.subr.bf16.mxu0 %v7885_v55  ;;  %6923 = vmatprep.subr.bf16.mxu1 %v7887_v0 }
 0x2ad   : > { %5583 = vmatmul.mubr.bf16.gmra.mrb[72].mxu0 %v8419_v16  ;;  %5685 = vmatmul.mubr.bf16.gmra.mrb[56].mxu1 %v8419_v16 }
 0x2ae   : > { %6806 = vmatpush3.bf16.msra.mxu0 %v7886_v36  ;;  %6924 = vmatpush3.bf16.msra.mxu1 %v7887_v0 }
 0x2af   : > { %6807 = vmatprep.subr.bf16.mxu0 %v7888_v32  ;;  %6925 = vmatprep.subr.bf16.mxu1 %v7890_v33 }
 0x2b0   : > { %5725 = vmatprep.mubr.bf16.mxu0 %v8366_v51  ;;  %6935 = vmatprep.mubr.bf16.mxu1 %v4858_v23  ;;  %v7900_v51 = vld [vmem:[#allocation2 + $0x1168] ss:$20 sps:$4 sm:$0xff]  }
 0x2b2   : > { %6808 = vmatpush3.bf16.msra.mxu0 %v7889_v11  ;;  %6926 = vmatpush3.bf16.msra.mxu1 %v7890_v33 }
 0x2b3   : > { %6809 = vmatprep.subr.bf16.mxu0 %v7891_v34  ;;  %6927 = vmatprep.subr.bf16.mxu1 %v7893_v38 }
 0x2b6   : > { %6810 = vmatpush3.bf16.msra.mxu0 %v7892_v46  ;;  %6928 = vmatpush3.bf16.msra.mxu1 %v7893_v38 }
 0x2b7   : > { %6811 = vmatprep.subr.bf16.mxu0 %v7894_v39  ;;  %6929 = vmatprep.subr.bf16.mxu1 %v7896_v41 }
 0x2ba   : > { %6812 = vmatpush3.bf16.msra.mxu0 %v7895_v44  ;;  %6930 = vmatpush3.bf16.msra.mxu1 %v7896_v41 }
 0x2bb   : > { %6813 = vmatprep.subr.bf16.mxu0 %v7897_v40  ;;  %6931 = vmatprep.subr.bf16.mxu1 %v7899_v56  ;;  %v8463_v40 = vld [vmem:[#allocation4] sm:$0x1f] }
 0x2be   : > { %6814 = vmatpush3.bf16.msra.mxu0 %v7898_v45  ;;  %6932 = vmatpush3.bf16.msra.mxu1 %v7899_v56 }
 0x2bf   : > { %6815 = vmatprep.subr.bf16.mxu0 %v7900_v51  ;;  %6933 = vmatprep.subr.bf16.mxu1 %v7902_v61 }
 0x2c2   : > { %6816 = vmatpush3.bf16.msra.mxu0 %v7901_v28  ;;  %6934 = vmatpush3.bf16.msra.mxu1 %v7902_v61 }
 0x2c5   : > { %5726 = vmatmul.mubr.bf16.vlgmr.msra.gmra.mrb[76].mxu0 %v8391_v21  ;;  %6936 = vmatmul.mubr.bf16.vlgmr.msra.gmra.mrb[60].mxu1 %v8419_v16 }
 0x2c6   : > { %5733 = vmatprep.mubr.bf16.mxu0 %v8360_v35 }
 0x2cd   : > { %5734 = vmatmul.mubr.bf16.gmra.mrb[80].mxu0 %v8383_v9 }
 0x2e0   : > { %v4423_v52 = vpop.f32.mrb[52].mxu0  ;;  %v4525_v59 = vpop.f32.mrb[40].mxu1 }
 0x2e1   : > { %v4425_v60 = vpop.f32.mrb[53].mxu0  ;;  %v4527_v48 = vpop.f32.mrb[41].mxu1 }
 0x2e2   : > { %v4427_v50 = vpop.f32.mrb[54].mxu0  ;;  %v4529_v13 = vpop.f32.mrb[42].mxu1 }
 0x2e3   : > { %v4428_v2 = vpop.f32.mrb[55].mxu0  ;;  %v4530_v47 = vpop.f32.mrb[43].mxu1 }
 0x300   : > { %v4474_v53 = vpop.f32.mrb[56].mxu0  ;;  %v4576_v3 = vpop.f32.mrb[44].mxu1 }
 0x301   : > { %v4475_v63 = vadd.f32 %v4474_v53, %v4423_v52  ;;  %v4577_v4 = vadd.f32 %v4576_v3, %v4525_v59  ;;  %v4476_v62 = vpop.f32.mrb[57].mxu0  ;;  %v4578_v21 = vpop.f32.mrb[45].mxu1 }
 0x302   : > { %v4477_v1 = vadd.f32 %v4476_v62, %v4425_v60  ;;  %v4579_v6 = vadd.f32 %v4578_v21, %v4527_v48  ;;  %v4478_v7 = vpop.f32.mrb[58].mxu0  ;;  %v4580_v35 = vpop.f32.mrb[46].mxu1 }
 0x303   : > { %v8439_v9 = vadd.f32 %v4475_v63, %v8394_v18  ;;  %v8442_v58 = vadd.f32 %v4577_v4, %v8397_v19  ;;  %v4479_v27 = vpop.f32.mrb[59].mxu0  ;;  %v4581_v12 = vpop.f32.mrb[47].mxu1 }
 0x304   : > { %v8445_v14 = vadd.f32 %v4477_v1, %v8400_v54  ;;  %v8448_v15 = vadd.f32 %v4579_v6, %v8403_v43 }
 0x318   : > { %v6779_v8 = vpop.f32.mrb[60].mxu0  ;;  %v6917_v16 = vpop.f32.mrb[48].mxu1 }
 0x319   : > { %v6780_v24 = vpop.f32.mrb[61].mxu0  ;;  %v4665_v37 = vpop.f32.mrb[49].mxu1 }
 0x31a   : > { %v6781_v20 = vadd.f32 %v6780_v24, %v6779_v8  ;;  %v6782_v57 = vpop.f32.mrb[62].mxu0  ;;  %v6918_v10 = vpop.f32.mrb[50].mxu1 }
 0x31b   : > { %v6783_v18 = vpop.f32.mrb[63].mxu0  ;;  %v4668_v23 = vpop.f32.mrb[51].mxu1 }
 0x31c   : > { %v6784_v26 = vadd.f32 %v6783_v18, %v6782_v57  ;;  %v4666_v19 = vadd.f32 %v6781_v20, %v4665_v37 }
 0x31e   : > { %v8451_v42 = vadd.f32 %v4666_v19, %v8416_v31  ;;  %v4669_v17 = vadd.f32 %v6784_v26, %v4668_v23 }
 0x320   : > { %v8454_v54 = vadd.f32 %v4669_v17, %v8422_v22  ;;  %v6785_v43 = vpop.f32.mrb[64].mxu0  ;;  %v5806_v22 = vlaneseq }
 0x321   : > { %v6786_v49 = vpop.f32.mrb[65].mxu0 }
 0x322   : > { %v6787_v29 = vadd.f32 %v6786_v49, %v6785_v43  ;;  %v6788_v30 = vpop.f32.mrb[66].mxu0  ;;  %v8459_v39 = vshrl.u32 %v5806_v22, 7 }
 0x323   : > { %v6789_v25 = vpop.f32.mrb[67].mxu0 }
 0x324   : > { %v4674_v55 = vadd.f32 %v6917_v16, %v6787_v29  ;;  %v5808_v41 = vsub.s32 0, %v8459_v39  ;;  %v5816_v44 = vsub.s32 2, %v8459_v39  ;;  %v5820_v56 = vsub.s32 3, %v8459_v39 }
 0x326   : > { %v8457_v0 = vadd.f32 %v4674_v55, %v8427_v5  ;;  %v5812_v5 = vsub.s32 1, %v8459_v39  ;;  %v5809_v45 = vrot.slane %v8463_v40, %v5808_v41  ;;  %v5817_v51 = vrot.slane %v8463_v40, %v5816_v44 }
 0x327   : > { %v5821_v28 = vrot.slane %v8463_v40, %v5820_v56 }
 0x328   : > { %v5813_v61 = vrot.slane %v8463_v40, %v5812_v5 }
 0x360   : > { %v5533_v36 = vpop.f32.mrb[68].mxu0  ;;  %v5635_v32 = vpop.f32.mrb[52].mxu1 }
 0x361   : > { %v5535_v33 = vpop.f32.mrb[69].mxu0  ;;  %v5637_v11 = vpop.f32.mrb[53].mxu1 }
 0x362   : > { %v5537_v34 = vpop.f32.mrb[70].mxu0  ;;  %v5639_v31 = vpop.f32.mrb[54].mxu1 }
 0x363   : > { %v5538_v38 = vpop.f32.mrb[71].mxu0  ;;  %v5640_v46 = vpop.f32.mrb[55].mxu1 }
 0x378   : > { %v5574_v52 = vpop.f32.mrb[0].mxu0  ;;  %v5676_v59 = vpop.f32.mrb[0].mxu1 }
 0x379   : > { %v5831_v60 = vadd.f32 %v5809_v45, %v5574_v52  ;;  %v5833_v48 = vadd.f32 %v5817_v51, %v5676_v59  ;;  %v5576_v50 = vpop.f32.mrb[1].mxu0  ;;  %v5678_v13 = vpop.f32.mrb[1].mxu1 }
 0x37a   : > { %v5832_v2 = vadd.f32 %v5813_v61, %v5576_v50  ;;  %v5834_v47 = vadd.f32 %v5821_v28, %v5678_v13  ;;  %v5578_v53 = vpop.f32.mrb[2].mxu0  ;;  %v5680_v3 = vpop.f32.mrb[2].mxu1 }
 0x37b   : > { %v5846_v63 = vmax.f32 %v5831_v60, 0.0  ;;  %v5848_v4 = vmax.f32 %v5833_v48, 0.0  ;;  %v5836_v62 = vadd.f32 %v5809_v45, %v5578_v53  ;;  %v5838_v21 = vadd.f32 %v5817_v51, %v5680_v3  ;;  %v5580_v1 = vpop.f32.mrb[3].mxu0  ;;  %v5682_v6 = vpop.f32.mrb[3].mxu1 }
 0x37c   : > { %v5847_v7 = vmax.f32 %v5832_v2, 0.0  ;;  %v5849_v35 = vmax.f32 %v5834_v47, 0.0  ;;  %v5837_v27 = vadd.f32 %v5813_v61, %v5580_v1  ;;  %v5839_v12 = vadd.f32 %v5821_v28, %v5682_v6 }
 0x37d   : > { %v5851_v8 = vmax.f32 %v5836_v62, 0.0  ;;  %v5853_v16 = vmax.f32 %v5838_v21, 0.0  ;;  %v5824_v48 = vsub.s32 4, %v8459_v39 }
 0x37e   : > { %v6640_v24 = vpack.c.bf16 %v5847_v7, %v5846_v63  ;;  %v6641_v37 = vpack.c.bf16 %v5849_v35, %v5848_v4  ;;  %v5852_v20 = vmax.f32 %v5837_v27, 0.0  ;;  %v5854_v57 = vmax.f32 %v5839_v12, 0.0 }
 0x37f   : > { %v5825_v47 = vrot.slane %v8463_v40, %v5824_v48 }
 0x380   : > { %5914 = vst [vmem:[%s8475_s13] sm:$0xff] %v6640_v24  ;;  %5915 = vst [vmem:[%s8475_s13 + $0x8] sm:$0xff] %v6641_v37  ;;  %v6643_v10 = vpack.c.bf16 %v5852_v20, %v5851_v8  ;;  %v6644_v18 = vpack.c.bf16 %v5854_v57, %v5853_v16  ;;  %v5584_v23 = vpop.f32.mrb[72].mxu0  ;;  %v5686_v26 = vpop.f32.mrb[56].mxu1 }
 0x381   : > { %v5585_v19 = vadd.f32 %v5584_v23, %v5533_v36  ;;  %v5687_v17 = vadd.f32 %v5686_v26, %v5635_v32  ;;  %v5586_v43 = vpop.f32.mrb[73].mxu0  ;;  %v5688_v49 = vpop.f32.mrb[57].mxu1 }
 0x382   : > { %5917 = vst [vmem:[%s8475_s13 + $0x14] sm:$0xff] %v6643_v10  ;;  %5918 = vst [vmem:[%s8475_s13 + $0x1c] sm:$0xff] %v6644_v18  ;;  %v5587_v29 = vadd.f32 %v5586_v43, %v5535_v33  ;;  %v5689_v30 = vadd.f32 %v5688_v49, %v5637_v11  ;;  %v5588_v25 = vpop.f32.mrb[74].mxu0  ;;  %v5690_v55 = vpop.f32.mrb[58].mxu1 }
 0x383   : > { %v5799_v34 = vadd.f32 %v5585_v19, %v8439_v9  ;;  %v5801_v31 = vadd.f32 %v5687_v17, %v8442_v58  ;;  %v5589_v38 = vpop.f32.mrb[75].mxu0  ;;  %v5691_v46 = vpop.f32.mrb[59].mxu1 }
 0x384   : > { %v5800_v22 = vadd.f32 %v5587_v29, %v8445_v14  ;;  %v5802_v36 = vadd.f32 %v5689_v30, %v8448_v15 }
 0x385   : > { %v5841_v32 = vadd.f32 %v5809_v45, %v5799_v34  ;;  %v5843_v41 = vadd.f32 %v5817_v51, %v5801_v31 }
 0x386   : > { %v5842_v44 = vadd.f32 %v5813_v61, %v5800_v22  ;;  %v5844_v5 = vadd.f32 %v5821_v28, %v5802_v36 }
 0x387   : > { %v5856_v33 = vmax.f32 %v5841_v32, 0.0  ;;  %v5858_v11 = vmax.f32 %v5843_v41, 0.0 }
 0x388   : > { %v5857_v56 = vmax.f32 %v5842_v44, 0.0  ;;  %v5859_v52 = vmax.f32 %v5844_v5, 0.0 }
 0x38a   : > { %v6646_v59 = vpack.c.bf16 %v5857_v56, %v5856_v33  ;;  %v6647_v9 = vpack.c.bf16 %v5859_v52, %v5858_v11 }
 0x38c   : > { %5920 = vst [vmem:[%s8475_s13 + $0x28] sm:$0x33] %v6646_v59  ;;  %5921 = vst [vmem:[%s8475_s13 + $0x30] sm:$0x33] %v6647_v9 }
 0x398   : > { %v6817_v58 = vpop.f32.mrb[76].mxu0  ;;  %v6937_v60 = vpop.f32.mrb[60].mxu1 }
 0x399   : > { %v6818_v50 = vpop.f32.mrb[77].mxu0  ;;  %v5775_v14 = vpop.f32.mrb[61].mxu1 }
 0x39a   : > { %v6819_v13 = vadd.f32 %v6818_v50, %v6817_v58  ;;  %v6820_v15 = vpop.f32.mrb[78].mxu0  ;;  %v6938_v45 = vpop.f32.mrb[62].mxu1 }
 0x39b   : > { %v6821_v51 = vpop.f32.mrb[79].mxu0  ;;  %v5778_v61 = vpop.f32.mrb[63].mxu1 }
 0x39c   : > { %v6822_v28 = vadd.f32 %v6821_v51, %v6820_v15  ;;  %v5776_v2 = vadd.f32 %v6819_v13, %v5775_v14 }
 0x39e   : > { %v5793_v53 = vadd.f32 %v5776_v2, %v8451_v42  ;;  %v5779_v3 = vadd.f32 %v6822_v28, %v5778_v61 }
 0x3a0   : > { %v5835_v63 = vadd.f32 %v5825_v47, %v5793_v53  ;;  %v5798_v4 = vadd.f32 %v5779_v3, %v8454_v54  ;;  %v6823_v39 = vpop.f32.mrb[80].mxu0 }
 0x3a1   : > { %v6824_v62 = vpop.f32.mrb[81].mxu0 }
 0x3a2   : > { %v5850_v21 = vmax.f32 %v5835_v63, 0.0  ;;  %v5840_v1 = vadd.f32 %v5825_v47, %v5798_v4  ;;  %v6825_v6 = vadd.f32 %v6824_v62, %v6823_v39  ;;  %v6826_v7 = vpop.f32.mrb[82].mxu0 }
 0x3a3   : > { %v6827_v35 = vpop.f32.mrb[83].mxu0 }
 0x3a4   : > { %v6642_v27 = vpack.c.bf16 %v5850_v21, %v5850_v21  ;;  %v5855_v12 = vmax.f32 %v5840_v1, 0.0  ;;  %v5784_v8 = vadd.f32 %v6937_v60, %v6825_v6 }
 0x3a6   : > { %5916 = vst [vmem:[%s8475_s13 + $0x10] sm:$0xf] %v6642_v27  ;;  %v6645_v40 = vpack.c.bf16 %v5855_v12, %v5855_v12  ;;  %v5803_v42 = vadd.f32 %v5784_v8, %v8457_v0 }
 0x3a8   : > { %5919 = vst [vmem:[%s8475_s13 + $0x24] sm:$0xf] %v6645_v40  ;;  %v5845_v16 = vadd.f32 %v5825_v47, %v5803_v42 }
 0x3aa   : > { %v5860_v24 = vmax.f32 %v5845_v16, 0.0 }
 0x3ac   : > { %v6648_v37 = vpack.c.bf16 %v5860_v24, %v5860_v24 }
 0x3ae   : > { %5922 = vst [vmem:[%s8475_s13 + $0x38] sm:$0x3] %v6648_v37 }
 0x3af PF: > { %s15_s12 = sadd.s32 1, %s7978_s12  }
 0x3b0   : > { %p12_p9 = scmp.ge.s32.totalorder %s15_s12, 4  }
 0x3b2   :  { %14 = sbr.rel (!%p12_p9) target bundleno = 2 (0x2), region = 75 }
 0x3b9   :  { %5944 = vsyncpa [#allocation3], 1 }
 0x3ba   :  { %5946 = vsyncpa [#allocation3 + $0x1], 1 }
 0x3bb   :  { %5947 = vsyncpa [#allocation5], 1 }

// kernel: cnn_forward.7
= control target key start
LH: loop header
LB: loop body
LE: loop exit
PB: predicated region body
PF: predicated region fallthrough
CT: control target
= control target key end

     0   :  { %v107_v29 = vlaneseq  ;;  %v817_v32 = vmov 1966171168   ;;  %v818_v36 = vmov 0.0   ;;  %s1001_s0 = inlined_call_operand.vmem [shape: bf16[2,576], index: 0, kind: input, shape index: {}]   ;;  %s1002_s1 = inlined_call_operand.vmem [shape: bf16[576,100], index: 1, kind: input, shape index: {}]   ;;  %s1003_s2 = inlined_call_operand.vmem [shape: f32[1,100], index: 2, kind: input, shape index: {}]   ;;  %s1004_s3 = inlined_call_operand.vmem [shape: bf16[100,10], index: 3, kind: input, shape index: {}]   ;;  %s1005_s4 = inlined_call_operand.vmem [shape: f32[1,10], index: 4, kind: input, shape index: {}]   ;;  %s1006_s5 = inlined_call_operand.hbm [shape: f32[2,10], index: 5, kind: output, shape index: {}]  }
   0x1   :  { %v749_v0 = vld [vmem:[%s1002_s1 + $0x40] sm:$0xff]   ;;  %v753_v4 = vld [vmem:[%s1002_s1 + $0x48] sm:$0xff]   ;;  %v757_v8 = vld [vmem:[%s1002_s1 + $0x50] sm:$0xff]   ;;  %v105_v33 = vunpack.c.l.s4 %v817_v32 }
   0x2   :  { %v750_v1 = vld [vmem:[%s1002_s1] sm:$0xff]   ;;  %658 = vmatprep.subr.bf16.mxu0 %v749_v0  ;;  %v754_v5 = vld [vmem:[%s1002_s1 + $0x8] sm:$0xff]   ;;  %v758_v9 = vld [vmem:[%s1002_s1 + $0x10] sm:$0xff]   ;;  %v108_v34 = vshrl.u32 %v107_v29, 7 }
   0x3   :  { %v751_v2 = vld [vmem:[%s1002_s1 + $0xc0] sm:$0xff]   ;;  %659 = vmatpush3.bf16.msra.mxu0 %v750_v1  ;;  %v755_v6 = vld [vmem:[%s1002_s1 + $0xc8] sm:$0xff]   ;;  %v759_v10 = vld [vmem:[%s1002_s1 + $0xd0] sm:$0xff]   ;;  %v106_v37 = vunpack.c.0.s8 %v105_v33 }
   0x4   :  { %v752_v3 = vld [vmem:[%s1002_s1 + $0x80] sm:$0xff]   ;;  %680 = vmatprep.subr.bf16.mxu1 %v751_v2  ;;  %660 = vmatprep.subr.bf16.mxu0 %v753_v4  ;;  %v756_v7 = vld [vmem:[%s1002_s1 + $0x88] sm:$0xff]   ;;  %v760_v11 = vld [vmem:[%s1002_s1 + $0x90] sm:$0xff]  }
   0x5   :  { %681 = vmatpush3.bf16.msra.mxu1 %v752_v3  ;;  %v761_v12 = vld [vmem:[%s1002_s1 + $0x58] sm:$0xff]   ;;  %v765_v16 = vld [vmem:[%s1002_s1 + $0x60] sm:$0xff]   ;;  %v769_v20 = vld [vmem:[%s1002_s1 + $0x68] sm:$0xff]   ;;  %v109_v39 = vsub.s32 %v106_v37, %v108_v34 }
   0x6   :  { %682 = vmatprep.subr.bf16.mxu1 %v755_v6  ;;  %v762_v13 = vld [vmem:[%s1002_s1 + $0x18] sm:$0xff]   ;;  %v766_v17 = vld [vmem:[%s1002_s1 + $0x20] sm:$0xff]   ;;  %v770_v21 = vld [vmem:[%s1002_s1 + $0x28] sm:$0xff]  }
   0x7   :  { %661 = vmatpush3.bf16.msra.mxu0 %v754_v5  ;;  %v763_v14 = vld [vmem:[%s1002_s1 + $0xd8] sm:$0xff]   ;;  %v767_v18 = vld [vmem:[%s1002_s1 + $0xe0] sm:$0xff]   ;;  %v771_v22 = vld [vmem:[%s1002_s1 + $0xe8] sm:$0xff]  }
   0x8   :  { %662 = vmatprep.subr.bf16.mxu0 %v757_v8  ;;  %v764_v15 = vld [vmem:[%s1002_s1 + $0x98] sm:$0xff]   ;;  %v768_v19 = vld [vmem:[%s1002_s1 + $0xa0] sm:$0xff]   ;;  %v772_v23 = vld [vmem:[%s1002_s1 + $0xa8] sm:$0xff]  }
   0x9   :  { %683 = vmatpush3.bf16.msra.mxu1 %v756_v7  ;;  %v773_v24 = vld [vmem:[%s1002_s1 + $0x70] sm:$0xff]   ;;  %v777_v28 = vld [vmem:[%s1002_s1 + $0x78] sm:$0xff]   ;;  %v22_v38 = vld [vmem:[%s1001_s0] sm:$0x1f] }
   0xa   :  { %684 = vmatprep.subr.bf16.mxu1 %v759_v10  ;;  %v774_v25 = vld [vmem:[%s1002_s1 + $0x30] sm:$0xff]   ;;  %v778_v30 = vld [vmem:[%s1002_s1 + $0x38] sm:$0xff]   ;;  %v110_v40 = vrot.slane %v22_v38, %v109_v39 }
   0xb   :  { %663 = vmatpush3.bf16.msra.mxu0 %v758_v9  ;;  %v775_v26 = vld [vmem:[%s1002_s1 + $0xf0] sm:$0xff]   ;;  %v779_v31 = vld [vmem:[%s1002_s1 + $0xf8] sm:$0xff]  }
   0xc   :  { %664 = vmatprep.subr.bf16.mxu0 %v761_v12  ;;  %v776_v27 = vld [vmem:[%s1002_s1 + $0xb0] sm:$0xff]   ;;  %v781_v35 = vld [vmem:[%s1002_s1 + $0xb8] sm:$0xff]   ;;  %v118_v41 = vcombine.high %v110_v40, %v110_v40  ;;  %v125_v42 = vrot.slane %v110_v40, %v109_v39 }
   0xd   :  { %685 = vmatpush3.bf16.msra.mxu1 %v760_v11 }
   0xe   :  { %686 = vmatprep.subr.bf16.mxu1 %v763_v14 }
   0xf   :  { %665 = vmatpush3.bf16.msra.mxu0 %v762_v13 }
  0x10   :  { %666 = vmatprep.subr.bf16.mxu0 %v765_v16 }
  0x11   :  { %687 = vmatpush3.bf16.msra.mxu1 %v764_v15 }
  0x12   :  { %688 = vmatprep.subr.bf16.mxu1 %v767_v18 }
  0x13   :  { %667 = vmatpush3.bf16.msra.mxu0 %v766_v17 }
  0x14   :  { %668 = vmatprep.subr.bf16.mxu0 %v769_v20 }
  0x15   :  { %689 = vmatpush3.bf16.msra.mxu1 %v768_v19 }
  0x16   :  { %690 = vmatprep.subr.bf16.mxu1 %v771_v22 }
  0x17   :  { %669 = vmatpush3.bf16.msra.mxu0 %v770_v21 }
  0x18   :  { %670 = vmatprep.subr.bf16.mxu0 %v773_v24 }
  0x19   :  { %691 = vmatpush3.bf16.msra.mxu1 %v772_v23 }
  0x1a   :  { %692 = vmatprep.subr.bf16.mxu1 %v775_v26 }
  0x1b   :  { %671 = vmatpush3.bf16.msra.mxu0 %v774_v25 }
  0x1c   :  { %672 = vmatprep.subr.bf16.mxu0 %v777_v28 }
  0x1d   :  { %693 = vmatpush3.bf16.msra.mxu1 %v776_v27 }
  0x1e   :  { %694 = vmatprep.subr.bf16.mxu1 %v779_v31 }
  0x1f   :  { %673 = vmatpush3.bf16.msra.mxu0 %v778_v30 }
  0x20   :  { %715 = vmatprep.subr.bf16.mxu0 %v818_v36 }
  0x21   :  { %695 = vmatpush3.bf16.msra.mxu1 %v781_v35 }
  0x22   :  { %727 = vmatprep.subr.bf16.mxu1 %v818_v36 }
  0x23   :  { %10 = vsyncpa [#allocation3], 0  ;;  %v139_v43 = vrot.slane %v118_v41, %v109_v39  ;;  %v782_v44 = vld [vmem:[%s1002_s1 + $0x100] sm:$0xff]   ;;  %v140_v45 = vcombine.high %v125_v42, %v125_v42  ;;  %v783_v48 = vld [vmem:[%s1002_s1 + $0x108] sm:$0xff]   ;;  %vm819_vm0 = vmmov 0   ;;  %v103_v49 = vcombine.high %v22_v38, %v22_v38  ;;  %s820_s6 = smov [#allocation2]  }
  0x24   :  { %v786_v47 = vld [vmem:[%s1004_s3] sm:$0xff]   ;;  %v784_v50 = vld [vmem:[%s1002_s1 + $0x110] sm:$0xff]   ;;  %v785_v52 = vld [vmem:[%s1002_s1 + $0x118] sm:$0xff]   ;;  %vm362_vm1 = vcmask 523264   ;;  %vm551_vm2 = vcmask 1041408   ;;  %vm547_vm3 = vcmask 818176  }
  0x25   :  { %398 = vmatprep.mubr.bf16.mxu0 %v139_v43  ;;  %v141_v46 = vcombine.high %v139_v43, %v139_v43  ;;  %v117_v51 = vrot.slane %v103_v49, %v109_v39  ;;  %v787_v54 = vld [vmem:[%s1004_s3 + $0x8] sm:$0xff]   ;;  %v788_v55 = vld [vmem:[%s1004_s3 + $0x10] sm:$0xff]   ;;  %v789_v56 = vld [vmem:[%s1004_s3 + $0x18] sm:$0xff]   ;;  %s603_s7 = sshll.u32 %s820_s6, 4  ;;  %vm595_vm4 = vcmask 74752   ;;  %s604_s7 = int_to_ptr.vmem [resolvable:$true] %s603_s7 }
  0x26   :  { %399 = vmatmul.mubr.bf16.vlgmr.msra.gmra.mrb[0].mxu0 %v125_v42  ;;  %v790_v57 = vld [vmem:[%s1004_s3 + $0x20] sm:$0xff]   ;;  %v791_v58 = vld [vmem:[%s1004_s3 + $0x28] sm:$0xff]   ;;  %v792_v59 = vld [vmem:[%s1004_s3 + $0x30] ss:$0 sps:$4 sm:$0x33]   ;;  %s793_s8 = scalar_lea.vmem %s604_s7, 32  ;;  %p798_p1 = scmp.lt.s32.totalorder %s604_s7, %s604_s7 }
  0x27   :  { %438 = vmatprep.mubr.bf16.mxu1 %v141_v46  ;;  %716 = vmatpush3.bf16.msra.mxu0 %v782_v44  ;;  %v132_v53 = vrot.slane %v117_v51, %v109_v39  ;;  %v553_v60 = vsel %vm551_vm2, %v792_v59, 0  ;;  %v611_v62 = vld [vmem:[%s1003_s2] ss:$0 sm:$0xff]  ;;  %p794_p0 = scmp.ne.s32.totalorder %s604_s7, %s793_s8  ;;  %p799_p2 = scmp.lt.s32.totalorder %s793_s8, %s793_s8 }
  0x28   :  { %439 = vmatmul.mubr.bf16.vlgmr.msra.gmra.mrb[0].mxu1 %v140_v45  ;;  %717 = vmatprep.subr.bf16.mxu0 %v818_v36  ;;  %v649_v17 = vld [vmem:[%s1005_s4] ss:$0 sm:$0xff] }
  0x29   :  { %723 = vmatprep.mubr.msk.bf16.mxu0 %vm819_vm0, %v818_v36  ;;  %728 = vmatpush3.bf16.msra.mxu1 %v786_v47  ;;  %p800_p3 = por %p799_p2, %p798_p1 }
  0x2a   :  { %729 = vmatprep.subr.bf16.mxu1 %v818_v36  ;;  %741 = vmatprep.mubr.msk.bf16.mxu1 %vm819_vm0, %v818_v36 }
  0x2b   :  { %718 = vmatpush3.bf16.msra.mxu0 %v783_v48  ;;  %p801_p4 = pnand %p800_p3, %p794_p0 }
  0x2c   :  { %719 = vmatprep.subr.bf16.mxu0 %v818_v36 }
  0x2d   :  { %730 = vmatpush3.bf16.msra.mxu1 %v787_v54 }
  0x2e   :  { %731 = vmatprep.subr.bf16.mxu1 %v818_v36 }
  0x2f   :  { %720 = vmatpush3.bf16.msra.mxu0 %v784_v50 }
  0x30   :  { %721 = vmatprep.subr.bf16.mxu0 %v818_v36 }
  0x31   :  { %732 = vmatpush3.bf16.msra.mxu1 %v788_v55 }
  0x32   :  { %733 = vmatprep.subr.bf16.mxu1 %v818_v36 }
  0x33   :  { %722 = vmatpush3.bf16.msra.mxu0 %v785_v52 }
  0x35   :  { %734 = vmatpush3.bf16.msra.mxu1 %v789_v56 }
  0x36   :  { %724 = vmatmul.mubr.msk.bf16.vlgmr.msra.gmra.mrb[4].mxu0 %vm362_vm1, %v132_v53  ;;  %735 = vmatprep.subr.bf16.mxu1 %v818_v36 }
  0x39   :  { %736 = vmatpush3.bf16.msra.mxu1 %v790_v57 }
  0x3a   :  { %737 = vmatprep.subr.bf16.mxu1 %v818_v36 }
  0x3d   :  { %738 = vmatpush3.bf16.msra.mxu1 %v791_v58 }
  0x3e   :  { %739 = vmatprep.subr.bf16.mxu1 %v818_v36 }
  0x41   :  { %740 = vmatpush3.bf16.msra.mxu1 %v553_v60 }
  0xf9   :  { %v674_v61 = vpop.f32.mrb[0].mxu0 }
  0xfa   :  { %v675_v63 = vpop.f32.mrb[1].mxu0 }
  0xfb   :  { %v676_v0 = vadd.f32 %v675_v63, %v674_v61  ;;  %v677_v1 = vpop.f32.mrb[2].mxu0  ;;  %v696_v2 = vpop.f32.mrb[0].mxu1 }
  0xfc   :  { %v678_v3 = vpop.f32.mrb[3].mxu0  ;;  %v697_v4 = vpop.f32.mrb[1].mxu1 }
  0xfd   :  { %v401_v5 = vadd.f32 %v676_v0, %v611_v62  ;;  %v698_v6 = vadd.f32 %v697_v4, %v696_v2  ;;  %v699_v7 = vpop.f32.mrb[2].mxu1 }
  0xfe   :  { %v700_v8 = vpop.f32.mrb[3].mxu1 }
  0xff   :  { %v441_v9 = vadd.f32 %v698_v6, %v401_v5 }
 0x109   :  { %v480_v10 = vpop.f32.mrb[4].mxu0 }
 0x10a   :  { %v481_v11 = vadd.f32 %v480_v10, %v441_v9  ;;  %v725_v12 = vpop.f32.mrb[5].mxu0 }
 0x10b   :  { %v483_v13 = vpop.f32.mrb[6].mxu0 }
 0x10c   :  { %v486_v14 = vmax.f32 %v481_v11, 0.0  ;;  %v726_v15 = vpop.f32.mrb[7].mxu0 }
 0x10e   :  { %v487_v16 = vpack.c.bf16 %v486_v14, %v486_v14 }
 0x110   :  { %742 = vmatmul.mubr.msk.bf16.vlgmr.msra.gmra.mrb[4].mxu1 %vm547_vm3, %v487_v16 }
 0x1e3   :  { %v589_v18 = vpop.f32.mrb[4].mxu1 }
 0x1e4   :  { %v590_v19 = vadd.f32 %v649_v17, %v589_v18  ;;  %v743_v20 = vpop.f32.mrb[5].mxu1 }
 0x1e5   :  { %v592_v21 = vpop.f32.mrb[6].mxu1 }
 0x1e6   :  { %v744_v22 = vpop.f32.mrb[7].mxu1  ;;  %596 = vst.msk [vmem:[#allocation2] sm:$0x3] %vm595_vm4, %v590_v19 }
 0x1e7   :  { %804 = shalt.err (!%p801_p4)
}
 0x1e8   :  { %s805_s4 = scalar_lea.hbm %s1006_s5, 32 }
 0x1e9   :  { %p806_p5 = scmp.ne.s32.totalorder %s1006_s5, %s805_s4  ;;  %p809_p6 = scmp.lt.u32.totalorder %s805_s4, %s1006_s5 }
 0x1eb   :  { %p811_p7 = pnand %p809_p6, %p806_p5 }
 0x1ed   :  { %814 = shalt.err (!%p811_p7)
}
 0x1ee   :  { %606 = dma.vmem_to_hbm [thread:$0]  %s604_s7, 32, %s1006_s5, [#allocation3]  }
 0x1ef   :  { %815 = dma.done.wait [#allocation3], 32  }
 0x1f0   :  { %816 = vsyncadd [#allocation3], 4294967264 }
 0x1f1   :  { %610 = vsyncpa [#allocation3], 1 }

</bundles_post_ra>
